<compile_context>
chip_gen: v7x
topology: tpu7x:2x2x1
jax: 0.10.0
libtpu: 0.0.40
codegen_flags: <defaults>
</compile_context>

<pallas_src>
import functools

import jax
import jax.numpy as jnp
import numpy as np
from jax.experimental import pallas as pl
from jax.experimental.pallas import tpu as pltpu


def _cbam_kernel(f_ref, w1t_ref, b1_ref, w2_ref, b2_ref, cwv_ref, cb_ref,
                 mask_ref, out_ref, *, W, K, LPAD):
    f = f_ref[...].astype(jnp.float32)                   # (nb, C, HW) lane-dense
    nb, C, HW = f.shape
    P = K // 2

    # ---------------- MC: channel attention (batched over nb samples) -------
    f_mean = jnp.mean(f, axis=2)                         # (nb, C) lane reduce
    f_max = jnp.max(f, axis=2)                           # (nb, C)
    x = jnp.concatenate([f_mean, f_max], axis=0)         # (2*nb, C): mean rows | max rows

    w1t = w1t_ref[...].astype(jnp.float32)               # (bott, C) (= w1.T)
    w2 = w2_ref[...].astype(jnp.float32)                 # (bott, C)
    b2 = b2_ref[...].astype(jnp.float32)                 # (1, C)
    bott = w1t.shape[0]

    # Shared 2-layer MLP, VPU-only (bott is tiny; do NOT push this to the MXU).
    mlp = jnp.zeros((2 * nb, C), jnp.float32)
    for j in range(bott):
        hj = jnp.sum(x * w1t[j:j + 1, :], axis=1, keepdims=True) + b1_ref[j]
        hj = jnp.maximum(hj, 0.0)                        # (2*nb, 1)
        mlp = mlp + hj * w2[j:j + 1, :]                  # (2*nb, C)
    mlp = mlp + b2
    # Matches the PyTorch module: sigmoid only on the mean branch.
    ca = jax.nn.sigmoid(mlp[:nb]) + mlp[nb:]             # (nb, C)
    f1 = f * ca[:, :, None]                              # (nb, C, HW) lane-dense scale

    # ---------------- MS: spatial attention (on f1) -------------------------
    s_avg = jnp.mean(f1, axis=1)                         # (nb, HW) sublane reduce
    s_max = jnp.max(f1, axis=1)                          # (nb, HW)
    # Stack every sample's avg map then every sample's max map onto sublanes,
    # so the 49-tap loop works on full vregs.
    s2 = jnp.concatenate([s_avg, s_max], axis=0)         # (2*nb, HW)

    # Zero-halo buffer rounded to whole vregs; s2 sits at a 128-aligned offset.
    zpad = jnp.zeros((2 * nb, LPAD), jnp.float32)
    g = jnp.concatenate([zpad, s2, zpad], axis=1)        # (2*nb, HW + 2*LPAD)

    cwv = cwv_ref[...].astype(jnp.float32)               # (2*nb, K*K) VMEM resident
    masks = mask_ref[...]                                # (K, HW) column-validity masks

    acc = jnp.zeros((2 * nb, HW), jnp.float32)
    for bi in range(K):                                  # horizontal offset b = bi - P
        b = bi - P
        part = jnp.zeros((2 * nb, HW), jnp.float32)
        for ai in range(K):                              # vertical offset a = ai - P
            a = ai - P
            off = LPAD + a * W + b                       # shifted flat-index origin
            t = ai * K + bi                              # row-major (K,K) weight index
            # One fused FMA per tap: both pooled channels of every sample.
            part = part + g[:, off:off + HW] * cwv[:, t:t + 1]
        if b == 0:
            acc = acc + part                             # center shift never wraps
        else:
            acc = acc + part * masks[bi:bi + 1, :]       # kill column wrap-around
    # Single sublane-block reduction: avg-channel rows + max-channel rows.
    conv = acc[:nb] + acc[nb:] + cb_ref[0]               # (nb, HW)
    sa = jax.nn.sigmoid(conv)

    out_ref[...] = (f1 * sa[:, None, :]).astype(out_ref.dtype)   # lane-dense store


def cbam_pallas(f, w1, b1, w2, b2, cw, cb, *, bblk=None):
    """f: (B,C,H,W); w1: (C,bott); b1: (bott,); w2: (bott,C); b2: (C,);
    cw: (2, K*K) row-major flatten of Conv2d(2,1,K) weight; cb: (1,)."""
    B, C, H, W = f.shape
    HW = H * W
    bott = w1.shape[1]
    K = 7
    P = K // 2

    # ---- batch-block size: ~1 MiB blocks, >=2 grid steps (v7x dual-TC),
    # ---- 2 arrays x 2 pipeline buffers kept well under v7x scoped VMEM.
    itemsize = jnp.dtype(f.dtype).itemsize
    per_sample = C * HW * itemsize
    if bblk is None:
        bblk = max(1, (1 << 20) // per_sample)                    # ~1 MiB per block
        bblk = min(bblk, max(1, B // 2))                          # keep >= 2 steps
        bblk = min(bblk, max(1, (8 << 20) // (4 * per_sample)))   # VMEM budget (v7x-safe)
        if bblk >= 4:
            bblk -= bblk % 4                                      # 2*bblk multiple of 8
    nsteps = -(-B // bblk)
    Bp = nsteps * bblk

    f_flat = f.reshape(B, C, HW)                                  # lane-dense layout
    if Bp != B:
        f_flat = jnp.pad(f_flat, ((0, Bp - B), (0, 0), (0, 0)))

    w1t = jnp.transpose(w1)                                       # (bott, C)
    b1v = b1.reshape(bott)
    b2v = b2.reshape(1, C)
    # Conv weight expanded to one column per tap for the stacked sublane layout:
    # rows [0, bblk) get the avg-channel weights, rows [bblk, 2*bblk) the max-channel.
    cwv = jnp.concatenate([jnp.tile(cw[0:1, :], (bblk, 1)),
                           jnp.tile(cw[1:2, :], (bblk, 1))], axis=0)   # (2*bblk, K*K)

    PAD = P * W + P                          # flat halo needed for +-P row/col shifts
    LPAD = -(-PAD // 128) * 128              # round halo up to whole vregs

    # Static column-validity masks, one per horizontal shift (built on host).
    cols = np.arange(HW) % W
    col_masks = np.stack(
        [((cols + (bi - P) >= 0) & (cols + (bi - P) < W)) for bi in range(K)]
    ).astype(np.float32)                                          # (K, HW)
    col_masks = jnp.asarray(col_masks)

    kernel = functools.partial(_cbam_kernel, W=W, K=K, LPAD=LPAD)

    grid_spec = pltpu.PrefetchScalarGridSpec(
        num_scalar_prefetch=0,
        grid=(nsteps,),
        in_specs=[
            pl.BlockSpec((bblk, C, HW), lambda i: (i, 0, 0)),          # f (lane-dense)
            pl.BlockSpec((bott, C), lambda i: (0, 0)),                 # w1.T
            pl.BlockSpec(memory_space=pltpu.MemorySpace.SMEM),         # b1 (bott,)
            pl.BlockSpec((bott, C), lambda i: (0, 0)),                 # w2
            pl.BlockSpec((1, C), lambda i: (0, 0)),                    # b2
            pl.BlockSpec((2 * bblk, K * K), lambda i: (0, 0)),         # conv weight cols
            pl.BlockSpec(memory_space=pltpu.MemorySpace.SMEM),         # conv bias (1,)
            pl.BlockSpec((K, HW), lambda i: (0, 0)),                   # column masks
        ],
        out_specs=pl.BlockSpec((bblk, C, HW), lambda i: (i, 0, 0)),
    )
    out_flat = pl.pallas_call(
        kernel,
        out_shape=jax.ShapeDtypeStruct((Bp, C, HW), f.dtype),
        grid_spec=grid_spec,
        compiler_params=pltpu.CompilerParams(
            dimension_semantics=("parallel",)),       # batch steps shard across v7x TCs
    )(f_flat, w1t, b1v, w2, b2v, cwv, cb, col_masks)
    return out_flat[:B].reshape(B, C, H, W)


def cbam_reference(f, w1, b1, w2, b2, cw, cb):
    """Pure-JAX reference mirroring the PyTorch CBAM forward."""
    def mlp(x):  # x: (B, C)
        h = jnp.maximum(x @ w1 + b1[None, :], 0.0)
        return h @ w2 + b2[None, :]

    mean_p = jnp.mean(f, axis=(2, 3))
    max_p = jnp.max(f, axis=(2, 3))
    ca = jax.nn.sigmoid(mlp(mean_p)) + mlp(max_p)                    # (B, C)
    f1 = f * ca[:, :, None, None]

    s_avg = jnp.mean(f1, axis=1, keepdims=True)
    s_max = jnp.max(f1, axis=1, keepdims=True)
    s_cat = jnp.concatenate([s_avg, s_max], axis=1)                  # (B, 2, H, W)
    w = cw.reshape(1, 2, 7, 7)
    conv = jax.lax.conv_general_dilated(
        s_cat, w, window_strides=(1, 1), padding='SAME',
        dimension_numbers=('NCHW', 'OIHW', 'NCHW')) + cb.reshape(1, 1, 1, 1)
    sa = jax.nn.sigmoid(conv)
    return f1 * sa


if __name__ == "__main__":
    B, C, H, W = 8, 32, 16, 16          # B=8 -> bblk=4, grid=(2,): both v7x TCs busy
    reduction_ratio = 16
    bott = C // reduction_ratio
    K = 7

    key = jax.random.PRNGKey(0)
    k1, k2, k3, k4, k5, k6, k7 = jax.random.split(key, 7)
    # Linear weights stored pre-transposed: y = x @ W + b (nn.Linear semantics).
    w1 = jax.random.normal(k1, (C, bott), jnp.float32) * 0.2
    b1 = jax.random.normal(k2, (bott,), jnp.float32) * 0.1
    w2 = jax.random.normal(k3, (bott, C), jnp.float32) * 0.2
    b2 = jax.random.normal(k4, (C,), jnp.float32) * 0.1
    cw = jax.random.normal(k5, (2, K * K), jnp.float32) * 0.1   # Conv2d(2,1,7) weight, flat
    cb = jax.random.normal(k6, (1,), jnp.float32) * 0.1         # Conv2d bias
    x = jax.random.normal(k7, (B, C, H, W), jnp.float32)

    out = jax.block_until_ready(cbam_pallas(x, w1, b1, w2, b2, cw, cb))
    ref = jax.block_until_ready(cbam_reference(x, w1, b1, w2, b2, cw, cb))
    np.testing.assert_allclose(np.asarray(out), np.asarray(ref), rtol=1e-3, atol=1e-4)

    print("KERNEL_OK")
</pallas_src>

<mosaic_0001>
module attributes {stable_mosaic.version = 11 : i64} {
  func.func @_cbam_kernel(%arg0: i32, %arg1: memref<4x32x256xf32, #tpu.memory_space<vmem>>, %arg2: memref<2x32xf32, #tpu.memory_space<vmem>>, %arg3: memref<2xf32, #tpu.memory_space<smem>>, %arg4: memref<2x32xf32, #tpu.memory_space<vmem>>, %arg5: memref<1x32xf32, #tpu.memory_space<vmem>>, %arg6: memref<8x49xf32, #tpu.memory_space<vmem>>, %arg7: memref<1xf32, #tpu.memory_space<smem>>, %arg8: memref<7x256xf32, #tpu.memory_space<vmem>>, %arg9: memref<4x32x256xf32, #tpu.memory_space<vmem>>) attributes {dimension_semantics = [#tpu.dimension_semantics<parallel>], iteration_bounds = array<i64: 2>, scalar_prefetch = 0 : i64, scratch_operands = 0 : i64, tpu.core_type = #tpu.core_type<tc>, window_params = [{transform_indices = @transform_0, window_bounds = array<i64: 4, 32, 256>}, {pipeline_mode = #tpu.pipeline_mode<synchronous>, transform_indices = @transform_1, window_bounds = array<i64: 2, 32>}, {transform_indices = @transform_2, window_bounds = array<i64: 2>}, {pipeline_mode = #tpu.pipeline_mode<synchronous>, transform_indices = @transform_3, window_bounds = array<i64: 2, 32>}, {pipeline_mode = #tpu.pipeline_mode<synchronous>, transform_indices = @transform_4, window_bounds = array<i64: 1, 32>}, {pipeline_mode = #tpu.pipeline_mode<synchronous>, transform_indices = @transform_5, window_bounds = array<i64: 8, 49>}, {transform_indices = @transform_6, window_bounds = array<i64: 1>}, {pipeline_mode = #tpu.pipeline_mode<synchronous>, transform_indices = @transform_7, window_bounds = array<i64: 7, 256>}, {transform_indices = @transform_8, window_bounds = array<i64: 4, 32, 256>}]} {
    %c0 = arith.constant 0 : index
    %c0_0 = arith.constant 0 : index
    %c0_1 = arith.constant 0 : index
    %0 = vector.load %arg1[%c0, %c0_0, %c0_1] : memref<4x32x256xf32, #tpu.memory_space<vmem>>, vector<4x32x256xf32>
    %cst = arith.constant dense<0.000000e+00> : vector<4x32xf32>
    %1 = vector.multi_reduction <add>, %0, %cst [2] : vector<4x32x256xf32> to vector<4x32xf32>
    %cst_2 = arith.constant 2.560000e+02 : f32
    %2 = vector.broadcast %cst_2 : f32 to vector<4x32xf32>
    %3 = arith.divf %1, %2 : vector<4x32xf32>
    %cst_3 = arith.constant dense<0xFF800000> : vector<4x32xf32>
    %4 = vector.multi_reduction <maximumf>, %0, %cst_3 [2] : vector<4x32x256xf32> to vector<4x32xf32>
    %5 = tpu.concatenate %3, %4 in 0 : vector<4x32xf32>, vector<4x32xf32> -> vector<8x32xf32>
    %c0_4 = arith.constant 0 : index
    %c0_5 = arith.constant 0 : index
    %6 = vector.load %arg2[%c0_4, %c0_5] : memref<2x32xf32, #tpu.memory_space<vmem>>, vector<2x32xf32>
    %c0_6 = arith.constant 0 : index
    %c0_7 = arith.constant 0 : index
    %7 = vector.load %arg4[%c0_6, %c0_7] : memref<2x32xf32, #tpu.memory_space<vmem>>, vector<2x32xf32>
    %c0_8 = arith.constant 0 : index
    %c0_9 = arith.constant 0 : index
    %8 = vector.load %arg5[%c0_8, %c0_9] : memref<1x32xf32, #tpu.memory_space<vmem>>, vector<1x32xf32>
    %cst_10 = arith.constant 0.000000e+00 : f32
    %9 = vector.broadcast %cst_10 : f32 to vector<8x32xf32>
    %10 = vector.extract_strided_slice %6 {offsets = [0, 0], sizes = [1, 32], strides = [1, 1]} : vector<2x32xf32> to vector<1x32xf32>
    %11 = vector.broadcast %10 : vector<1x32xf32> to vector<8x32xf32>
    %12 = arith.mulf %5, %11 : vector<8x32xf32>
    %cst_11 = arith.constant dense<0.000000e+00> : vector<8xf32>
    %13 = vector.multi_reduction <add>, %12, %cst_11 [1] : vector<8x32xf32> to vector<8xf32>
    %14 = vector.shape_cast %13 : vector<8xf32> to vector<8x1xf32>
    %c0_12 = arith.constant 0 : index
    %15 = memref.load %arg3[%c0_12] : memref<2xf32, #tpu.memory_space<smem>>
    %16 = vector.broadcast %15 : f32 to vector<8x1xf32>
    %17 = arith.addf %14, %16 : vector<8x1xf32>
    %cst_13 = arith.constant 0.000000e+00 : f32
    %18 = vector.broadcast %cst_13 : f32 to vector<8x1xf32>
    %19 = arith.maximumf %17, %18 : vector<8x1xf32>
    %20 = vector.extract_strided_slice %7 {offsets = [0, 0], sizes = [1, 32], strides = [1, 1]} : vector<2x32xf32> to vector<1x32xf32>
    %21 = vector.broadcast %19 : vector<8x1xf32> to vector<8x32xf32>
    %22 = vector.broadcast %20 : vector<1x32xf32> to vector<8x32xf32>
    %23 = arith.mulf %21, %22 : vector<8x32xf32>
    %24 = arith.addf %9, %23 : vector<8x32xf32>
    %25 = vector.extract_strided_slice %6 {offsets = [1, 0], sizes = [1, 32], strides = [1, 1]} : vector<2x32xf32> to vector<1x32xf32>
    %26 = vector.broadcast %25 : vector<1x32xf32> to vector<8x32xf32>
    %27 = arith.mulf %5, %26 : vector<8x32xf32>
    %cst_14 = arith.constant dense<0.000000e+00> : vector<8xf32>
    %28 = vector.multi_reduction <add>, %27, %cst_14 [1] : vector<8x32xf32> to vector<8xf32>
    %29 = vector.shape_cast %28 : vector<8xf32> to vector<8x1xf32>
    %c1 = arith.constant 1 : index
    %30 = memref.load %arg3[%c1] : memref<2xf32, #tpu.memory_space<smem>>
    %31 = vector.broadcast %30 : f32 to vector<8x1xf32>
    %32 = arith.addf %29, %31 : vector<8x1xf32>
    %cst_15 = arith.constant 0.000000e+00 : f32
    %33 = vector.broadcast %cst_15 : f32 to vector<8x1xf32>
    %34 = arith.maximumf %32, %33 : vector<8x1xf32>
    %35 = vector.extract_strided_slice %7 {offsets = [1, 0], sizes = [1, 32], strides = [1, 1]} : vector<2x32xf32> to vector<1x32xf32>
    %36 = vector.broadcast %34 : vector<8x1xf32> to vector<8x32xf32>
    %37 = vector.broadcast %35 : vector<1x32xf32> to vector<8x32xf32>
    %38 = arith.mulf %36, %37 : vector<8x32xf32>
    %39 = arith.addf %24, %38 : vector<8x32xf32>
    %40 = vector.broadcast %8 : vector<1x32xf32> to vector<8x32xf32>
    %41 = arith.addf %39, %40 : vector<8x32xf32>
    %42 = vector.extract_strided_slice %41 {offsets = [0, 0], sizes = [4, 32], strides = [1, 1]} : vector<8x32xf32> to vector<4x32xf32>
    %43 = arith.negf %42 : vector<4x32xf32>
    %44 = math.exp %43 : vector<4x32xf32>
    %cst_16 = arith.constant 1.000000e+00 : f32
    %45 = vector.broadcast %cst_16 : f32 to vector<4x32xf32>
    %46 = arith.addf %45, %44 : vector<4x32xf32>
    %47 = arith.divf %45, %46 : vector<4x32xf32>
    %48 = vector.extract_strided_slice %41 {offsets = [4, 0], sizes = [4, 32], strides = [1, 1]} : vector<8x32xf32> to vector<4x32xf32>
    %49 = arith.addf %47, %48 : vector<4x32xf32>
    %50 = vector.shape_cast %49 : vector<4x32xf32> to vector<4x32x1xf32>
    %51 = vector.broadcast %50 : vector<4x32x1xf32> to vector<4x32x256xf32>
    %52 = arith.mulf %0, %51 : vector<4x32x256xf32>
    %cst_17 = arith.constant dense<0.000000e+00> : vector<4x256xf32>
    %53 = vector.multi_reduction <add>, %52, %cst_17 [1] : vector<4x32x256xf32> to vector<4x256xf32>
    %cst_18 = arith.constant 3.200000e+01 : f32
    %54 = vector.broadcast %cst_18 : f32 to vector<4x256xf32>
    %55 = arith.divf %53, %54 : vector<4x256xf32>
    %cst_19 = arith.constant dense<0xFF800000> : vector<4x256xf32>
    %56 = vector.multi_reduction <maximumf>, %52, %cst_19 [1] : vector<4x32x256xf32> to vector<4x256xf32>
    %57 = tpu.concatenate %55, %56 in 0 : vector<4x256xf32>, vector<4x256xf32> -> vector<8x256xf32>
    %cst_20 = arith.constant 0.000000e+00 : f32
    %58 = vector.broadcast %cst_20 : f32 to vector<8x128xf32>
    %59 = tpu.concatenate %58, %57, %58 in 1 : vector<8x128xf32>, vector<8x256xf32>, vector<8x128xf32> -> vector<8x512xf32>
    %c0_21 = arith.constant 0 : index
    %c0_22 = arith.constant 0 : index
    %60 = vector.load %arg6[%c0_21, %c0_22] : memref<8x49xf32, #tpu.memory_space<vmem>>, vector<8x49xf32>
    %c0_23 = arith.constant 0 : index
    %c0_24 = arith.constant 0 : index
    %61 = vector.load %arg8[%c0_23, %c0_24] : memref<7x256xf32, #tpu.memory_space<vmem>>, vector<7x256xf32>
    %cst_25 = arith.constant 0.000000e+00 : f32
    %62 = vector.broadcast %cst_25 : f32 to vector<8x256xf32>
    %cst_26 = arith.constant 0.000000e+00 : f32
    %63 = vector.broadcast %cst_26 : f32 to vector<8x256xf32>
    %64 = vector.extract_strided_slice %59 {offsets = [0, 77], sizes = [8, 256], strides = [1, 1]} : vector<8x512xf32> to vector<8x256xf32>
    %65 = vector.extract_strided_slice %60 {offsets = [0, 0], sizes = [8, 1], strides = [1, 1]} : vector<8x49xf32> to vector<8x1xf32>
    %66 = vector.broadcast %65 : vector<8x1xf32> to vector<8x256xf32>
    %67 = arith.mulf %64, %66 : vector<8x256xf32>
    %68 = arith.addf %63, %67 : vector<8x256xf32>
    %69 = vector.extract_strided_slice %59 {offsets = [0, 93], sizes = [8, 256], strides = [1, 1]} : vector<8x512xf32> to vector<8x256xf32>
    %70 = vector.extract_strided_slice %60 {offsets = [0, 7], sizes = [8, 1], strides = [1, 1]} : vector<8x49xf32> to vector<8x1xf32>
    %71 = vector.broadcast %70 : vector<8x1xf32> to vector<8x256xf32>
    %72 = arith.mulf %69, %71 : vector<8x256xf32>
    %73 = arith.addf %68, %72 : vector<8x256xf32>
    %74 = vector.extract_strided_slice %59 {offsets = [0, 109], sizes = [8, 256], strides = [1, 1]} : vector<8x512xf32> to vector<8x256xf32>
    %75 = vector.extract_strided_slice %60 {offsets = [0, 14], sizes = [8, 1], strides = [1, 1]} : vector<8x49xf32> to vector<8x1xf32>
    %76 = vector.broadcast %75 : vector<8x1xf32> to vector<8x256xf32>
    %77 = arith.mulf %74, %76 : vector<8x256xf32>
    %78 = arith.addf %73, %77 : vector<8x256xf32>
    %79 = vector.extract_strided_slice %59 {offsets = [0, 125], sizes = [8, 256], strides = [1, 1]} : vector<8x512xf32> to vector<8x256xf32>
    %80 = vector.extract_strided_slice %60 {offsets = [0, 21], sizes = [8, 1], strides = [1, 1]} : vector<8x49xf32> to vector<8x1xf32>
    %81 = vector.broadcast %80 : vector<8x1xf32> to vector<8x256xf32>
    %82 = arith.mulf %79, %81 : vector<8x256xf32>
    %83 = arith.addf %78, %82 : vector<8x256xf32>
    %84 = vector.extract_strided_slice %59 {offsets = [0, 141], sizes = [8, 256], strides = [1, 1]} : vector<8x512xf32> to vector<8x256xf32>
    %85 = vector.extract_strided_slice %60 {offsets = [0, 28], sizes = [8, 1], strides = [1, 1]} : vector<8x49xf32> to vector<8x1xf32>
    %86 = vector.broadcast %85 : vector<8x1xf32> to vector<8x256xf32>
    %87 = arith.mulf %84, %86 : vector<8x256xf32>
    %88 = arith.addf %83, %87 : vector<8x256xf32>
    %89 = vector.extract_strided_slice %59 {offsets = [0, 157], sizes = [8, 256], strides = [1, 1]} : vector<8x512xf32> to vector<8x256xf32>
    %90 = vector.extract_strided_slice %60 {offsets = [0, 35], sizes = [8, 1], strides = [1, 1]} : vector<8x49xf32> to vector<8x1xf32>
    %91 = vector.broadcast %90 : vector<8x1xf32> to vector<8x256xf32>
    %92 = arith.mulf %89, %91 : vector<8x256xf32>
    %93 = arith.addf %88, %92 : vector<8x256xf32>
    %94 = vector.extract_strided_slice %59 {offsets = [0, 173], sizes = [8, 256], strides = [1, 1]} : vector<8x512xf32> to vector<8x256xf32>
    %95 = vector.extract_strided_slice %60 {offsets = [0, 42], sizes = [8, 1], strides = [1, 1]} : vector<8x49xf32> to vector<8x1xf32>
    %96 = vector.broadcast %95 : vector<8x1xf32> to vector<8x256xf32>
    %97 = arith.mulf %94, %96 : vector<8x256xf32>
    %98 = arith.addf %93, %97 : vector<8x256xf32>
    %99 = vector.extract_strided_slice %61 {offsets = [0, 0], sizes = [1, 256], strides = [1, 1]} : vector<7x256xf32> to vector<1x256xf32>
    %100 = vector.broadcast %99 : vector<1x256xf32> to vector<8x256xf32>
    %101 = arith.mulf %98, %100 : vector<8x256xf32>
    %102 = arith.addf %62, %101 : vector<8x256xf32>
    %cst_27 = arith.constant 0.000000e+00 : f32
    %103 = vector.broadcast %cst_27 : f32 to vector<8x256xf32>
    %104 = vector.extract_strided_slice %59 {offsets = [0, 78], sizes = [8, 256], strides = [1, 1]} : vector<8x512xf32> to vector<8x256xf32>
    %105 = vector.extract_strided_slice %60 {offsets = [0, 1], sizes = [8, 1], strides = [1, 1]} : vector<8x49xf32> to vector<8x1xf32>
    %106 = vector.broadcast %105 : vector<8x1xf32> to vector<8x256xf32>
    %107 = arith.mulf %104, %106 : vector<8x256xf32>
    %108 = arith.addf %103, %107 : vector<8x256xf32>
    %109 = vector.extract_strided_slice %59 {offsets = [0, 94], sizes = [8, 256], strides = [1, 1]} : vector<8x512xf32> to vector<8x256xf32>
    %110 = vector.extract_strided_slice %60 {offsets = [0, 8], sizes = [8, 1], strides = [1, 1]} : vector<8x49xf32> to vector<8x1xf32>
    %111 = vector.broadcast %110 : vector<8x1xf32> to vector<8x256xf32>
    %112 = arith.mulf %109, %111 : vector<8x256xf32>
    %113 = arith.addf %108, %112 : vector<8x256xf32>
    %114 = vector.extract_strided_slice %59 {offsets = [0, 110], sizes = [8, 256], strides = [1, 1]} : vector<8x512xf32> to vector<8x256xf32>
    %115 = vector.extract_strided_slice %60 {offsets = [0, 15], sizes = [8, 1], strides = [1, 1]} : vector<8x49xf32> to vector<8x1xf32>
    %116 = vector.broadcast %115 : vector<8x1xf32> to vector<8x256xf32>
    %117 = arith.mulf %114, %116 : vector<8x256xf32>
    %118 = arith.addf %113, %117 : vector<8x256xf32>
    %119 = vector.extract_strided_slice %59 {offsets = [0, 126], sizes = [8, 256], strides = [1, 1]} : vector<8x512xf32> to vector<8x256xf32>
    %120 = vector.extract_strided_slice %60 {offsets = [0, 22], sizes = [8, 1], strides = [1, 1]} : vector<8x49xf32> to vector<8x1xf32>
    %121 = vector.broadcast %120 : vector<8x1xf32> to vector<8x256xf32>
    %122 = arith.mulf %119, %121 : vector<8x256xf32>
    %123 = arith.addf %118, %122 : vector<8x256xf32>
    %124 = vector.extract_strided_slice %59 {offsets = [0, 142], sizes = [8, 256], strides = [1, 1]} : vector<8x512xf32> to vector<8x256xf32>
    %125 = vector.extract_strided_slice %60 {offsets = [0, 29], sizes = [8, 1], strides = [1, 1]} : vector<8x49xf32> to vector<8x1xf32>
    %126 = vector.broadcast %125 : vector<8x1xf32> to vector<8x256xf32>
    %127 = arith.mulf %124, %126 : vector<8x256xf32>
    %128 = arith.addf %123, %127 : vector<8x256xf32>
    %129 = vector.extract_strided_slice %59 {offsets = [0, 158], sizes = [8, 256], strides = [1, 1]} : vector<8x512xf32> to vector<8x256xf32>
    %130 = vector.extract_strided_slice %60 {offsets = [0, 36], sizes = [8, 1], strides = [1, 1]} : vector<8x49xf32> to vector<8x1xf32>
    %131 = vector.broadcast %130 : vector<8x1xf32> to vector<8x256xf32>
    %132 = arith.mulf %129, %131 : vector<8x256xf32>
    %133 = arith.addf %128, %132 : vector<8x256xf32>
    %134 = vector.extract_strided_slice %59 {offsets = [0, 174], sizes = [8, 256], strides = [1, 1]} : vector<8x512xf32> to vector<8x256xf32>
    %135 = vector.extract_strided_slice %60 {offsets = [0, 43], sizes = [8, 1], strides = [1, 1]} : vector<8x49xf32> to vector<8x1xf32>
    %136 = vector.broadcast %135 : vector<8x1xf32> to vector<8x256xf32>
    %137 = arith.mulf %134, %136 : vector<8x256xf32>
    %138 = arith.addf %133, %137 : vector<8x256xf32>
    %139 = vector.extract_strided_slice %61 {offsets = [1, 0], sizes = [1, 256], strides = [1, 1]} : vector<7x256xf32> to vector<1x256xf32>
    %140 = vector.broadcast %139 : vector<1x256xf32> to vector<8x256xf32>
    %141 = arith.mulf %138, %140 : vector<8x256xf32>
    %142 = arith.addf %102, %141 : vector<8x256xf32>
    %cst_28 = arith.constant 0.000000e+00 : f32
    %143 = vector.broadcast %cst_28 : f32 to vector<8x256xf32>
    %144 = vector.extract_strided_slice %59 {offsets = [0, 79], sizes = [8, 256], strides = [1, 1]} : vector<8x512xf32> to vector<8x256xf32>
    %145 = vector.extract_strided_slice %60 {offsets = [0, 2], sizes = [8, 1], strides = [1, 1]} : vector<8x49xf32> to vector<8x1xf32>
    %146 = vector.broadcast %145 : vector<8x1xf32> to vector<8x256xf32>
    %147 = arith.mulf %144, %146 : vector<8x256xf32>
    %148 = arith.addf %143, %147 : vector<8x256xf32>
    %149 = vector.extract_strided_slice %59 {offsets = [0, 95], sizes = [8, 256], strides = [1, 1]} : vector<8x512xf32> to vector<8x256xf32>
    %150 = vector.extract_strided_slice %60 {offsets = [0, 9], sizes = [8, 1], strides = [1, 1]} : vector<8x49xf32> to vector<8x1xf32>
    %151 = vector.broadcast %150 : vector<8x1xf32> to vector<8x256xf32>
    %152 = arith.mulf %149, %151 : vector<8x256xf32>
    %153 = arith.addf %148, %152 : vector<8x256xf32>
    %154 = vector.extract_strided_slice %59 {offsets = [0, 111], sizes = [8, 256], strides = [1, 1]} : vector<8x512xf32> to vector<8x256xf32>
    %155 = vector.extract_strided_slice %60 {offsets = [0, 16], sizes = [8, 1], strides = [1, 1]} : vector<8x49xf32> to vector<8x1xf32>
    %156 = vector.broadcast %155 : vector<8x1xf32> to vector<8x256xf32>
    %157 = arith.mulf %154, %156 : vector<8x256xf32>
    %158 = arith.addf %153, %157 : vector<8x256xf32>
    %159 = vector.extract_strided_slice %59 {offsets = [0, 127], sizes = [8, 256], strides = [1, 1]} : vector<8x512xf32> to vector<8x256xf32>
    %160 = vector.extract_strided_slice %60 {offsets = [0, 23], sizes = [8, 1], strides = [1, 1]} : vector<8x49xf32> to vector<8x1xf32>
    %161 = vector.broadcast %160 : vector<8x1xf32> to vector<8x256xf32>
    %162 = arith.mulf %159, %161 : vector<8x256xf32>
    %163 = arith.addf %158, %162 : vector<8x256xf32>
    %164 = vector.extract_strided_slice %59 {offsets = [0, 143], sizes = [8, 256], strides = [1, 1]} : vector<8x512xf32> to vector<8x256xf32>
    %165 = vector.extract_strided_slice %60 {offsets = [0, 30], sizes = [8, 1], strides = [1, 1]} : vector<8x49xf32> to vector<8x1xf32>
    %166 = vector.broadcast %165 : vector<8x1xf32> to vector<8x256xf32>
    %167 = arith.mulf %164, %166 : vector<8x256xf32>
    %168 = arith.addf %163, %167 : vector<8x256xf32>
    %169 = vector.extract_strided_slice %59 {offsets = [0, 159], sizes = [8, 256], strides = [1, 1]} : vector<8x512xf32> to vector<8x256xf32>
    %170 = vector.extract_strided_slice %60 {offsets = [0, 37], sizes = [8, 1], strides = [1, 1]} : vector<8x49xf32> to vector<8x1xf32>
    %171 = vector.broadcast %170 : vector<8x1xf32> to vector<8x256xf32>
    %172 = arith.mulf %169, %171 : vector<8x256xf32>
    %173 = arith.addf %168, %172 : vector<8x256xf32>
    %174 = vector.extract_strided_slice %59 {offsets = [0, 175], sizes = [8, 256], strides = [1, 1]} : vector<8x512xf32> to vector<8x256xf32>
    %175 = vector.extract_strided_slice %60 {offsets = [0, 44], sizes = [8, 1], strides = [1, 1]} : vector<8x49xf32> to vector<8x1xf32>
    %176 = vector.broadcast %175 : vector<8x1xf32> to vector<8x256xf32>
    %177 = arith.mulf %174, %176 : vector<8x256xf32>
    %178 = arith.addf %173, %177 : vector<8x256xf32>
    %179 = vector.extract_strided_slice %61 {offsets = [2, 0], sizes = [1, 256], strides = [1, 1]} : vector<7x256xf32> to vector<1x256xf32>
    %180 = vector.broadcast %179 : vector<1x256xf32> to vector<8x256xf32>
    %181 = arith.mulf %178, %180 : vector<8x256xf32>
    %182 = arith.addf %142, %181 : vector<8x256xf32>
    %cst_29 = arith.constant 0.000000e+00 : f32
    %183 = vector.broadcast %cst_29 : f32 to vector<8x256xf32>
    %184 = vector.extract_strided_slice %59 {offsets = [0, 80], sizes = [8, 256], strides = [1, 1]} : vector<8x512xf32> to vector<8x256xf32>
    %185 = vector.extract_strided_slice %60 {offsets = [0, 3], sizes = [8, 1], strides = [1, 1]} : vector<8x49xf32> to vector<8x1xf32>
    %186 = vector.broadcast %185 : vector<8x1xf32> to vector<8x256xf32>
    %187 = arith.mulf %184, %186 : vector<8x256xf32>
    %188 = arith.addf %183, %187 : vector<8x256xf32>
    %189 = vector.extract_strided_slice %59 {offsets = [0, 96], sizes = [8, 256], strides = [1, 1]} : vector<8x512xf32> to vector<8x256xf32>
    %190 = vector.extract_strided_slice %60 {offsets = [0, 10], sizes = [8, 1], strides = [1, 1]} : vector<8x49xf32> to vector<8x1xf32>
    %191 = vector.broadcast %190 : vector<8x1xf32> to vector<8x256xf32>
    %192 = arith.mulf %189, %191 : vector<8x256xf32>
    %193 = arith.addf %188, %192 : vector<8x256xf32>
    %194 = vector.extract_strided_slice %59 {offsets = [0, 112], sizes = [8, 256], strides = [1, 1]} : vector<8x512xf32> to vector<8x256xf32>
    %195 = vector.extract_strided_slice %60 {offsets = [0, 17], sizes = [8, 1], strides = [1, 1]} : vector<8x49xf32> to vector<8x1xf32>
    %196 = vector.broadcast %195 : vector<8x1xf32> to vector<8x256xf32>
    %197 = arith.mulf %194, %196 : vector<8x256xf32>
    %198 = arith.addf %193, %197 : vector<8x256xf32>
    %199 = vector.extract_strided_slice %59 {offsets = [0, 128], sizes = [8, 256], strides = [1, 1]} : vector<8x512xf32> to vector<8x256xf32>
    %200 = vector.extract_strided_slice %60 {offsets = [0, 24], sizes = [8, 1], strides = [1, 1]} : vector<8x49xf32> to vector<8x1xf32>
    %201 = vector.broadcast %200 : vector<8x1xf32> to vector<8x256xf32>
    %202 = arith.mulf %199, %201 : vector<8x256xf32>
    %203 = arith.addf %198, %202 : vector<8x256xf32>
    %204 = vector.extract_strided_slice %59 {offsets = [0, 144], sizes = [8, 256], strides = [1, 1]} : vector<8x512xf32> to vector<8x256xf32>
    %205 = vector.extract_strided_slice %60 {offsets = [0, 31], sizes = [8, 1], strides = [1, 1]} : vector<8x49xf32> to vector<8x1xf32>
    %206 = vector.broadcast %205 : vector<8x1xf32> to vector<8x256xf32>
    %207 = arith.mulf %204, %206 : vector<8x256xf32>
    %208 = arith.addf %203, %207 : vector<8x256xf32>
    %209 = vector.extract_strided_slice %59 {offsets = [0, 160], sizes = [8, 256], strides = [1, 1]} : vector<8x512xf32> to vector<8x256xf32>
    %210 = vector.extract_strided_slice %60 {offsets = [0, 38], sizes = [8, 1], strides = [1, 1]} : vector<8x49xf32> to vector<8x1xf32>
    %211 = vector.broadcast %210 : vector<8x1xf32> to vector<8x256xf32>
    %212 = arith.mulf %209, %211 : vector<8x256xf32>
    %213 = arith.addf %208, %212 : vector<8x256xf32>
    %214 = vector.extract_strided_slice %59 {offsets = [0, 176], sizes = [8, 256], strides = [1, 1]} : vector<8x512xf32> to vector<8x256xf32>
    %215 = vector.extract_strided_slice %60 {offsets = [0, 45], sizes = [8, 1], strides = [1, 1]} : vector<8x49xf32> to vector<8x1xf32>
    %216 = vector.broadcast %215 : vector<8x1xf32> to vector<8x256xf32>
    %217 = arith.mulf %214, %216 : vector<8x256xf32>
    %218 = arith.addf %213, %217 : vector<8x256xf32>
    %219 = arith.addf %182, %218 : vector<8x256xf32>
    %cst_30 = arith.constant 0.000000e+00 : f32
    %220 = vector.broadcast %cst_30 : f32 to vector<8x256xf32>
    %221 = vector.extract_strided_slice %59 {offsets = [0, 81], sizes = [8, 256], strides = [1, 1]} : vector<8x512xf32> to vector<8x256xf32>
    %222 = vector.extract_strided_slice %60 {offsets = [0, 4], sizes = [8, 1], strides = [1, 1]} : vector<8x49xf32> to vector<8x1xf32>
    %223 = vector.broadcast %222 : vector<8x1xf32> to vector<8x256xf32>
    %224 = arith.mulf %221, %223 : vector<8x256xf32>
    %225 = arith.addf %220, %224 : vector<8x256xf32>
    %226 = vector.extract_strided_slice %59 {offsets = [0, 97], sizes = [8, 256], strides = [1, 1]} : vector<8x512xf32> to vector<8x256xf32>
    %227 = vector.extract_strided_slice %60 {offsets = [0, 11], sizes = [8, 1], strides = [1, 1]} : vector<8x49xf32> to vector<8x1xf32>
    %228 = vector.broadcast %227 : vector<8x1xf32> to vector<8x256xf32>
    %229 = arith.mulf %226, %228 : vector<8x256xf32>
    %230 = arith.addf %225, %229 : vector<8x256xf32>
    %231 = vector.extract_strided_slice %59 {offsets = [0, 113], sizes = [8, 256], strides = [1, 1]} : vector<8x512xf32> to vector<8x256xf32>
    %232 = vector.extract_strided_slice %60 {offsets = [0, 18], sizes = [8, 1], strides = [1, 1]} : vector<8x49xf32> to vector<8x1xf32>
    %233 = vector.broadcast %232 : vector<8x1xf32> to vector<8x256xf32>
    %234 = arith.mulf %231, %233 : vector<8x256xf32>
    %235 = arith.addf %230, %234 : vector<8x256xf32>
    %236 = vector.extract_strided_slice %59 {offsets = [0, 129], sizes = [8, 256], strides = [1, 1]} : vector<8x512xf32> to vector<8x256xf32>
    %237 = vector.extract_strided_slice %60 {offsets = [0, 25], sizes = [8, 1], strides = [1, 1]} : vector<8x49xf32> to vector<8x1xf32>
    %238 = vector.broadcast %237 : vector<8x1xf32> to vector<8x256xf32>
    %239 = arith.mulf %236, %238 : vector<8x256xf32>
    %240 = arith.addf %235, %239 : vector<8x256xf32>
    %241 = vector.extract_strided_slice %59 {offsets = [0, 145], sizes = [8, 256], strides = [1, 1]} : vector<8x512xf32> to vector<8x256xf32>
    %242 = vector.extract_strided_slice %60 {offsets = [0, 32], sizes = [8, 1], strides = [1, 1]} : vector<8x49xf32> to vector<8x1xf32>
    %243 = vector.broadcast %242 : vector<8x1xf32> to vector<8x256xf32>
    %244 = arith.mulf %241, %243 : vector<8x256xf32>
    %245 = arith.addf %240, %244 : vector<8x256xf32>
    %246 = vector.extract_strided_slice %59 {offsets = [0, 161], sizes = [8, 256], strides = [1, 1]} : vector<8x512xf32> to vector<8x256xf32>
    %247 = vector.extract_strided_slice %60 {offsets = [0, 39], sizes = [8, 1], strides = [1, 1]} : vector<8x49xf32> to vector<8x1xf32>
    %248 = vector.broadcast %247 : vector<8x1xf32> to vector<8x256xf32>
    %249 = arith.mulf %246, %248 : vector<8x256xf32>
    %250 = arith.addf %245, %249 : vector<8x256xf32>
    %251 = vector.extract_strided_slice %59 {offsets = [0, 177], sizes = [8, 256], strides = [1, 1]} : vector<8x512xf32> to vector<8x256xf32>
    %252 = vector.extract_strided_slice %60 {offsets = [0, 46], sizes = [8, 1], strides = [1, 1]} : vector<8x49xf32> to vector<8x1xf32>
    %253 = vector.broadcast %252 : vector<8x1xf32> to vector<8x256xf32>
    %254 = arith.mulf %251, %253 : vector<8x256xf32>
    %255 = arith.addf %250, %254 : vector<8x256xf32>
    %256 = vector.extract_strided_slice %61 {offsets = [4, 0], sizes = [1, 256], strides = [1, 1]} : vector<7x256xf32> to vector<1x256xf32>
    %257 = vector.broadcast %256 : vector<1x256xf32> to vector<8x256xf32>
    %258 = arith.mulf %255, %257 : vector<8x256xf32>
    %259 = arith.addf %219, %258 : vector<8x256xf32>
    %cst_31 = arith.constant 0.000000e+00 : f32
    %260 = vector.broadcast %cst_31 : f32 to vector<8x256xf32>
    %261 = vector.extract_strided_slice %59 {offsets = [0, 82], sizes = [8, 256], strides = [1, 1]} : vector<8x512xf32> to vector<8x256xf32>
    %262 = vector.extract_strided_slice %60 {offsets = [0, 5], sizes = [8, 1], strides = [1, 1]} : vector<8x49xf32> to vector<8x1xf32>
    %263 = vector.broadcast %262 : vector<8x1xf32> to vector<8x256xf32>
    %264 = arith.mulf %261, %263 : vector<8x256xf32>
    %265 = arith.addf %260, %264 : vector<8x256xf32>
    %266 = vector.extract_strided_slice %59 {offsets = [0, 98], sizes = [8, 256], strides = [1, 1]} : vector<8x512xf32> to vector<8x256xf32>
    %267 = vector.extract_strided_slice %60 {offsets = [0, 12], sizes = [8, 1], strides = [1, 1]} : vector<8x49xf32> to vector<8x1xf32>
    %268 = vector.broadcast %267 : vector<8x1xf32> to vector<8x256xf32>
    %269 = arith.mulf %266, %268 : vector<8x256xf32>
    %270 = arith.addf %265, %269 : vector<8x256xf32>
    %271 = vector.extract_strided_slice %59 {offsets = [0, 114], sizes = [8, 256], strides = [1, 1]} : vector<8x512xf32> to vector<8x256xf32>
    %272 = vector.extract_strided_slice %60 {offsets = [0, 19], sizes = [8, 1], strides = [1, 1]} : vector<8x49xf32> to vector<8x1xf32>
    %273 = vector.broadcast %272 : vector<8x1xf32> to vector<8x256xf32>
    %274 = arith.mulf %271, %273 : vector<8x256xf32>
    %275 = arith.addf %270, %274 : vector<8x256xf32>
    %276 = vector.extract_strided_slice %59 {offsets = [0, 130], sizes = [8, 256], strides = [1, 1]} : vector<8x512xf32> to vector<8x256xf32>
    %277 = vector.extract_strided_slice %60 {offsets = [0, 26], sizes = [8, 1], strides = [1, 1]} : vector<8x49xf32> to vector<8x1xf32>
    %278 = vector.broadcast %277 : vector<8x1xf32> to vector<8x256xf32>
    %279 = arith.mulf %276, %278 : vector<8x256xf32>
    %280 = arith.addf %275, %279 : vector<8x256xf32>
    %281 = vector.extract_strided_slice %59 {offsets = [0, 146], sizes = [8, 256], strides = [1, 1]} : vector<8x512xf32> to vector<8x256xf32>
    %282 = vector.extract_strided_slice %60 {offsets = [0, 33], sizes = [8, 1], strides = [1, 1]} : vector<8x49xf32> to vector<8x1xf32>
    %283 = vector.broadcast %282 : vector<8x1xf32> to vector<8x256xf32>
    %284 = arith.mulf %281, %283 : vector<8x256xf32>
    %285 = arith.addf %280, %284 : vector<8x256xf32>
    %286 = vector.extract_strided_slice %59 {offsets = [0, 162], sizes = [8, 256], strides = [1, 1]} : vector<8x512xf32> to vector<8x256xf32>
    %287 = vector.extract_strided_slice %60 {offsets = [0, 40], sizes = [8, 1], strides = [1, 1]} : vector<8x49xf32> to vector<8x1xf32>
    %288 = vector.broadcast %287 : vector<8x1xf32> to vector<8x256xf32>
    %289 = arith.mulf %286, %288 : vector<8x256xf32>
    %290 = arith.addf %285, %289 : vector<8x256xf32>
    %291 = vector.extract_strided_slice %59 {offsets = [0, 178], sizes = [8, 256], strides = [1, 1]} : vector<8x512xf32> to vector<8x256xf32>
    %292 = vector.extract_strided_slice %60 {offsets = [0, 47], sizes = [8, 1], strides = [1, 1]} : vector<8x49xf32> to vector<8x1xf32>
    %293 = vector.broadcast %292 : vector<8x1xf32> to vector<8x256xf32>
    %294 = arith.mulf %291, %293 : vector<8x256xf32>
    %295 = arith.addf %290, %294 : vector<8x256xf32>
    %296 = vector.extract_strided_slice %61 {offsets = [5, 0], sizes = [1, 256], strides = [1, 1]} : vector<7x256xf32> to vector<1x256xf32>
    %297 = vector.broadcast %296 : vector<1x256xf32> to vector<8x256xf32>
    %298 = arith.mulf %295, %297 : vector<8x256xf32>
    %299 = arith.addf %259, %298 : vector<8x256xf32>
    %cst_32 = arith.constant 0.000000e+00 : f32
    %300 = vector.broadcast %cst_32 : f32 to vector<8x256xf32>
    %301 = vector.extract_strided_slice %59 {offsets = [0, 83], sizes = [8, 256], strides = [1, 1]} : vector<8x512xf32> to vector<8x256xf32>
    %302 = vector.extract_strided_slice %60 {offsets = [0, 6], sizes = [8, 1], strides = [1, 1]} : vector<8x49xf32> to vector<8x1xf32>
    %303 = vector.broadcast %302 : vector<8x1xf32> to vector<8x256xf32>
    %304 = arith.mulf %301, %303 : vector<8x256xf32>
    %305 = arith.addf %300, %304 : vector<8x256xf32>
    %306 = vector.extract_strided_slice %59 {offsets = [0, 99], sizes = [8, 256], strides = [1, 1]} : vector<8x512xf32> to vector<8x256xf32>
    %307 = vector.extract_strided_slice %60 {offsets = [0, 13], sizes = [8, 1], strides = [1, 1]} : vector<8x49xf32> to vector<8x1xf32>
    %308 = vector.broadcast %307 : vector<8x1xf32> to vector<8x256xf32>
    %309 = arith.mulf %306, %308 : vector<8x256xf32>
    %310 = arith.addf %305, %309 : vector<8x256xf32>
    %311 = vector.extract_strided_slice %59 {offsets = [0, 115], sizes = [8, 256], strides = [1, 1]} : vector<8x512xf32> to vector<8x256xf32>
    %312 = vector.extract_strided_slice %60 {offsets = [0, 20], sizes = [8, 1], strides = [1, 1]} : vector<8x49xf32> to vector<8x1xf32>
    %313 = vector.broadcast %312 : vector<8x1xf32> to vector<8x256xf32>
    %314 = arith.mulf %311, %313 : vector<8x256xf32>
    %315 = arith.addf %310, %314 : vector<8x256xf32>
    %316 = vector.extract_strided_slice %59 {offsets = [0, 131], sizes = [8, 256], strides = [1, 1]} : vector<8x512xf32> to vector<8x256xf32>
    %317 = vector.extract_strided_slice %60 {offsets = [0, 27], sizes = [8, 1], strides = [1, 1]} : vector<8x49xf32> to vector<8x1xf32>
    %318 = vector.broadcast %317 : vector<8x1xf32> to vector<8x256xf32>
    %319 = arith.mulf %316, %318 : vector<8x256xf32>
    %320 = arith.addf %315, %319 : vector<8x256xf32>
    %321 = vector.extract_strided_slice %59 {offsets = [0, 147], sizes = [8, 256], strides = [1, 1]} : vector<8x512xf32> to vector<8x256xf32>
    %322 = vector.extract_strided_slice %60 {offsets = [0, 34], sizes = [8, 1], strides = [1, 1]} : vector<8x49xf32> to vector<8x1xf32>
    %323 = vector.broadcast %322 : vector<8x1xf32> to vector<8x256xf32>
    %324 = arith.mulf %321, %323 : vector<8x256xf32>
    %325 = arith.addf %320, %324 : vector<8x256xf32>
    %326 = vector.extract_strided_slice %59 {offsets = [0, 163], sizes = [8, 256], strides = [1, 1]} : vector<8x512xf32> to vector<8x256xf32>
    %327 = vector.extract_strided_slice %60 {offsets = [0, 41], sizes = [8, 1], strides = [1, 1]} : vector<8x49xf32> to vector<8x1xf32>
    %328 = vector.broadcast %327 : vector<8x1xf32> to vector<8x256xf32>
    %329 = arith.mulf %326, %328 : vector<8x256xf32>
    %330 = arith.addf %325, %329 : vector<8x256xf32>
    %331 = vector.extract_strided_slice %59 {offsets = [0, 179], sizes = [8, 256], strides = [1, 1]} : vector<8x512xf32> to vector<8x256xf32>
    %332 = vector.extract_strided_slice %60 {offsets = [0, 48], sizes = [8, 1], strides = [1, 1]} : vector<8x49xf32> to vector<8x1xf32>
    %333 = vector.broadcast %332 : vector<8x1xf32> to vector<8x256xf32>
    %334 = arith.mulf %331, %333 : vector<8x256xf32>
    %335 = arith.addf %330, %334 : vector<8x256xf32>
    %336 = vector.extract_strided_slice %61 {offsets = [6, 0], sizes = [1, 256], strides = [1, 1]} : vector<7x256xf32> to vector<1x256xf32>
    %337 = vector.broadcast %336 : vector<1x256xf32> to vector<8x256xf32>
    %338 = arith.mulf %335, %337 : vector<8x256xf32>
    %339 = arith.addf %299, %338 : vector<8x256xf32>
    %340 = vector.extract_strided_slice %339 {offsets = [0, 0], sizes = [4, 256], strides = [1, 1]} : vector<8x256xf32> to vector<4x256xf32>
    %341 = vector.extract_strided_slice %339 {offsets = [4, 0], sizes = [4, 256], strides = [1, 1]} : vector<8x256xf32> to vector<4x256xf32>
    %342 = arith.addf %340, %341 : vector<4x256xf32>
    %c0_33 = arith.constant 0 : index
    %343 = memref.load %arg7[%c0_33] : memref<1xf32, #tpu.memory_space<smem>>
    %344 = vector.broadcast %343 : f32 to vector<4x256xf32>
    %345 = arith.addf %342, %344 : vector<4x256xf32>
    %346 = arith.negf %345 : vector<4x256xf32>
    %347 = math.exp %346 : vector<4x256xf32>
    %cst_34 = arith.constant 1.000000e+00 : f32
    %348 = vector.broadcast %cst_34 : f32 to vector<4x256xf32>
    %349 = arith.addf %348, %347 : vector<4x256xf32>
    %350 = arith.divf %348, %349 : vector<4x256xf32>
    %351 = vector.shape_cast %350 : vector<4x256xf32> to vector<4x1x256xf32>
    %352 = vector.broadcast %351 : vector<4x1x256xf32> to vector<4x32x256xf32>
    %353 = arith.mulf %52, %352 : vector<4x32x256xf32>
    %c0_35 = arith.constant 0 : index
    %c0_36 = arith.constant 0 : index
    %c0_37 = arith.constant 0 : index
    %354 = vector.load %arg9[%c0_35, %c0_36, %c0_37] : memref<4x32x256xf32, #tpu.memory_space<vmem>>, vector<4x32x256xf32>
    tpu.vector_store %arg9[%c0_35, %c0_36, %c0_37], %353 {strides = array<i32>} : memref<4x32x256xf32, #tpu.memory_space<vmem>>, vector<4x32x256xf32>,
    return
  }
  func.func @transform_0(%arg0: i32) -> (i32, i32, i32) {
    %c0_i32 = arith.constant 0 : i32
    %c0_i32_0 = arith.constant 0 : i32
    %c0_i32_1 = arith.constant 0 : i32
    return %arg0, %c0_i32, %c0_i32_0 : i32, i32, i32
  }
  func.func @transform_1(%arg0: i32) -> (i32, i32) {
    %c0_i32 = arith.constant 0 : i32
    %c0_i32_0 = arith.constant 0 : i32
    %c0_i32_1 = arith.constant 0 : i32
    return %c0_i32, %c0_i32_0 : i32, i32
  }
  func.func @transform_2(%arg0: i32) -> i32 {
    %c0_i32 = arith.constant 0 : i32
    %c0_i32_0 = arith.constant 0 : i32
    return %c0_i32 : i32
  }
  func.func @transform_3(%arg0: i32) -> (i32, i32) {
    %c0_i32 = arith.constant 0 : i32
    %c0_i32_0 = arith.constant 0 : i32
    %c0_i32_1 = arith.constant 0 : i32
    return %c0_i32, %c0_i32_0 : i32, i32
  }
  func.func @transform_4(%arg0: i32) -> (i32, i32) {
    %c0_i32 = arith.constant 0 : i32
    %c0_i32_0 = arith.constant 0 : i32
    %c0_i32_1 = arith.constant 0 : i32
    return %c0_i32, %c0_i32_0 : i32, i32
  }
  func.func @transform_5(%arg0: i32) -> (i32, i32) {
    %c0_i32 = arith.constant 0 : i32
    %c0_i32_0 = arith.constant 0 : i32
    %c0_i32_1 = arith.constant 0 : i32
    return %c0_i32, %c0_i32_0 : i32, i32
  }
  func.func @transform_6(%arg0: i32) -> i32 {
    %c0_i32 = arith.constant 0 : i32
    %c0_i32_0 = arith.constant 0 : i32
    return %c0_i32 : i32
  }
  func.func @transform_7(%arg0: i32) -> (i32, i32) {
    %c0_i32 = arith.constant 0 : i32
    %c0_i32_0 = arith.constant 0 : i32
    %c0_i32_1 = arith.constant 0 : i32
    return %c0_i32, %c0_i32_0 : i32, i32
  }
  func.func @transform_8(%arg0: i32) -> (i32, i32, i32) {
    %c0_i32 = arith.constant 0 : i32
    %c0_i32_0 = arith.constant 0 : i32
    %c0_i32_1 = arith.constant 0 : i32
    return %arg0, %c0_i32, %c0_i32_0 : i32, i32, i32
  }
}

</mosaic_0001>

<bundles_post_ra>
// kernel: tpu_custom_call.1
= control target key start
LH: loop header
LB: loop body
LE: loop exit
PB: predicated region body
PF: predicated region fallthrough
CT: control target
= control target key end

     0   :  { %s5111_s0 = inlined_call_operand.hbm [shape: f32[8,32,256], index: 0, kind: input, shape index: {}]   ;;  %s5112_s1 = inlined_call_operand.vmem [shape: f32[2,32], index: 1, kind: input, shape index: {}]   ;;  %s5113_s2 = inlined_call_operand.hbm [shape: f32[2], index: 2, kind: input, shape index: {}]   ;;  %s5114_s3 = inlined_call_operand.hbm [shape: f32[2,32], index: 3, kind: input, shape index: {}]   ;;  %s5115_s4 = inlined_call_operand.hbm [shape: f32[1,32], index: 4, kind: input, shape index: {}]   ;;  %s5116_s5 = inlined_call_operand.vmem [shape: f32[8,49], index: 5, kind: input, shape index: {}]   ;;  %s5117_s6 = inlined_call_operand.<no memory space> [shape: f32[1], index: 6, kind: input, shape index: {}]   ;;  %s5118_s7 = inlined_call_operand.vmem [shape: f32[7,256], index: 7, kind: input, shape index: {}]   ;;  %s5119_s8 = inlined_call_operand.hbm [shape: f32[8,32,256], index: 8, kind: output, shape index: {}]  }
   0x1   :  { %13 = sst [smem:[#allocation2]] %s5117_s6 }
   0x2   :  { %14 = vsyncpa [#allocation4], 0 }
   0x3   :  { %16 = vsyncpa [#allocation4 + $0x1], 0 }
   0x4   :  { %17 = vsyncpa [#allocation6], 0 }
   0x5   :  { %18 = vsyncpa [#allocation9], 0 }
   0x6   :  { %19 = vsyncpa [#allocation5], 0 }
   0x7   :  { %21 = vsyncpa [#allocation5 + $0x1], 0  ;;  %s3321_s29 = smov 0   ;;  %s3323_s30 = smov 0  }
   0x8   :  { %s3325_s9 = smov 0   ;;  %s3327_s10 = smov 0  }
   0x9 LB: > { %s3342_s6 = sadd.s32 4294967295, %s3193_s10   ;;  %s2738_s11 = sadd.s32 4294967294, %s3193_s10   ;;  %s3193_s10 = sphi %s3327_s10, %s5503_s10   ;;  %s3189_s9 = sphi %s3325_s9, %s5502_s9   ;;  %s3185_s30 = sphi %s3323_s30, %s5501_s30   ;;  %s3181_s29 = sphi %s3321_s29, %s5500_s29  }
   0xa   : > { %p47_p0 = scmp.ne.s32.totalorder %s3185_s30, %s3181_s29  ;;  %p5120_p1 = scmp.eq.s32.totalorder %s3342_s6, 0 }
   0xb   : > { %p224_p3 = scmp.eq.s32.totalorder %s2738_s11, 1  ;;  %p2739_p5 = scmp.ge.s32.totalorder %s3193_s10, 1 }
   0xc   : > { %p3351_p4 = por %p5120_p1, %p47_p0  ;;  %p231_p7 = scmp.lt.s32.totalorder %s3193_s10, 3 }
   0xd   : > { %p3356_p6 = por %p224_p3, %p47_p0  ;;  %s3195_s15 = smov [#allocation8]  }
   0xe   : > { %s5233_s12 = scalar_select %p3351_p4, 1, 0 }
   0xf   : > { %s5234_s13 = scalar_select %p3356_p6, 1, 0 }
  0x10   : > { %p3361_p8 = pnand %p2739_p5, %p231_p7  ;;  %s256_s16 = sshll.u32 %s3195_s15, 4  ;;  %s257_s16 = int_to_ptr.vmem [resolvable:$true] %s256_s16 }
  0x11   : > { %s3196_s18 = smov [#allocation10]   ;;  %s3377_s20 = sadd.s32 1, %s3193_s10  }
  0x12   : > { %s5235_s14 = scalar_select %p3361_p8, 1, 0 }
  0x13   : > { %p2786_p10 = pneg %p3361_p8  ;;  %s267_s19 = sshll.u32 %s3196_s18, 4  ;;  %s3374_s19 = int_to_ptr.vmem [resolvable:$true] %s267_s19 }
  0x14   : > { %s3020_s23 = scalar_lea.hbm %s5114_s3, 32 }
  0x15   : > { %p3370_p11 = pnand %p2786_p10, %p5120_p1  ;;  %p3021_p12 = scmp.ne.s32.totalorder %s5114_s3, %s3020_s23 }
  0x16   : > { %p3027_p5 = scmp.lt.u32.totalorder %s3020_s23, %s5114_s3 }
  0x17   : > { %p3387_p13 = pneg %p3370_p11 }
  0x19   : > { %p3023_p0 = pnand %p3387_p13, %p3021_p12 }
  0x1b   : > { %p3024_p3 = pneg %p3023_p0 }
  0x1d   : > { %p3029_p7 = pnand %p3027_p5, %p3024_p3 }
  0x1f   : > { %3032 = shalt.err (!%p3029_p7)
}
  0x20   : > { %s3033_s11 = scalar_lea.vmem %s257_s16, 32  ;;  %p3041_p2 = scmp.lt.s32.totalorder %s257_s16, %s257_s16 }
  0x21   : > { %p3034_p10 = scmp.ne.s32.totalorder %s257_s16, %s3033_s11  ;;  %p3042_p6 = scmp.lt.s32.totalorder %s3033_s11, %s3033_s11 }
  0x23   : > { %p3036_p9 = pnand %p3034_p10, %p3387_p13  ;;  %p3043_p4 = por %p3042_p6, %p3041_p2 }
  0x25   : > { %p3037_p1 = pneg %p3036_p9 }
  0x27   : > { %p3044_p8 = pnand %p3043_p4, %p3037_p1 }
  0x29   : > { %3047 = shalt.err (!%p3044_p8)
}
  0x2a   : > { %2792 = dma.hbm_to_vmem [thread:$0]  (!%p3370_p11), %s5114_s3, 32, %s257_s16, [#allocation9]  }
  0x2b   : > { %s3048_s23 = scalar_lea.hbm %s5113_s2, 16 }
  0x2c   : > { %p3049_p9 = scmp.ne.s32.totalorder %s5113_s2, %s3048_s23  ;;  %p3055_p1 = scmp.lt.u32.totalorder %s3048_s23, %s5113_s2 }
  0x2e   : > { %p3051_p12 = pnand %p3049_p9, %p3387_p13 }
  0x30   : > { %p3052_p2 = pneg %p3051_p12 }
  0x32   : > { %p3057_p4 = pnand %p3055_p1, %p3052_p2 }
  0x34   : > { %3060 = shalt.err (!%p3057_p4)
}
  0x35   : > { %s3197_s11 = smov [#allocation7]   ;;  %s3061_s22 = scalar_lea.hbm %s5115_s4, 16 }
  0x36   : > { %2789 = dma.hbm_to_smem (!%p3370_p11), %s5113_s2, 16, %s3197_s11, [#allocation6]  }
  0x37   : > { %p3062_p6 = scmp.ne.s32.totalorder %s5115_s4, %s3061_s22  ;;  %p3068_p3 = scmp.lt.u32.totalorder %s3061_s22, %s5115_s4 }
  0x39   : > { %p3064_p8 = pnand %p3062_p6, %p3387_p13 }
  0x3b   : > { %p3065_p0 = pneg %p3064_p8 }
  0x3d   : > { %p3070_p5 = pnand %p3068_p3, %p3065_p0 }
  0x3f   : > { %3073 = shalt.err (!%p3070_p5)
}
  0x40   : > { %s3074_s28 = scalar_lea.vmem %s3374_s19, 16  ;;  %s3081_s11 = scalar_lea.vmem %s3374_s19, 32 }
  0x41   : > { %p3075_p7 = scmp.ne.s32.totalorder %s3374_s19, %s3074_s28  ;;  %p3082_p12 = scmp.lt.s32.totalorder %s3374_s19, %s3374_s19 }
  0x42   : > { %p3083_p2 = scmp.lt.s32.totalorder %s3081_s11, %s3074_s28 }
  0x43   : > { %p3077_p10 = pnand %p3075_p7, %p3387_p13 }
  0x44   : > { %p3084_p1 = por %p3083_p2, %p3082_p12 }
  0x45   : > { %p3078_p9 = pneg %p3077_p10 }
  0x47   : > { %p3085_p4 = pnand %p3084_p1, %p3078_p9 }
  0x49   : > { %3088 = shalt.err (!%p3085_p4)
}
  0x4a   : > { %2795 = dma.hbm_to_vmem [thread:$0]  (!%p3370_p11), %s5115_s4, 16, %s3374_s19, [#allocation9]  }
  0x4b   : > { %s31_s26 = ssub.s32 %s3193_s10, %s3377_s20  ;;  %s34_s18 = sadd.s32 1, %s3189_s9 }
  0x4c   : > { %p32_p13 = scmp.eq.s32.totalorder %s31_s26, 0  ;;  %p41_p6 = scmp.ne.s32.totalorder %s3189_s9, %s3185_s30 }
  0x4d   : > { %p42_p8 = scmp.eq.s32.totalorder %s3193_s10, 0  ;;  %p2807_p0 = scmp.lt.s32.totalorder %s3193_s10, 2 }
  0x4e   : > { %s3451_s17 = scalar_select %p32_p13, %s3189_s9, %s34_s18  }
  0x4f   : > { %p43_p3 = por %p42_p8, %p41_p6  ;;  %p5238_p5 = scmp.eq.s32.totalorder %s3342_s6, 1 }
  0x50   : > { %s287_s22 = sand.u32 1, %s3189_s9   ;;  %s2767_s24 = sshll.u32 %s3193_s10, 12 }
  0x51   : > { %p3455_p7 = por %p5238_p5, %p41_p6  ;;  %s2744_s25 = sshll.u32 %s287_s22, 8 }
  0x52   : > { %s3464_s19 = scalar_lea.hbm %s5111_s0, %s2767_s24  ;;  %s291_s28 = scalar_lea.vmem [#allocation3], %s2744_s25 }
  0x53   : > { %s299_s11 = sshll.u32 %s291_s28, 4  ;;  %p3466_p11 = pnand %p2807_p0, %p43_p3  ;;  %s3470_s11 = int_to_ptr.vmem [resolvable:$true] %s299_s11 }
  0x54   : > { %s3472_s15 = scalar_lea.sflag [#allocation4], %s287_s22  ;;  %s3089_s26 = scalar_lea.hbm %s3464_s19, 4096 }
  0x55   : > { %p3090_p10 = scmp.ne.s32.totalorder %s3464_s19, %s3089_s26  ;;  %p3091_p9 = pneg %p3466_p11 }
  0x56   : > { %s3094_s25 = scalar_lea.hbm %s5111_s0, 8192  ;;  %p3095_p1 = scmp.lt.u32.totalorder %s3464_s19, %s5111_s0 }
  0x57   : > { %p3092_p12 = pnand %p3091_p9, %p3090_p10  ;;  %p3096_p4 = scmp.lt.u32.totalorder %s3094_s25, %s3089_s26 }
  0x58   : > { %p3098_p6 = scmp.lt.u32.totalorder %s3089_s26, %s3464_s19 }
  0x59   : > { %p3093_p2 = pneg %p3092_p12  ;;  %p3097_p13 = por %p3096_p4, %p3095_p1 }
  0x5b   : > { %p3099_p8 = por %p3098_p6, %p3097_p13 }
  0x5d   : > { %p3100_p0 = pnand %p3099_p8, %p3093_p2 }
  0x5f   : > { %3103 = shalt.err (!%p3100_p0)
}
  0x60   : > { %s3104_s22 = scalar_lea.vmem %s3470_s11, 4096  ;;  %s3198_s28 = smov [#allocation3]  }
  0x61   : > { %p3105_p3 = scmp.ne.s32.totalorder %s3470_s11, %s3104_s22  ;;  %s3109_s18 = sshll.u32 %s3198_s28, 4  ;;  %s3110_s18 = int_to_ptr.vmem [resolvable:$false] %s3109_s18 }
  0x62   : > { %s3111_s24 = scalar_lea.vmem %s3110_s18, 8192  ;;  %p3112_p12 = scmp.lt.s32.totalorder %s3470_s11, %s3110_s18 }
  0x63   : > { %p3107_p5 = pnand %p3105_p3, %p3091_p9  ;;  %p3113_p1 = scmp.lt.s32.totalorder %s3111_s24, %s3104_s22 }
  0x65   : > { %p3108_p10 = pneg %p3107_p5  ;;  %p3114_p4 = por %p3113_p1, %p3112_p12 }
  0x67   : > { %p3115_p13 = pnand %p3114_p4, %p3108_p10 }
  0x69   : > { %3118 = shalt.err (!%p3115_p13)
}
  0x6a   : > { %s3199_s26 = smov 256   ;;  %s3200_s25 = smov 16  }
  0x6b   : > { %2799 = dma.hbm_to_vmem [thread:$0]  (!%p3466_p11), %s3464_s19, 4096, %s3470_s11, %s3472_s15, %s3199_s26, %s3199_s26, %s3200_s25  }
  0x6c   : > { %p5241_p9 = scmp.ne.s32.totalorder %s5235_s14, 0 }
  0x6e   : > { %311 = sbr.rel (%p5241_p9) target bundleno = 1710 (0x6ae), region = 52 }
  0x75   : > { %s3503_s23 = sand.u32 1, %s3185_s30   ;;  %p5242_p2 = scmp.ne.s32.totalorder %s5233_s12, 0 }
  0x76   : > { %s2749_s27 = sshll.u32 %s3503_s23, 8  ;;  %s314_s22 = scalar_lea.sflag [#allocation4], %s3503_s23 }
  0x77   : > { %s3509_s28 = scalar_lea.vmem [#allocation3], %s2749_s27 }
  0x78   : > { %3164 = dma.done.wait (%p5242_p2), %s314_s22, 4096  }
  0x79   : > { %3166 = vsyncadd (%p5242_p2), %s314_s22, 4294963200  ;;  %p5243_p11 = scmp.eq.s32.totalorder %s3342_s6, 0 }
  0x7b   : > { %3168 = dma.done.wait (%p5243_p11), [#allocation6], 16   ;;  %p5244_p6 = pmov %p5243_p11 }
  0x7d   : > { %3170 = vsyncadd (%p5244_p6), [#allocation6], 4294967280  ;;  %p5245_p8 = pmov %p5244_p6 }
  0x7e   : > { %p5246_p0 = pmov %p5244_p6 }
  0x7f   : > { %3172 = dma.done.wait (%p5245_p8), [#allocation9], 48  }
  0x80   : > { %3174 = vsyncadd (%p5246_p0), [#allocation9], 4294967248 }
  0x81   : > { %334 = sfence }
  0x82   : > { %v3524_v0 = vld [vmem:[%s3509_s28 + $0x20] sm:$0xff]  ;;  %v3527_v1 = vld [vmem:[%s3509_s28 + $0x28] sm:$0xff]  ;;  %v3538_v5 = vld [vmem:[%s3509_s28 + $0x30] sm:$0xff]  ;;  %v3201_v7 = vmov 7   ;;  %v3202_v11 = vmov 0   ;;  %s3207_s16 = smov 77  }
  0x83   : > { %v3530_v2 = vld [vmem:[%s3509_s28] sm:$0xff]  ;;  %v403_v3 = vadd.f32 %v3527_v1, %v3524_v0  ;;  %v3535_v4 = vld [vmem:[%s3509_s28 + $0x8] sm:$0xff]  ;;  %v3541_v6 = vld [vmem:[%s3509_s28 + $0x38] sm:$0xff]  ;;  %2921 = vset.pattern.permute.xlu1 %v3201_v7  ;;  %2920 = vset.pattern.permute.xlu0 %v3202_v11  ;;  %v468_v53 = vmax.f32 %v3524_v0, %v3527_v1  ;;  %v3204_v7 = vmov 28   ;;  %v3206_v11 = vmov 35   ;;  %s3210_s24 = smov 78  }
  0x84   : > { %v397_v8 = vadd.f32 %v3535_v4, %v3530_v2  ;;  %v367_v9 = vld [vmem:[%s3509_s28 + $0x10] sm:$0xff]  ;;  %v368_v10 = vld [vmem:[%s3509_s28 + $0x18] sm:$0xff]  ;;  %v406_v12 = vadd.f32 %v3541_v6, %v3538_v5  ;;  %v373_v16 = vld [vmem:[%s3509_s28 + $0x40] sm:$0xff]  ;;  %v462_v51 = vmax.f32 %v3530_v2, %v3535_v4  ;;  %v471_v52 = vmax.f32 %v3538_v5, %v3541_v6  ;;  %s3219_s22 = smov 112   ;;  %s3220_s12 = smov 80  }
  0x85   : > { %404 = vadd.xlane.f32.xlu1 %v403_v3  ;;  %v400_v13 = vadd.f32 %v368_v10, %v367_v9  ;;  %v375_v14 = vld [vmem:[%s3509_s28 + $0x50] sm:$0xff]  ;;  %v376_v15 = vld [vmem:[%s3509_s28 + $0x58] sm:$0xff]  ;;  %v374_v17 = vld [vmem:[%s3509_s28 + $0x48] sm:$0xff]  ;;  %v465_v50 = vmax.f32 %v367_v9, %v368_v10  ;;  %v526_v3 = vlaneseq  ;;  %v3203_v4 = vmov 21   ;;  %s3221_s14 = smov 64   ;;  %s3222_s19 = smov 96  }
  0x86   : > { %398 = vadd.xlane.f32.xlu0 %v397_v8  ;;  %v412_v18 = vadd.f32 %v376_v15, %v375_v14  ;;  %v409_v19 = vadd.f32 %v374_v17, %v373_v16  ;;  %v379_v20 = vld [vmem:[%s3509_s28 + $0x70] sm:$0xff]  ;;  %v380_v21 = vld [vmem:[%s3509_s28 + $0x78] sm:$0xff]  ;;  %v377_v22 = vld [vmem:[%s3509_s28 + $0x60] sm:$0xff]  ;;  %v477_v54 = vmax.f32 %v375_v14, %v376_v15  ;;  %v474_v55 = vmax.f32 %v373_v16, %v374_v17  ;;  %s3223_s11 = smov 48   ;;  %s3231_s15 = smov 79  }
  0x87   : > { %v378_v23 = vld [vmem:[%s3509_s28 + $0x68] sm:$0xff]  ;;  %v418_v24 = vadd.f32 %v380_v21, %v379_v20  ;;  %v383_v26 = vld [vmem:[%s3509_s28 + $0x90] sm:$0xff]  ;;  %v384_v27 = vld [vmem:[%s3509_s28 + $0x98] sm:$0xff]  ;;  %v483_v56 = vmax.f32 %v379_v20, %v380_v21  ;;  %v3587_v5 = vshrl.u32 %v526_v3, 7  ;;  %v3205_v9 = vmov 14   ;;  %s730_s18 = sld [smem:[#allocation7]] }
  0x88   : > { %v415_v25 = vadd.f32 %v378_v23, %v377_v22  ;;  %v381_v28 = vld [vmem:[%s3509_s28 + $0x80] sm:$0xff]  ;;  %v382_v29 = vld [vmem:[%s3509_s28 + $0x88] sm:$0xff]  ;;  %v424_v30 = vadd.f32 %v384_v27, %v383_v26  ;;  %v387_v32 = vld [vmem:[%s3509_s28 + $0xb0] sm:$0xff]  ;;  %v480_v57 = vmax.f32 %v377_v22, %v378_v23  ;;  %v489_v58 = vmax.f32 %v383_v26, %v384_v27  ;;  %s2407_s26 = sld [smem:[#allocation2]]  ;;  %s3269_s25 = smov 51  }
  0x89   : > { %407 = vadd.xlane.f32.xlu1 %v406_v12  ;;  %v421_v31 = vadd.f32 %v382_v29, %v381_v28  ;;  %v388_v33 = vld [vmem:[%s3509_s28 + $0xb8] sm:$0xff]  ;;  %v385_v34 = vld [vmem:[%s3509_s28 + $0xa0] sm:$0xff]  ;;  %v386_v35 = vld [vmem:[%s3509_s28 + $0xa8] sm:$0xff]  ;;  %v486_v59 = vmax.f32 %v381_v28, %v382_v29  ;;  %5247 = vst [vmem:[#allocation16_spill] sm:$0xff] %v3587_v5  ;;  %v3596_v8 = vsub.s32 0, %v3587_v5  ;;  %v3208_v12 = vmov 8  }
  0x8a   : > { %401 = vadd.xlane.f32.xlu0 %v400_v13  ;;  %v430_v36 = vadd.f32 %v388_v33, %v387_v32  ;;  %v427_v37 = vadd.f32 %v386_v35, %v385_v34  ;;  %v391_v38 = vld [vmem:[%s3509_s28 + $0xd0] sm:$0xff]  ;;  %v392_v39 = vld [vmem:[%s3509_s28 + $0xd8] sm:$0xff]  ;;  %v389_v40 = vld [vmem:[%s3509_s28 + $0xc0] sm:$0xff]  ;;  %v495_v60 = vmax.f32 %v387_v32, %v388_v33  ;;  %v492_v61 = vmax.f32 %v385_v34, %v386_v35 }
  0x8b   : > { %v390_v41 = vld [vmem:[%s3509_s28 + $0xc8] sm:$0xff]  ;;  %v436_v42 = vadd.f32 %v392_v39, %v391_v38  ;;  %v395_v44 = vld [vmem:[%s3509_s28 + $0xf0] sm:$0xff]  ;;  %v396_v45 = vld [vmem:[%s3509_s28 + $0xf8] sm:$0xff]  ;;  %v501_v62 = vmax.f32 %v391_v38, %v392_v39  ;;  %5248 = vst [vmem:[#allocation17_spill] sm:$0xff] %v3596_v8  ;;  %v3609_v14 = vsub.s32 1, %v3587_v5  ;;  %v3209_v15 = vmov 42  }
  0x8c   : > { %v433_v43 = vadd.f32 %v390_v41, %v389_v40  ;;  %v393_v46 = vld [vmem:[%s3509_s28 + $0xe0] sm:$0xff]  ;;  %v394_v47 = vld [vmem:[%s3509_s28 + $0xe8] sm:$0xff]  ;;  %v442_v48 = vadd.f32 %v396_v45, %v395_v44  ;;  %v498_v63 = vmax.f32 %v389_v40, %v390_v41  ;;  %v507_v0 = vmax.f32 %v395_v44, %v396_v45 }
  0x8d   : > { %413 = vadd.xlane.f32.xlu1 %v412_v18  ;;  %v439_v49 = vadd.f32 %v394_v47, %v393_v46  ;;  %v504_v1 = vmax.f32 %v393_v46, %v394_v47  ;;  %v3582_v2 = vld [vmem:[%s5116_s5] sm:$0xff]  ;;  %v3593_v6 = vld [vmem:[%s5118_s7 + $0x8] sm:$0x7f]  ;;  %5249 = vst [vmem:[#allocation18_spill] sm:$0xff] %v3609_v14  ;;  %v3211_v18 = vmov 1   ;;  %v3213_v20 = vmov 22  }
  0x8e   : > { %410 = vadd.xlane.f32.xlu0 %v409_v19  ;;  %v1240_v10 = vrot.slane %v3593_v6, %v3596_v8  ;;  %v3606_v13 = vld [vmem:[%s5118_s7] sm:$0x7f]  ;;  %v1419_v16 = vrot.slane %v3593_v6, %v3609_v14  ;;  %v3212_v19 = vmov 15   ;;  %v3214_v21 = vmov 29  }
  0x8f   : > { %v1236_v17 = vrot.slane %v3606_v13, %v3596_v8  ;;  %v3215_v22 = vmov 36   ;;  %v3216_v23 = vmov 43   ;;  %v3218_v26 = vmov 9  }
  0x90   : > { %v527_v45 = vand.u32 127, %v526_v3  ;;  %vm537_vm0 = vcmask 130112   ;;  %vm544_vm1 = vcmask 195712   ;;  %vm551_vm2 = vcmask 261312  }
  0x91   : > { %419 = vadd.xlane.f32.xlu1 %v418_v24  ;;  %v1415_v24 = vrot.slane %v3606_v13, %v3609_v14  ;;  %vm610_vm3 = vcmask 1041409   ;;  %vm709_vm4 = vcmask 1045509   ;;  %vm612_vm5 = vcmask 1042434  }
  0x92   : > { %416 = vadd.xlane.f32.xlu0 %v415_v25  ;;  %v3217_v25 = vmov 2   ;;  %v532_v47 = vadd.s32 4294967288, %v527_v45  ;;  %vm711_vm6 = vcmask 1046534   ;;  %vm614_vm7 = vcmask 1043459  }
  0x93   : > { %vm713_vm8 = vcmask 1047559   ;;  %vm716_vm9 = vcmask 1043456   ;;  %vm726_vm10 = vcmask 261120   ;;  %vm1100_vm11 = vcmask 916480  }
  0x94   : > { %vm1125_vm12 = vcmask 785408   ;;  %vm1150_vm13 = vcmask 654336   ;;  %vm1175_vm14 = vcmask 523264   ;;  %vm1200_vm15 = vcmask 392192  }
  0x95   : > { %425 = vadd.xlane.f32.xlu1 %v424_v30 }
  0x96   : > { %422 = vadd.xlane.f32.xlu0 %v421_v31 }
  0x99   : > { %431 = vadd.xlane.f32.xlu1 %v430_v36 }
  0x9a   : > { %428 = vadd.xlane.f32.xlu0 %v427_v37 }
  0x9d   : > { %437 = vadd.xlane.f32.xlu1 %v436_v42 }
  0x9e   : > { %434 = vadd.xlane.f32.xlu0 %v433_v43 }
  0xa1   : > { %443 = vadd.xlane.f32.xlu1 %v442_v48 }
  0xa2   : > { %440 = vadd.xlane.f32.xlu0 %v439_v49 }
  0xa5   : > { %466 = vmax.xlane.f32.xlu1 %v465_v50  ;;  %v539_v50 = vadd.s32 4294967280, %v527_v45 }
  0xa6   : > { %463 = vmax.xlane.f32.xlu0 %v462_v51  ;;  %v3637_v51 = vsub.s32 %v527_v45, %v3587_v5 }
  0xa9   : > { %472 = vmax.xlane.f32.xlu1 %v471_v52  ;;  %v3640_v52 = vsub.s32 %v532_v47, %v3587_v5 }
  0xaa   : > { %469 = vmax.xlane.f32.xlu0 %v468_v53 }
  0xad   : > { %478 = vmax.xlane.f32.xlu1 %v477_v54 }
  0xae   : > { %475 = vmax.xlane.f32.xlu0 %v474_v55 }
  0xb1   : > { %484 = vmax.xlane.f32.xlu1 %v483_v56 }
  0xb2   : > { %481 = vmax.xlane.f32.xlu0 %v480_v57 }
  0xb5   : > { %490 = vmax.xlane.f32.xlu1 %v489_v58 }
  0xb6   : > { %487 = vmax.xlane.f32.xlu0 %v486_v59  ;;  %v3647_v59 = vsub.s32 %v539_v50, %v3587_v5 }
  0xb9   : > { %496 = vmax.xlane.f32.xlu1 %v495_v60 }
  0xba   : > { %493 = vmax.xlane.f32.xlu0 %v492_v61  ;;  %v546_v61 = vadd.s32 4294967272, %v527_v45 }
  0xbd   : > { %502 = vmax.xlane.f32.xlu1 %v501_v62 }
  0xbe   : > { %499 = vmax.xlane.f32.xlu0 %v498_v63 }
  0xc1   : > { %508 = vmax.xlane.f32.xlu1 %v507_v0 }
  0xc2   : > { %505 = vmax.xlane.f32.xlu0 %v504_v1 }
  0xd2   : > { %1085 = vperm.xlu1 %2921, %v3582_v2  }
  0xd6   : > { %2923 = vset.pattern.permute.xlu1 %v3203_v4 }
  0xd7   : > { %1135 = vperm.xlu1 %2923, %v3582_v2  }
  0xd8   : > { %1075 = vperm.xlu0 %2920, %v3582_v2  }
  0xdb   : > { %2924 = vset.pattern.permute.xlu1 %v3204_v7 }
  0xdc   : > { %1160 = vperm.xlu1 %2924, %v3582_v2   ;;  %2922 = vset.pattern.permute.xlu0 %v3205_v9 }
  0xdd   : > { %1110 = vperm.xlu0 %2922, %v3582_v2  }
  0xe0   : > { %2925 = vset.pattern.permute.xlu1 %v3206_v11 }
  0xe1   : > { %1185 = vperm.xlu1 %2925, %v3582_v2   ;;  %1245 = vrot.lane.b32.xlu0 %v1240_v10, %s3207_s16 }
  0xe2   : > { %2928 = vset.pattern.permute.xlu0 %v3208_v12 }
  0xe5   : > { %2926 = vset.pattern.permute.xlu1 %v3209_v15  ;;  %1269 = vperm.xlu0 %2928, %v3582_v2  }
  0xe6   : > { %1210 = vperm.xlu1 %2926, %v3582_v2  }
  0xe9   : > { %1424 = vrot.lane.b32.xlu0 %v1419_v16, %s3210_s24 }
  0xea   : > { %1243 = vrot.lane.b32.xlu1 %v1236_v17, %s3207_s16  ;;  %2934 = vset.pattern.permute.xlu0 %v3217_v25  ;;  %v3658_v17 = vsub.s32 %v546_v61, %v3587_v5  ;;  %s3224_s16 = smov 32  }
  0xeb   : > { %2927 = vset.pattern.permute.xlu1 %v3211_v18 }
  0xee   : > { %1259 = vperm.xlu1 %2927, %v3582_v2  }
  0xf2   : > { %2929 = vset.pattern.permute.xlu1 %v3212_v19 }
  0xf3   : > { %1293 = vperm.xlu1 %2929, %v3582_v2  }
  0xf7   : > { %2930 = vset.pattern.permute.xlu1 %v3213_v20 }
  0xf8   : > { %1317 = vperm.xlu1 %2930, %v3582_v2  }
  0xfc   : > { %2931 = vset.pattern.permute.xlu1 %v3214_v21 }
  0xfd   : > { %1341 = vperm.xlu1 %2931, %v3582_v2  }
 0x101   : > { %2932 = vset.pattern.permute.xlu1 %v3215_v22 }
 0x102   : > { %1365 = vperm.xlu1 %2932, %v3582_v2  }
 0x106   : > { %2933 = vset.pattern.permute.xlu1 %v3216_v23 }
 0x107   : > { %1389 = vperm.xlu1 %2933, %v3582_v2  }
 0x10b   : > { %1422 = vrot.lane.b32.xlu1 %v1415_v24, %s3210_s24  ;;  %s2754_s24 = sld [smem:[#allocation7 + $0x1]] }
 0x10c   : > { %2935 = vset.pattern.permute.xlu1 %v3218_v26 }
 0x112   : > { %v405_v27 = vpop.xlane.xlu1 %404 }
 0x113   : > { %v399_v28 = vpop.xlane.xlu0 %398  ;;  %v3649_v60 = vmul.f32 0.00390625, %v405_v27 }
 0x114   : > { %v446_v54 = vmul.f32 0.00390625, %v399_v28 }
 0x115   : > { %v543_v16 = vrot.slane %v3649_v60, %v3647_v59 }
 0x116   : > { %v408_v29 = vpop.xlane.xlu1 %407  ;;  %v531_v63 = vrot.slane %v446_v54, %v3637_v51 }
 0x117   : > { %v402_v30 = vpop.xlane.xlu0 %401  ;;  %v3660_v19 = vmul.f32 0.00390625, %v408_v29 }
 0x118   : > { %v447_v55 = vmul.f32 0.00390625, %v402_v30 }
 0x11a   : > { %v414_v31 = vpop.xlane.xlu1 %413  ;;  %v536_v0 = vrot.slane %v447_v55, %v3640_v52 }
 0x11b   : > { %v411_v32 = vpop.xlane.xlu0 %410  ;;  %v451_v56 = vmul.f32 0.00390625, %v414_v31 }
 0x11c   : > { %v450_v57 = vmul.f32 0.00390625, %v411_v32  ;;  %v538_v20 = vsel %vm537_vm0, %v536_v0, %v531_v63 }
 0x11d   : > { %v560_v1 = vrot.slane %v451_v56, %v3640_v52 }
 0x11e   : > { %v420_v33 = vpop.xlane.xlu1 %419  ;;  %v556_v3 = vrot.slane %v450_v57, %v3637_v51 }
 0x11f   : > { %v417_v34 = vpop.xlane.xlu0 %416  ;;  %v453_v22 = vmul.f32 0.00390625, %v420_v33 }
 0x120   : > { %v452_v4 = vmul.f32 0.00390625, %v417_v34  ;;  %v561_v21 = vsel %vm537_vm0, %v560_v1, %v556_v3 }
 0x122   : > { %v426_v35 = vpop.xlane.xlu1 %425  ;;  %v565_v23 = vrot.slane %v452_v4, %v3647_v59 }
 0x123   : > { %v423_v36 = vpop.xlane.xlu0 %422  ;;  %v455_v7 = vmul.f32 0.00390625, %v426_v35 }
 0x124   : > { %v454_v9 = vmul.f32 0.00390625, %v423_v36 }
 0x125   : > { %v579_v24 = vrot.slane %v455_v7, %v3640_v52 }
 0x126   : > { %v432_v37 = vpop.xlane.xlu1 %431  ;;  %v575_v25 = vrot.slane %v454_v9, %v3637_v51 }
 0x127   : > { %v429_v38 = vpop.xlane.xlu0 %428  ;;  %v457_v26 = vmul.f32 0.00390625, %v432_v37 }
 0x128   : > { %v456_v10 = vmul.f32 0.00390625, %v429_v38 }
 0x129   : > { %v589_v47 = vrot.slane %v457_v26, %v3658_v17 }
 0x12a   : > { %v438_v39 = vpop.xlane.xlu1 %437  ;;  %v584_v27 = vrot.slane %v456_v10, %v3647_v59 }
 0x12b   : > { %v435_v40 = vpop.xlane.xlu0 %434  ;;  %v459_v11 = vmul.f32 0.00390625, %v438_v39 }
 0x12c   : > { %v458_v12 = vmul.f32 0.00390625, %v435_v40 }
 0x12d   : > { %v598_v28 = vrot.slane %v459_v11, %v3640_v52  ;;  %v550_v11 = vrot.slane %v3660_v19, %v3658_v17 }
 0x12e   : > { %v444_v41 = vpop.xlane.xlu1 %443  ;;  %v594_v29 = vrot.slane %v458_v12, %v3637_v51 }
 0x12f   : > { %v441_v42 = vpop.xlane.xlu0 %440  ;;  %v461_v32 = vmul.f32 0.00390625, %v444_v41  ;;  %v570_v41 = vrot.slane %v453_v22, %v3658_v17 }
 0x130   : > { %v460_v30 = vmul.f32 0.00390625, %v441_v42  ;;  %v566_v42 = vsel %vm544_vm1, %v565_v23, %v561_v21  ;;  %v599_v54 = vsel %vm537_vm0, %v598_v28, %v594_v29 }
 0x131   : > { %v608_v55 = vrot.slane %v461_v32, %v3658_v17  ;;  %v571_v12 = vsel %vm551_vm2, %v570_v41, %v566_v42 }
 0x132   : > { %v3625_v43 = vpop.xlane.xlu1 %466 }
 0x133   : > { %v3627_v44 = vpop.xlane.xlu0 %463  ;;  %v640_v33 = vrot.slane %v3625_v43, %v3640_v52  ;;  %v580_v43 = vsel %vm537_vm0, %v579_v24, %v575_v25 }
 0x134   : > { %v636_v37 = vrot.slane %v3627_v44, %v3637_v51  ;;  %v585_v44 = vsel %vm544_vm1, %v584_v27, %v580_v43 }
 0x136   : > { %v3630_v46 = vpop.xlane.xlu1 %472  ;;  %v641_v61 = vsel %vm537_vm0, %v640_v33, %v636_v37 }
 0x137   : > { %v3632_v48 = vpop.xlane.xlu0 %469 }
 0x138   : > { %v645_v50 = vrot.slane %v3632_v48, %v3647_v59  ;;  %v650_v48 = vrot.slane %v3630_v46, %v3658_v17 }
 0x13a   : > { %v3634_v49 = vpop.xlane.xlu1 %478  ;;  %v646_v9 = vsel %vm544_vm1, %v645_v50, %v641_v61 }
 0x13b   : > { %v3642_v53 = vpop.xlane.xlu0 %475  ;;  %v659_v34 = vrot.slane %v3634_v49, %v3640_v52  ;;  %v603_v49 = vrot.slane %v460_v30, %v3647_v59  ;;  %v651_v19 = vsel %vm551_vm2, %v650_v48, %v646_v9 }
 0x13c   : > { %v655_v35 = vrot.slane %v3642_v53, %v3637_v51 }
 0x13d   : > { %v604_v7 = vsel %vm544_vm1, %v603_v49, %v599_v54 }
 0x13e   : > { %v3644_v58 = vpop.xlane.xlu1 %484  ;;  %v660_v56 = vsel %vm537_vm0, %v659_v34, %v655_v35 }
 0x13f   : > { %v482_v62 = vpop.xlane.xlu0 %481  ;;  %v669_v57 = vrot.slane %v3644_v58, %v3658_v17  ;;  %v545_v58 = vsel %vm544_vm1, %v543_v16, %v538_v20  ;;  %v590_v20 = vsel %vm551_vm2, %v589_v47, %v585_v44 }
 0x140   : > { %v664_v38 = vrot.slane %v482_v62, %v3647_v59  ;;  %v552_v22 = vsel %vm551_vm2, %v550_v11, %v545_v58 }
 0x141   : > { %v611_v25 = vsel %vm610_vm3, %v571_v12, %v552_v22 }
 0x142   : > { %v491_v15 = vpop.xlane.xlu1 %490  ;;  %v665_v62 = vsel %vm544_vm1, %v664_v38, %v660_v56  ;;  %v613_v28 = vsel %vm612_vm5, %v590_v20, %v611_v25 }
 0x143   : > { %v488_v18 = vpop.xlane.xlu0 %487  ;;  %v678_v39 = vrot.slane %v491_v15, %v3640_v52  ;;  %v670_v46 = vsel %vm551_vm2, %v669_v57, %v665_v62 }
 0x144   : > { %v674_v40 = vrot.slane %v488_v18, %v3637_v51  ;;  %v710_v26 = vsel %vm709_vm4, %v670_v46, %v651_v19 }
 0x146   : > { %v497_v31 = vpop.xlane.xlu1 %496  ;;  %v679_v63 = vsel %vm537_vm0, %v678_v39, %v674_v40 }
 0x147   : > { %v494_v36 = vpop.xlane.xlu0 %493  ;;  %v688_v0 = vrot.slane %v497_v31, %v3658_v17 }
 0x148   : > { %v683_v45 = vrot.slane %v494_v36, %v3647_v59 }
 0x14a   : > { %v503_v53 = vpop.xlane.xlu1 %502  ;;  %v684_v1 = vsel %vm544_vm1, %v683_v45, %v679_v63 }
 0x14b   : > { %v500_v60 = vpop.xlane.xlu0 %499  ;;  %v697_v3 = vrot.slane %v503_v53, %v3640_v52  ;;  %v689_v16 = vsel %vm551_vm2, %v688_v0, %v684_v1 }
 0x14c   : > { %v693_v4 = vrot.slane %v500_v60, %v3637_v51  ;;  %v3715_v51 = vld [vmem:[%s5112_s1] sm:$0x3]  ;;  %v712_v30 = vsel %vm711_vm6, %v689_v16, %v710_v26 }
 0x14e   : > { %v509_v10 = vpop.xlane.xlu1 %508  ;;  %v698_v21 = vsel %vm537_vm0, %v697_v3, %v693_v4  ;;  %v3225_v3 = vmov 16   ;;  %v3226_v4 = vmov 23   ;;  %vm1426_vm0 = vcmask 637952  }
 0x14f   : > { %v707_v15 = vrot.slane %v509_v10, %v3658_v17  ;;  %v506_v52 = vpop.xlane.xlu0 %505  ;;  %v609_v17 = vsel %vm551_vm2, %v608_v55, %v604_v7 }
 0x150   : > { %v702_v18 = vrot.slane %v506_v52, %v3647_v59  ;;  %v724_v59 = vrot.slane %v3715_v51, %v3596_v8  ;;  %v615_v31 = vsel %vm614_vm7, %v609_v17, %v613_v28  ;;  %v3229_v28 = vmov 44  }
 0x152   : > { %v703_v23 = vsel %vm544_vm1, %v702_v18, %v698_v21  ;;  %v3725_v24 = vpop.permute.xlu1 %1085  ;;  %vm1620_vm1 = vcmask 646144  }
 0x153   : > { %v1088_v27 = vmul.f32 0.0, %v3725_v24  ;;  %v708_v29 = vsel %vm551_vm2, %v707_v15, %v703_v23  ;;  %vm2175_vm2 = vcmask 670720  }
 0x154   : > { %v714_v32 = vsel %vm713_vm8, %v708_v29, %v712_v30  ;;  %v3230_v29 = vmov 10   ;;  %v743_v30 = vrot.slane %v3715_v51, %v3609_v14  ;;  %v3233_v51 = vmov 11  }
 0x155   : > { %1094 = vrot.lane.b32.xlu1 %v1088_v27, %s3219_s22  ;;  %v3739_v33 = vsel %vm716_vm9, %v615_v31, %v714_v32  ;;  %v3228_v27 = vmov 37  }
 0x156   : > { %v3741_v34 = vpop.permute.xlu1 %1135  ;;  %v3744_v35 = vmul.f32 %v724_v59, %v3739_v33  ;;  %v3227_v59 = vmov 30   ;;  %v744_v31 = vmul.f32 %v743_v30, %v3739_v33  ;;  %v3234_v33 = vmov 18  }
 0x157   : > { %v1138_v36 = vmul.f32 0.0, %v3741_v34  ;;  %v3747_v37 = vpop.permute.xlu0 %1075  ;;  %v3246_v30 = vmov 47  }
 0x158   : > { %5250 = vst [vmem:[#allocation19_spill] sm:$0xff] %v3747_v37  ;;  %v745_v32 = vsel %vm726_vm10, %v744_v31, 0.0  ;;  %v3247_v31 = vmov 41  }
 0x159   : > { %1144 = vrot.lane.b32.xlu0 %v1138_v36, %s3220_s12  ;;  %v3846_v36 = vsub.s32 2, %v3587_v5 }
 0x15b   : > { %v3750_v38 = vpop.permute.xlu1 %1160  ;;  %5269 = vst [vmem:[#allocation38_spill] sm:$0xff] %v3846_v36 }
 0x15c   : > { %v1165_v39 = vmul.f32 0.0, %v3750_v38  ;;  %v3753_v40 = vpop.permute.xlu0 %1110 }
 0x15d   : > { %v1113_v41 = vmul.f32 0.0, %v3753_v40 }
 0x15e   : > { %1173 = vrot.lane.b32.xlu0 %v1165_v39, %s3221_s14  ;;  %v1609_v39 = vrot.slane %v3606_v13, %v3846_v36  ;;  %v3236_v13 = vmov 25  }
 0x15f   : > { %1119 = vrot.lane.b32.xlu1 %v1113_v41, %s3222_s19  ;;  %v3232_v41 = vmov 3  }
 0x160   : > { %v3758_v42 = vpop.permute.xlu1 %1185  ;;  %v3760_v43 = vpop.permute.xlu0 %1245 }
 0x161   : > { %5251 = vst [vmem:[#allocation20_spill] sm:$0xff] %v3760_v43  ;;  %v1190_v45 = vmul.f32 0.0, %v3758_v42 }
 0x163   : > { %1198 = vrot.lane.b32.xlu0 %v1190_v45, %s3223_s11  ;;  %v3235_v45 = vmov 12  }
 0x164   : > { %v3764_v47 = vpop.permute.xlu0 %1269 }
 0x165   : > { %v3766_v44 = vpop.permute.xlu1 %1210  ;;  %v1272_v49 = vmul.f32 0.0, %v3764_v47 }
 0x166   : > { %v1215_v50 = vmul.f32 0.0, %v3766_v44 }
 0x167   : > { %1278 = vrot.lane.b32.xlu1 %v1272_v49, %s3219_s22  ;;  %v3237_v49 = vmov 19  }
 0x168   : > { %1223 = vrot.lane.b32.xlu0 %v1215_v50, %s3224_s16  ;;  %v3799_v58 = vpop.permute.xlu0 %1424  ;;  %v3238_v50 = vmov 31  }
 0x169   : > { %v3772_v53 = vpop.permute.xlu1 %1243  ;;  %5254 = vst [vmem:[#allocation23_spill] sm:$0xff] %v3799_v58 }
 0x16a   : > { %5252 = vst [vmem:[#allocation21_spill] sm:$0xff] %v3772_v53 }
 0x16b   : > { %1463 = vperm.xlu1 %2935, %v3582_v2  }
 0x16d   : > { %v3775_v54 = vpop.permute.xlu1 %1259 }
 0x16e   : > { %5253 = vst [vmem:[#allocation22_spill] sm:$0xff] %v3775_v54 }
 0x16f   : > { %2937 = vset.pattern.permute.xlu1 %v3226_v4  ;;  %v3243_v4 = vmov 27  }
 0x172   : > { %v3777_v55 = vpop.permute.xlu1 %1293 }
 0x173   : > { %v1296_v56 = vmul.f32 0.0, %v3777_v55 }
 0x175   : > { %1302 = vrot.lane.b32.xlu0 %v1296_v56, %s3222_s19  ;;  %v3239_v56 = vmov 32  }
 0x177   : > { %v3781_v57 = vpop.permute.xlu1 %1317 }
 0x178   : > { %v1320_v60 = vmul.f32 0.0, %v3781_v57 }
 0x17a   : > { %1326 = vrot.lane.b32.xlu0 %v1320_v60, %s3220_s12  ;;  %v3240_v60 = vmov 20  }
 0x17c   : > { %v3785_v61 = vpop.permute.xlu1 %1341 }
 0x17d   : > { %v1346_v62 = vmul.f32 0.0, %v3785_v61 }
 0x17f   : > { %1354 = vrot.lane.b32.xlu0 %v1346_v62, %s3221_s14  ;;  %v3241_v62 = vmov 38  }
 0x181   : > { %v3789_v63 = vpop.permute.xlu1 %1365 }
 0x182   : > { %v1370_v0 = vmul.f32 0.0, %v3789_v63 }
 0x184   : > { %1378 = vrot.lane.b32.xlu0 %v1370_v0, %s3223_s11 }
 0x186   : > { %v3793_v48 = vpop.permute.xlu1 %1389 }
 0x187   : > { %v1394_v1 = vmul.f32 0.0, %v3793_v48 }
 0x189   : > { %1402 = vrot.lane.b32.xlu0 %v1394_v1, %s3224_s16  ;;  %v3242_v1 = vmov 33  }
 0x18a   : > { %v3801_v7 = vpop.permute.xlu1 %1422 }
 0x18b   : > { %5255 = vst [vmem:[#allocation24_spill] sm:$0xff] %v3801_v7 }
 0x18d   : > { %1453 = vperm.xlu0 %2934, %v3582_v2  }
 0x191   : > { %2936 = vset.pattern.permute.xlu0 %v3225_v3 }
 0x192   : > { %1487 = vperm.xlu0 %2936, %v3582_v2  }
 0x196   : > { %2941 = vset.pattern.permute.xlu0 %v3232_v41  ;;  %v727_v41 = vsel %vm726_vm10, %v3744_v35, 0.0 }
 0x1c7   : > { %v3805_v10 = vpop.permute.xlu1 %1094 }
 0x1c8   : > { %5257 = vst [vmem:[#allocation26_spill] sm:$0xff] %v3805_v10 }
 0x1cb   : > { %v3803_v9 = vpop.permute.xlu0 %1144 }
 0x1cc   : > { %5256 = vst [vmem:[#allocation25_spill] sm:$0xff] %v3803_v9 }
 0x1d0   : > { %v3807_v11 = vpop.permute.xlu0 %1173 }
 0x1d1   : > { %5258 = vst [vmem:[#allocation27_spill] sm:$0xff] %v3807_v11  ;;  %v3809_v12 = vpop.permute.xlu1 %1119 }
 0x1d2   : > { %5259 = vst [vmem:[#allocation28_spill] sm:$0xff] %v3809_v12 }
 0x1d5   : > { %v3811_v46 = vpop.permute.xlu0 %1198 }
 0x1d6   : > { %5260 = vst [vmem:[#allocation29_spill] sm:$0xff] %v3811_v46 }
 0x1d9   : > { %v3813_v15 = vpop.permute.xlu1 %1278 }
 0x1da   : > { %5261 = vst [vmem:[#allocation30_spill] sm:$0xff] %v3813_v15  ;;  %v3818_v18 = vpop.permute.xlu0 %1223 }
 0x1db   : > { %5262 = vst [vmem:[#allocation31_spill] sm:$0xff] %v3818_v18 }
 0x1e7   : > { %v3821_v20 = vpop.permute.xlu0 %1302 }
 0x1e8   : > { %5263 = vst [vmem:[#allocation32_spill] sm:$0xff] %v3821_v20 }
 0x1ea   : > { %v3815_v52 = vpop.permute.xlu1 %1463 }
 0x1eb   : > { %v1466_v16 = vmul.f32 0.0, %v3815_v52 }
 0x1ec   : > { %v3823_v19 = vpop.permute.xlu0 %1326 }
 0x1ed   : > { %1472 = vrot.lane.b32.xlu1 %v1466_v16, %s3219_s22  ;;  %5264 = vst [vmem:[#allocation33_spill] sm:$0xff] %v3823_v19 }
 0x1f1   : > { %v3825_v21 = vpop.permute.xlu0 %1354 }
 0x1f2   : > { %5265 = vst [vmem:[#allocation34_spill] sm:$0xff] %v3825_v21 }
 0x1f6   : > { %v3827_v22 = vpop.permute.xlu0 %1378 }
 0x1f7   : > { %5266 = vst [vmem:[#allocation35_spill] sm:$0xff] %v3827_v22 }
 0x1fb   : > { %v3829_v17 = vpop.permute.xlu0 %1402 }
 0x1fc   : > { %5267 = vst [vmem:[#allocation36_spill] sm:$0xff] %v3829_v17 }
 0x20c   : > { %v3831_v23 = vpop.permute.xlu0 %1453 }
 0x20d   : > { %5268 = vst [vmem:[#allocation37_spill] sm:$0xff] %v3831_v23 }
 0x211   : > { %v3833_v25 = vpop.permute.xlu0 %1487 }
 0x212   : > { %v1490_v26 = vmul.f32 0.0, %v3833_v25 }
 0x214   : > { %1496 = vrot.lane.b32.xlu1 %v1490_v26, %s3222_s19 }
 0x218   : > { %1511 = vperm.xlu1 %2937, %v3582_v2  }
 0x21c   : > { %2938 = vset.pattern.permute.xlu1 %v3227_v59  ;;  %v3244_v59 = vmov 46  }
 0x21d   : > { %1535 = vperm.xlu1 %2938, %v3582_v2  }
 0x221   : > { %2939 = vset.pattern.permute.xlu1 %v3228_v27 }
 0x222   : > { %1559 = vperm.xlu1 %2939, %v3582_v2  }
 0x226   : > { %2940 = vset.pattern.permute.xlu1 %v3229_v28 }
 0x227   : > { %1583 = vperm.xlu1 %2940, %v3582_v2  }
 0x22b   : > { %2942 = vset.pattern.permute.xlu1 %v3230_v29  ;;  %v3245_v29 = vmov 40  }
 0x24b   : > { %746 = vadd.xlane.f32.xlu1 %v745_v32  ;;  %v3248_v32 = vmov 4  }
 0x25c   : > { %1616 = vrot.lane.b32.xlu1 %v1609_v39, %s3231_s15  ;;  %v3249_v39 = vmov 5  }
 0x25f   : > { %v3860_v0 = vpop.permute.xlu1 %1472 }
 0x260   : > { %1657 = vperm.xlu1 %2942, %v3582_v2   ;;  %5270 = vst [vmem:[#allocation39_spill] sm:$0xff] %v3860_v0 }
 0x264   : > { %2943 = vset.pattern.permute.xlu1 %v3233_v51 }
 0x265   : > { %1824 = vperm.xlu1 %2943, %v3582_v2  }
 0x269   : > { %2945 = vset.pattern.permute.xlu1 %v3234_v33 }
 0x26a   : > { %1848 = vperm.xlu1 %2945, %v3582_v2  }
 0x26e   : > { %2946 = vset.pattern.permute.xlu1 %v3235_v45 }
 0x26f   : > { %2018 = vperm.xlu1 %2946, %v3582_v2  }
 0x273   : > { %2948 = vset.pattern.permute.xlu1 %v3236_v13 }
 0x274   : > { %1872 = vperm.xlu1 %2948, %v3582_v2  }
 0x278   : > { %2949 = vset.pattern.permute.xlu1 %v3237_v49 }
 0x279   : > { %2042 = vperm.xlu1 %2949, %v3582_v2  }
 0x27d   : > { %2951 = vset.pattern.permute.xlu1 %v3238_v50  ;;  %v1613_v50 = vrot.slane %v3593_v6, %v3846_v36 }
 0x27e   : > { %1724 = vperm.xlu1 %2951, %v3582_v2  }
 0x282   : > { %2952 = vset.pattern.permute.xlu1 %v3239_v56 }
 0x283   : > { %1896 = vperm.xlu1 %2952, %v3582_v2  }
 0x286   : > { %v3864_v3 = vpop.permute.xlu1 %1496 }
 0x287   : > { %2954 = vset.pattern.permute.xlu1 %v3240_v60  ;;  %5271 = vst [vmem:[#allocation40_spill] sm:$0xff] %v3864_v3  ;;  %v2994_v3 = vld [vmem:[%s3509_s28 + $0x50] sm:$0xff] }
 0x288   : > { %2236 = vperm.xlu1 %2954, %v3582_v2  }
 0x28c   : > { %2955 = vset.pattern.permute.xlu1 %v3241_v62  ;;  %v3250_v62 = vmov 17  }
 0x28d   : > { %1748 = vperm.xlu1 %2955, %v3582_v2  }
 0x291   : > { %2957 = vset.pattern.permute.xlu1 %v3242_v1 }
 0x292   : > { %2090 = vperm.xlu1 %2957, %v3582_v2  }
 0x296   : > { %2958 = vset.pattern.permute.xlu1 %v3243_v4  ;;  %v3251_v4 = vmov 24  }
 0x297   : > { %v3866_v16 = vpop.permute.xlu1 %1511  ;;  %2260 = vperm.xlu1 %2958, %v3582_v2  }
 0x298   : > { %v1514_v26 = vmul.f32 0.0, %v3866_v16 }
 0x29a   : > { %1520 = vrot.lane.b32.xlu0 %v1514_v26, %s3220_s12 }
 0x29b   : > { %2960 = vset.pattern.permute.xlu1 %v3244_v59 }
 0x29c   : > { %v3871_v27 = vpop.permute.xlu1 %1535  ;;  %1944 = vperm.xlu1 %2960, %v3582_v2  }
 0x29d   : > { %v1540_v28 = vmul.f32 0.0, %v3871_v27 }
 0x29f   : > { %1548 = vrot.lane.b32.xlu0 %v1540_v28, %s3221_s14  ;;  %v3252_v28 = vmov 13  }
 0x2a0   : > { %2961 = vset.pattern.permute.xlu1 %v3245_v29 }
 0x2a1   : > { %2114 = vperm.xlu1 %2961, %v3582_v2   ;;  %v3883_v51 = vpop.permute.xlu1 %1559 }
 0x2a2   : > { %v1564_v33 = vmul.f32 0.0, %v3883_v51 }
 0x2a5   : > { %2963 = vset.pattern.permute.xlu1 %v3246_v30  ;;  %v3253_v30 = vmov 26  }
 0x2a6   : > { %2138 = vperm.xlu1 %2963, %v3582_v2   ;;  %v3886_v45 = vpop.permute.xlu1 %1583 }
 0x2a7   : > { %v1588_v13 = vmul.f32 0.0, %v3886_v45 }
 0x2aa   : > { %2964 = vset.pattern.permute.xlu1 %v3247_v31 }
 0x2ab   : > { %2308 = vperm.xlu1 %2964, %v3582_v2  }
 0x2af   : > { %2966 = vset.pattern.permute.xlu1 %v3248_v32 }
 0x2b0   : > { %1814 = vperm.xlu1 %2966, %v3582_v2  }
 0x2b4   : > { %2967 = vset.pattern.permute.xlu1 %v3249_v39  ;;  %v3254_v39 = vmov 39  }
 0x2b5   : > { %2008 = vperm.xlu1 %2967, %v3582_v2  }
 0x2be   : > { %728 = vadd.xlane.f32.xlu0 %v727_v41  ;;  %v3255_v41 = vmov 45  }
 0x2d4   : > { %1572 = vrot.lane.b32.xlu0 %v1564_v33, %s3223_s11  ;;  %v3256_v33 = vmov 34  }
 0x2d8   : > { %1596 = vrot.lane.b32.xlu0 %v1588_v13, %s3224_s16  ;;  %v747_v49 = vpop.xlane.xlu1 %746  ;;  %v3257_v13 = vmov 48  }
 0x2dc   : > { %1618 = vrot.lane.b32.xlu0 %v1613_v50, %s3231_s15  ;;  %v3894_v35 = vpop.permute.xlu1 %1616  ;;  %v3258_v50 = vmov 6   ;;  %s3264_s15 = smov 126  }
 0x2dd   : > { %5272 = vst [vmem:[#allocation41_spill] sm:$0xff] %v3894_v35 }
 0x2e0   : > { %1647 = vperm.xlu0 %2941, %v3582_v2   ;;  %v3897_v56 = vpop.permute.xlu1 %1657 }
 0x2e1   : > { %5273 = vst [vmem:[#allocation42_spill] sm:$0xff] %v3897_v56  ;;  %v1660_v60 = vmul.f32 0.0, %v3897_v56 }
 0x2e3   : > { %1666 = vrot.lane.b32.xlu1 %v1660_v60, %s3219_s22 }
 0x2e4   : > { %2944 = vset.pattern.permute.xlu0 %v3250_v62  ;;  %v3901_v1 = vpop.permute.xlu1 %1824 }
 0x2e5   : > { %5274 = vst [vmem:[#allocation43_spill] sm:$0xff] %v3901_v1  ;;  %1681 = vperm.xlu0 %2944, %v3582_v2   ;;  %v1827_v6 = vmul.f32 0.0, %v3901_v1 }
 0x2e7   : > { %1833 = vrot.lane.b32.xlu1 %v1827_v6, %s3219_s22  ;;  %v731_v6 = vstv %s730_s18  ;;  %s3265_s18 = smov 124  }
 0x2e9   : > { %2947 = vset.pattern.permute.xlu0 %v3251_v4  ;;  %v3906_v26 = vpop.permute.xlu1 %1848 }
 0x2ea   : > { %5275 = vst [vmem:[#allocation44_spill] sm:$0xff] %v3906_v26  ;;  %1705 = vperm.xlu0 %2947, %v3582_v2   ;;  %v1851_v59 = vmul.f32 0.0, %v3906_v26 }
 0x2ec   : > { %1857 = vrot.lane.b32.xlu1 %v1851_v59, %s3222_s19  ;;  %v749_v59 = vstv %s2754_s24  ;;  %s3266_s24 = smov 123  }
 0x2ee   : > { %2950 = vset.pattern.permute.xlu0 %v3252_v28  ;;  %v3911_v29 = vpop.permute.xlu1 %2018 }
 0x2ef   : > { %5276 = vst [vmem:[#allocation45_spill] sm:$0xff] %v3911_v29  ;;  %2212 = vperm.xlu0 %2950, %v3582_v2  }
 0x2f3   : > { %2953 = vset.pattern.permute.xlu0 %v3253_v30  ;;  %v3914_v31 = vpop.permute.xlu1 %1872  ;;  %v750_v30 = vadd.f32 %v749_v59, %v747_v49 }
 0x2f4   : > { %5277 = vst [vmem:[#allocation46_spill] sm:$0xff] %v3914_v31  ;;  %2066 = vperm.xlu0 %2953, %v3582_v2   ;;  %v1877_v32 = vmul.f32 0.0, %v3914_v31 }
 0x2f6   : > { %1885 = vrot.lane.b32.xlu1 %v1877_v32, %s3220_s12 }
 0x2f8   : > { %2956 = vset.pattern.permute.xlu0 %v3254_v39  ;;  %v719_v39 = vld [vmem:[#allocation8] sm:$0x3] }
 0x2f9   : > { %1920 = vperm.xlu0 %2956, %v3582_v2  }
 0x2fd   : > { %2959 = vset.pattern.permute.xlu0 %v3255_v41  ;;  %v3930_v41 = vpop.permute.xlu1 %2042 }
 0x2fe   : > { %1772 = vperm.xlu0 %2959, %v3582_v2   ;;  %5281 = vst [vmem:[#allocation50_spill] sm:$0xff] %v3930_v41 }
 0x301   : > { %v3936_v18 = vpop.permute.xlu1 %1724 }
 0x302   : > { %2962 = vset.pattern.permute.xlu0 %v3256_v33  ;;  %v737_v33 = vrot.slane %v719_v39, %v3596_v8  ;;  %5283 = vst [vmem:[#allocation52_spill] sm:$0xff] %v3936_v18 }
 0x303   : > { %2284 = vperm.xlu0 %2962, %v3582_v2  }
 0x307   : > { %2965 = vset.pattern.permute.xlu0 %v3257_v13 }
 0x308   : > { %2332 = vperm.xlu0 %2965, %v3582_v2  }
 0x30c   : > { %2968 = vset.pattern.permute.xlu0 %v3258_v50  ;;  %v3924_v60 = vpop.permute.xlu0 %1520  ;;  %v751_v50 = vmax.f32 %v750_v30, 0.0 }
 0x30d   : > { %2202 = vperm.xlu0 %2968, %v3582_v2   ;;  %5278 = vst [vmem:[#allocation47_spill] sm:$0xff] %v3924_v60 }
 0x311   : > { %2969 = vset.pattern.permute.xlu0 %v3257_v13  ;;  %v3926_v62 = vpop.permute.xlu0 %1548  ;;  %v755_v13 = vrot.slane %v719_v39, %v3609_v14 }
 0x312   : > { %5279 = vst [vmem:[#allocation48_spill] sm:$0xff] %v3926_v62 }
 0x313   : > { %v756_v9 = vmul.f32 %v755_v13, %v751_v50 }
 0x34b   : > { %v729_v4 = vpop.xlane.xlu0 %728 }
 0x34c   : > { %v732_v28 = vadd.f32 %v731_v6, %v729_v4  ;;  %v2755_v6 = vld [vmem:[#allocation10] ss:$0 sm:$0xff]  ;;  %v3940_v4 = vpop.permute.xlu1 %1896 }
 0x34d   : > { %5285 = vst [vmem:[#allocation54_spill] sm:$0xff] %v3940_v4  ;;  %v1901_v10 = vmul.f32 0.0, %v3940_v4 }
 0x34e   : > { %v733_v2 = vmax.f32 %v732_v28, 0.0 }
 0x34f   : > { %v3928_v32 = vpop.permute.xlu0 %1572 }
 0x350   : > { %5280 = vst [vmem:[#allocation49_spill] sm:$0xff] %v3928_v32  ;;  %v738_v53 = vmul.f32 %v737_v33, %v733_v2  ;;  %v3944_v28 = vpop.permute.xlu1 %2236 }
 0x351   : > { %5287 = vst [vmem:[#allocation56_spill] sm:$0xff] %v3944_v28 }
 0x352   : > { %v757_v46 = vadd.f32 %v756_v9, %v738_v53  ;;  %v2021_v53 = vmul.f32 0.0, %v3911_v29 }
 0x353   : > { %v3934_v43 = vpop.permute.xlu0 %1596 }
 0x354   : > { %5282 = vst [vmem:[#allocation51_spill] sm:$0xff] %v3934_v43  ;;  %v764_v59 = vadd.f32 %v2755_v6, %v757_v46  ;;  %v3950_v33 = vpop.permute.xlu1 %1748  ;;  %v2045_v46 = vmul.f32 0.0, %v3930_v41  ;;  %v1729_v6 = vmul.f32 0.0, %v3936_v18 }
 0x355   : > { %5289 = vst [vmem:[#allocation58_spill] sm:$0xff] %v3950_v33 }
 0x356   : > { %v2756_v11 = vmul.f32 -1.442695, %v764_v59  ;;  %v772_v15 = vrot.slane %v764_v59, 4 }
 0x357   : > { %v3938_v49 = vpop.permute.xlu0 %1618 }
 0x358   : > { %5284 = vst [vmem:[#allocation53_spill] sm:$0xff] %v3938_v49  ;;  %2970 = vpow2.f32 %v2756_v11  ;;  %v3959_v13 = vpop.permute.xlu1 %2090 }
 0x359   : > { %5292 = vst [vmem:[#allocation61_spill] sm:$0xff] %v3959_v13  ;;  %v2095_v7 = vmul.f32 0.0, %v3959_v13 }
 0x35c   : > { %v3970_v35 = vpop.permute.xlu1 %2260 }
 0x35d   : > { %5294 = vst [vmem:[#allocation63_spill] sm:$0xff] %v3970_v35 }
 0x35f   : > { %v3942_v12 = vpop.permute.xlu0 %1647 }
 0x360   : > { %5286 = vst [vmem:[#allocation55_spill] sm:$0xff] %v3942_v12 }
 0x362   : > { %v2971_v50 = vpop.eup %2970 }
 0x364   : > { %v3946_v39 = vpop.permute.xlu0 %1681 }
 0x365   : > { %5288 = vst [vmem:[#allocation57_spill] sm:$0xff] %v3946_v39  ;;  %v1684_v30 = vmul.f32 0.0, %v3946_v39 }
 0x367   : > { %1690 = vrot.lane.b32.xlu0 %v1684_v30, %s3222_s19  ;;  %v768_v30 = vadd.f32 1.0, %v2971_v50  ;;  %v1753_v50 = vmul.f32 0.0, %v3950_v33  ;;  %v3009_v33 = vld [vmem:[%s3509_s28 + $0xb8] sm:$0xff] }
 0x369   : > { %v3953_v9 = vpop.permute.xlu0 %1705  ;;  %2972 = vrcp.f32 %v768_v30 }
 0x36a   : > { %5290 = vst [vmem:[#allocation59_spill] sm:$0xff] %v3953_v9 }
 0x36b   : > { %2027 = vrot.lane.b32.xlu0 %v2021_v53, %s3219_s22 }
 0x36e   : > { %v3957_v2 = vpop.permute.xlu0 %2212 }
 0x36f   : > { %5291 = vst [vmem:[#allocation60_spill] sm:$0xff] %v3957_v2  ;;  %v2215_v11 = vmul.f32 0.0, %v3957_v2  ;;  %2051 = vrot.lane.b32.xlu0 %v2045_v46, %s3222_s19  ;;  %v2239_v46 = vmul.f32 0.0, %v3944_v28  ;;  %v3016_v2 = vld [vmem:[%s3509_s28 + $0xf0] sm:$0xff] }
 0x371   : > { %2221 = vrot.lane.b32.xlu1 %v2215_v11, %s3219_s22 }
 0x373   : > { %1737 = vrot.lane.b32.xlu0 %v1729_v6, %s3221_s14  ;;  %v3967_v53 = vpop.permute.xlu0 %2066  ;;  %v3980_v6 = vpop.permute.xlu1 %1944 }
 0x374   : > { %5293 = vst [vmem:[#allocation62_spill] sm:$0xff] %v3967_v53  ;;  %v2071_v37 = vmul.f32 0.0, %v3967_v53  ;;  %5296 = vst [vmem:[#allocation65_spill] sm:$0xff] %v3980_v6  ;;  %v2973_v20 = vpop.eup %2972  ;;  %v1949_v49 = vmul.f32 0.0, %v3980_v6 }
 0x375   : > { %1909 = vrot.lane.b32.xlu1 %v1901_v10, %s3221_s14  ;;  %v2265_v10 = vmul.f32 0.0, %v3970_v35 }
 0x377   : > { %2079 = vrot.lane.b32.xlu0 %v2071_v37, %s3220_s12 }
 0x378   : > { %v3975_v19 = vpop.permute.xlu0 %1920 }
 0x379   : > { %5295 = vst [vmem:[#allocation64_spill] sm:$0xff] %v3975_v19  ;;  %2245 = vrot.lane.b32.xlu1 %v2239_v46, %s3222_s19  ;;  %v1925_v11 = vmul.f32 0.0, %v3975_v19  ;;  %v3990_v46 = vpop.permute.xlu1 %2114 }
 0x37a   : > { %5298 = vst [vmem:[#allocation67_spill] sm:$0xff] %v3990_v46  ;;  %v2119_v58 = vmul.f32 0.0, %v3990_v46  ;;  %v3001_v46 = vld [vmem:[%s3509_s28 + $0x78] sm:$0xff] }
 0x37b   : > { %1761 = vrot.lane.b32.xlu0 %v1753_v50, %s3223_s11  ;;  %v774_v50 = vadd.f32 %v2973_v20, %v772_v15  ;;  %v834_v20 = vsub.s32 3, %v3587_v5  ;;  %v3000_v5 = vld [vmem:[%s3509_s28 + $0x70] sm:$0xff] }
 0x37d   : > { %1933 = vrot.lane.b32.xlu1 %v1925_v11, %s3223_s11  ;;  %v3986_v30 = vpop.permute.xlu0 %1772  ;;  %v797_v59 = vrot.slane %v774_v50, %v3609_v14  ;;  %v816_v15 = vrot.slane %v774_v50, %v3846_v36 }
 0x37e   : > { %5297 = vst [vmem:[#allocation66_spill] sm:$0xff] %v3986_v30  ;;  %v1777_v37 = vmul.f32 0.0, %v3986_v30  ;;  %v3002_v30 = vld [vmem:[%s3509_s28 + $0x80] sm:$0xff] }
 0x37f   : > { %2103 = vrot.lane.b32.xlu0 %v2095_v7, %s3221_s14  ;;  %v778_v7 = vrot.slane %v774_v50, %v3596_v8 }
 0x381   : > { %2273 = vrot.lane.b32.xlu1 %v2265_v10, %s3220_s12 }
 0x383   : > { %1785 = vrot.lane.b32.xlu0 %v1777_v37, %s3224_s16  ;;  %v4008_v37 = vpop.permute.xlu0 %2284 }
 0x384   : > { %5302 = vst [vmem:[#allocation71_spill] sm:$0xff] %v4008_v37 }
 0x385   : > { %1957 = vrot.lane.b32.xlu1 %v1949_v49, %s3224_s16  ;;  %v4002_v49 = vpop.permute.xlu1 %2138 }
 0x386   : > { %5299 = vst [vmem:[#allocation68_spill] sm:$0xff] %v4002_v49 }
 0x387   : > { %2127 = vrot.lane.b32.xlu0 %v2119_v58, %s3223_s11  ;;  %v835_v58 = vrot.slane %v774_v50, %v834_v20 }
 0x389   : > { %784 = vbcast.lane.b32.xlu1 %v778_v7, 264  ;;  %v4004_v11 = vpop.permute.xlu1 %2308 }
 0x38a   : > { %5300 = vst [vmem:[#allocation69_spill] sm:$0xff] %v4004_v11 }
 0x38b   : > { %780 = vbcast.lane.b32.xlu0 %v778_v7, 256 }
 0x38d   : > { %788 = vbcast.lane.b32.xlu1 %v778_v7, 272  ;;  %v4006_v10 = vpop.permute.xlu1 %1814 }
 0x38e   : > { %5301 = vst [vmem:[#allocation70_spill] sm:$0xff] %v4006_v10 }
 0x38f   : > { %799 = vbcast.lane.b32.xlu0 %v797_v59, 256 }
 0x391   : > { %792 = vbcast.lane.b32.xlu1 %v778_v7, 280  ;;  %v4010_v7 = vpop.permute.xlu1 %2008 }
 0x392   : > { %5303 = vst [vmem:[#allocation72_spill] sm:$0xff] %v4010_v7 }
 0x393   : > { %807 = vbcast.lane.b32.xlu0 %v797_v59, 272 }
 0x395   : > { %803 = vbcast.lane.b32.xlu1 %v797_v59, 264  ;;  %v4014_v36 = vpop.permute.xlu1 %1666 }
 0x396   : > { %5305 = vst [vmem:[#allocation74_spill] sm:$0xff] %v4014_v36 }
 0x397   : > { %818 = vbcast.lane.b32.xlu0 %v816_v15, 256 }
 0x399   : > { %811 = vbcast.lane.b32.xlu1 %v797_v59, 280  ;;  %v4012_v59 = vpop.permute.xlu0 %2332 }
 0x39a   : > { %5304 = vst [vmem:[#allocation73_spill] sm:$0xff] %v4012_v59 }
 0x39b   : > { %826 = vbcast.lane.b32.xlu0 %v816_v15, 272 }
 0x39d   : > { %822 = vbcast.lane.b32.xlu1 %v816_v15, 264  ;;  %v4016_v50 = vpop.permute.xlu0 %2202 }
 0x39e   : > { %5306 = vst [vmem:[#allocation75_spill] sm:$0xff] %v4016_v50 }
 0x39f   : > { %837 = vbcast.lane.b32.xlu0 %v835_v58, 256 }
 0x3a1   : > { %830 = vbcast.lane.b32.xlu1 %v816_v15, 280  ;;  %v4018_v15 = vpop.permute.xlu1 %1833 }
 0x3a2   : > { %5307 = vst [vmem:[#allocation76_spill] sm:$0xff] %v4018_v15 }
 0x3a3   : > { %845 = vbcast.lane.b32.xlu0 %v835_v58, 272 }
 0x3a5   : > { %841 = vbcast.lane.b32.xlu1 %v835_v58, 264 }
 0x3a9   : > { %849 = vbcast.lane.b32.xlu1 %v835_v58, 280  ;;  %v4022_v58 = vpop.permute.xlu1 %1857 }
 0x3aa   : > { %5309 = vst [vmem:[#allocation78_spill] sm:$0xff] %v4022_v58 }
 0x3ad   : > { %v4026_v14 = vpop.permute.xlu1 %1885 }
 0x3ae   : > { %5311 = vst [vmem:[#allocation80_spill] sm:$0xff] %v4026_v14 }
 0x3d9   : > { %v4020_v20 = vpop.permute.xlu0 %1690 }
 0x3da   : > { %5308 = vst [vmem:[#allocation77_spill] sm:$0xff] %v4020_v20 }
 0x3dd   : > { %v4024_v8 = vpop.permute.xlu0 %2027 }
 0x3de   : > { %5310 = vst [vmem:[#allocation79_spill] sm:$0xff] %v4024_v8 }
 0x3e1   : > { %v4028_v17 = vpop.permute.xlu0 %2051 }
 0x3e2   : > { %5312 = vst [vmem:[#allocation81_spill] sm:$0xff] %v4028_v17 }
 0x3e3   : > { %v4030_v22 = vpop.permute.xlu1 %2221 }
 0x3e4   : > { %5313 = vst [vmem:[#allocation82_spill] sm:$0xff] %v4030_v22 }
 0x3e5   : > { %v4032_v21 = vpop.permute.xlu0 %1737 }
 0x3e6   : > { %5314 = vst [vmem:[#allocation83_spill] sm:$0xff] %v4032_v21 }
 0x3e7   : > { %v4034_v54 = vpop.permute.xlu1 %1909 }
 0x3e8   : > { %5315 = vst [vmem:[#allocation84_spill] sm:$0xff] %v4034_v54 }
 0x3e9   : > { %v4036_v36 = vpop.permute.xlu0 %2079 }
 0x3ea   : > { %5316 = vst [vmem:[#allocation85_spill] sm:$0xff] %v4036_v36 }
 0x3eb   : > { %v4038_v20 = vpop.permute.xlu1 %2245 }
 0x3ec   : > { %5317 = vst [vmem:[#allocation86_spill] sm:$0xff] %v4038_v20  ;;  %v2986_v20 = vld [vmem:[%s3509_s28 + $0x10] sm:$0xff] }
 0x3ed   : > { %v4040_v12 = vpop.permute.xlu0 %1761 }
 0x3ee   : > { %5318 = vst [vmem:[#allocation87_spill] sm:$0xff] %v4040_v12  ;;  %v2987_v12 = vld [vmem:[%s3509_s28 + $0x18] sm:$0xff] }
 0x3ef   : > { %v4042_v50 = vpop.permute.xlu1 %1933 }
 0x3f0   : > { %5319 = vst [vmem:[#allocation88_spill] sm:$0xff] %v4042_v50  ;;  %v2988_v50 = vld [vmem:[%s3509_s28] sm:$0xff] }
 0x3f1   : > { %v4044_v14 = vpop.permute.xlu0 %2103 }
 0x3f2   : > { %5320 = vst [vmem:[#allocation89_spill] sm:$0xff] %v4044_v14 }
 0x3f3   : > { %v4046_v17 = vpop.permute.xlu1 %2273 }
 0x3f4   : > { %5321 = vst [vmem:[#allocation90_spill] sm:$0xff] %v4046_v17  ;;  %v2989_v17 = vld [vmem:[%s3509_s28 + $0x8] sm:$0xff] }
 0x3f5   : > { %v4048_v22 = vpop.permute.xlu0 %1785 }
 0x3f6   : > { %5322 = vst [vmem:[#allocation91_spill] sm:$0xff] %v4048_v22 }
 0x3f7   : > { %v4050_v8 = vpop.permute.xlu1 %1957 }
 0x3f8   : > { %5323 = vst [vmem:[#allocation92_spill] sm:$0xff] %v4050_v8 }
 0x3f9   : > { %v4052_v21 = vpop.permute.xlu0 %2127 }
 0x3fa   : > { %5324 = vst [vmem:[#allocation93_spill] sm:$0xff] %v4052_v21 }
 0x3fb   : > { %v785_v54 = vpop.permute.xlu1 %784 }
 0x3fc   : > { %v4055_v7 = vmul.f32 %v2986_v20, %v785_v54  ;;  %v4058_v58 = vmul.f32 %v2987_v12, %v785_v54  ;;  %v2990_v12 = vld [vmem:[%s3509_s28 + $0x20] sm:$0xff] }
 0x3fd   : > { %v781_v36 = vpop.permute.xlu0 %780 }
 0x3fe   : > { %5325 = vst [vmem:[#allocation94_spill] sm:$0xff] %v4055_v7  ;;  %5326 = vst [vmem:[#allocation95_spill] sm:$0xff] %v4058_v58  ;;  %v4061_v14 = vmul.f32 %v2988_v50, %v781_v36  ;;  %v4064_v15 = vmul.f32 %v2989_v17, %v781_v36  ;;  %v2991_v17 = vld [vmem:[%s3509_s28 + $0x28] sm:$0xff] }
 0x3ff   : > { %v789_v8 = vpop.permute.xlu1 %788 }
 0x400   : > { %5327 = vst [vmem:[#allocation96_spill] sm:$0xff] %v4061_v14  ;;  %5328 = vst [vmem:[#allocation97_spill] sm:$0xff] %v4064_v15  ;;  %v883_v21 = vadd.f32 %v4055_v7, %v4061_v14  ;;  %v892_v22 = vadd.f32 %v4058_v58, %v4064_v15  ;;  %v964_v20 = vmax.f32 %v4061_v14, %v4055_v7  ;;  %v2992_v14 = vld [vmem:[%s3509_s28 + $0x30] sm:$0xff] }
 0x401   : > { %v973_v54 = vmax.f32 %v4064_v15, %v4058_v58  ;;  %v4075_v50 = vmul.f32 %v2990_v12, %v789_v8  ;;  %v4078_v36 = vmul.f32 %v2991_v17, %v789_v8  ;;  %v800_v10 = vpop.permute.xlu0 %799  ;;  %v2993_v12 = vld [vmem:[%s3509_s28 + $0x38] sm:$0xff] }
 0x403   : > { %5329 = vst [vmem:[#allocation98_spill] sm:$0xff] %v4075_v50  ;;  %5330 = vst [vmem:[#allocation99_spill] sm:$0xff] %v4078_v36  ;;  %v884_v43 = vadd.f32 %v883_v21, %v4075_v50  ;;  %v893_v32 = vadd.f32 %v892_v22, %v4078_v36  ;;  %v793_v62 = vpop.permute.xlu1 %792  ;;  %v965_v59 = vmax.f32 %v964_v20, %v4075_v50 }
 0x404   : > { %v974_v7 = vmax.f32 %v973_v54, %v4078_v36  ;;  %v4085_v58 = vmul.f32 %v2992_v14, %v793_v62  ;;  %v4088_v15 = vmul.f32 %v2993_v12, %v793_v62  ;;  %v2995_v62 = vld [vmem:[%s3509_s28 + $0x58] sm:$0xff] }
 0x405   : > { %v808_v17 = vpop.permute.xlu0 %807 }
 0x406   : > { %5331 = vst [vmem:[#allocation100_spill] sm:$0xff] %v4085_v58  ;;  %5332 = vst [vmem:[#allocation101_spill] sm:$0xff] %v4088_v15  ;;  %v885_v8 = vadd.f32 %v884_v43, %v4085_v58  ;;  %v894_v21 = vadd.f32 %v893_v32, %v4088_v15  ;;  %v966_v22 = vmax.f32 %v965_v59, %v4085_v58  ;;  %v2996_v59 = vld [vmem:[%s3509_s28 + $0x40] sm:$0xff] }
 0x407   : > { %v975_v20 = vmax.f32 %v974_v7, %v4088_v15  ;;  %v804_v50 = vpop.permute.xlu1 %803  ;;  %v4101_v58 = vmul.f32 %v2996_v59, %v800_v10  ;;  %v2997_v7 = vld [vmem:[%s3509_s28 + $0x48] sm:$0xff] }
 0x408   : > { %v886_v54 = vrot.slane %v885_v8, 4  ;;  %v895_v36 = vrot.slane %v894_v21, 4  ;;  %v967_v60 = vrot.slane %v966_v22, 4  ;;  %v4095_v11 = vmul.f32 %v2994_v3, %v804_v50  ;;  %v2999_v59 = vld [vmem:[%s3509_s28 + $0x68] sm:$0xff] }
 0x409   : > { %v976_v14 = vrot.slane %v975_v20, 4  ;;  %v4098_v43 = vmul.f32 %v2995_v62, %v804_v50  ;;  %5335 = vst [vmem:[#allocation104_spill] sm:$0xff] %v4101_v58  ;;  %v4104_v15 = vmul.f32 %v2997_v7, %v800_v10  ;;  %v4114_v10 = vmul.f32 %v2999_v59, %v808_v17 }
 0x40a   : > { %5333 = vst [vmem:[#allocation102_spill] sm:$0xff] %v4095_v11  ;;  %v887_v12 = vadd.f32 %v886_v54, %v885_v8  ;;  %v896_v32 = vadd.f32 %v895_v36, %v894_v21  ;;  %v968_v0 = vmax.f32 %v966_v22, %v967_v60  ;;  %v901_v3 = vadd.f32 %v4095_v11, %v4101_v58  ;;  %v819_v8 = vpop.permute.xlu0 %818  ;;  %v2998_v21 = vld [vmem:[%s3509_s28 + $0x60] sm:$0xff] }
 0x40b   : > { %5334 = vst [vmem:[#allocation103_spill] sm:$0xff] %v4098_v43  ;;  %5336 = vst [vmem:[#allocation105_spill] sm:$0xff] %v4104_v15  ;;  %v977_v23 = vmax.f32 %v975_v20, %v976_v14  ;;  %v812_v49 = vpop.permute.xlu1 %811  ;;  %v910_v50 = vadd.f32 %v4098_v43, %v4104_v15  ;;  %v4111_v62 = vmul.f32 %v2998_v21, %v808_v17 }
 0x40c   : > { %v888_v54 = vrot.slane %v887_v12, 2  ;;  %v897_v36 = vrot.slane %v896_v32, 2  ;;  %5338 = vst [vmem:[#allocation107_spill] sm:$0xff] %v4114_v10  ;;  %v982_v60 = vmax.f32 %v4101_v58, %v4095_v11  ;;  %v991_v22 = vmax.f32 %v4104_v15, %v4098_v43 }
 0x40d   : > { %5337 = vst [vmem:[#allocation106_spill] sm:$0xff] %v4111_v62  ;;  %v969_v20 = vrot.slane %v968_v0, 2  ;;  %v978_v14 = vrot.slane %v977_v23, 2  ;;  %v902_v7 = vadd.f32 %v901_v3, %v4111_v62  ;;  %v911_v37 = vadd.f32 %v910_v50, %v4114_v10  ;;  %v3003_v50 = vld [vmem:[%s3509_s28 + $0x88] sm:$0xff] }
 0x40e   : > { %v4123_v21 = vmul.f32 %v3000_v5, %v812_v49  ;;  %v4126_v17 = vmul.f32 %v3001_v46, %v812_v49  ;;  %v889_v59 = vadd.f32 %v888_v54, %v887_v12  ;;  %v898_v11 = vadd.f32 %v897_v36, %v896_v32  ;;  %v827_v6 = vpop.permute.xlu0 %826 }
 0x40f   : > { %v823_v58 = vpop.permute.xlu1 %822  ;;  %v983_v43 = vmax.f32 %v982_v60, %v4111_v62  ;;  %v992_v15 = vmax.f32 %v991_v22, %v4114_v10  ;;  %v4131_v3 = vmul.f32 %v3002_v30, %v819_v8  ;;  %v4134_v5 = vmul.f32 %v3003_v50, %v819_v8  ;;  %v3004_v60 = vld [vmem:[%s3509_s28 + $0x90] sm:$0xff]  ;;  %v3005_v22 = vld [vmem:[%s3509_s28 + $0x98] sm:$0xff]  ;;  %v3006_v8 = vld [vmem:[%s3509_s28 + $0xa0] sm:$0xff] }
 0x410   : > { %5339 = vst [vmem:[#allocation108_spill] sm:$0xff] %v4123_v21  ;;  %5340 = vst [vmem:[#allocation109_spill] sm:$0xff] %v4126_v17  ;;  %v970_v46 = vmax.f32 %v968_v0, %v969_v20  ;;  %v979_v49 = vmax.f32 %v977_v23, %v978_v14  ;;  %v903_v12 = vadd.f32 %v902_v7, %v4123_v21  ;;  %v890_v54 = vrot.slane %v889_v59, 1  ;;  %v3007_v23 = vld [vmem:[%s3509_s28 + $0xa8] sm:$0xff] }
 0x411   : > { %5341 = vst [vmem:[#allocation110_spill] sm:$0xff] %v4131_v3  ;;  %5342 = vst [vmem:[#allocation111_spill] sm:$0xff] %v4134_v5  ;;  %v912_v32 = vadd.f32 %v911_v37, %v4126_v17  ;;  %v899_v36 = vrot.slane %v898_v11, 1  ;;  %v4139_v62 = vmul.f32 %v3004_v60, %v823_v58  ;;  %v4142_v10 = vmul.f32 %v3005_v22, %v823_v58 }
 0x412   : > { %v984_v30 = vmax.f32 %v983_v43, %v4123_v21  ;;  %v993_v35 = vmax.f32 %v992_v15, %v4126_v17  ;;  %v4147_v50 = vmul.f32 %v3006_v8, %v827_v6  ;;  %v4150_v0 = vmul.f32 %v3007_v23, %v827_v6  ;;  %v838_v22 = vpop.permute.xlu0 %837 }
 0x413   : > { %5343 = vst [vmem:[#allocation112_spill] sm:$0xff] %v4139_v62  ;;  %5344 = vst [vmem:[#allocation113_spill] sm:$0xff] %v4142_v10  ;;  %v919_v37 = vadd.f32 %v4139_v62, %v4131_v3  ;;  %v928_v20 = vadd.f32 %v4142_v10, %v4134_v5  ;;  %v1000_v58 = vmax.f32 %v4131_v3, %v4139_v62  ;;  %v831_v15 = vpop.permute.xlu1 %830  ;;  %v971_v14 = vrot.slane %v970_v46, 1 }
 0x414   : > { %5345 = vst [vmem:[#allocation114_spill] sm:$0xff] %v4147_v50  ;;  %5346 = vst [vmem:[#allocation115_spill] sm:$0xff] %v4150_v0  ;;  %v1009_v43 = vmax.f32 %v4134_v5, %v4142_v10  ;;  %v980_v7 = vrot.slane %v979_v49, 1  ;;  %v904_v60 = vrot.slane %v903_v12, 4  ;;  %v913_v6 = vrot.slane %v912_v32, 4  ;;  %v3008_v10 = vld [vmem:[%s3509_s28 + $0xb0] sm:$0xff] }
 0x415   : > { %v920_v8 = vadd.f32 %v919_v37, %v4147_v50  ;;  %v929_v23 = vadd.f32 %v928_v20, %v4150_v0  ;;  %v1001_v17 = vmax.f32 %v1000_v58, %v4147_v50  ;;  %v985_v62 = vrot.slane %v984_v30, 4 }
 0x416   : > { %v1010_v21 = vmax.f32 %v1009_v43, %v4150_v0  ;;  %v994_v3 = vrot.slane %v993_v35, 4  ;;  %v891_v13 = vadd.f32 %v890_v54, %v889_v59  ;;  %v900_v19 = vadd.f32 %v899_v36, %v898_v11  ;;  %v3010_v36 = vld [vmem:[%s3509_s28 + $0xc0] sm:$0xff] }
 0x417   : > { %v4165_v5 = vmul.f32 %v3008_v10, %v831_v15  ;;  %v4168_v28 = vmul.f32 %v3009_v33, %v831_v15  ;;  %v4170_v53 = vmax.f32 %v970_v46, %v971_v14  ;;  %v4172_v37 = vmax.f32 %v979_v49, %v980_v7  ;;  %v842_v59 = vpop.permute.xlu1 %841  ;;  %v3011_v49 = vld [vmem:[%s3509_s28 + $0xc8] sm:$0xff] }
 0x418   : > { %v905_v20 = vadd.f32 %v904_v60, %v903_v12  ;;  %v914_v58 = vadd.f32 %v913_v6, %v912_v32  ;;  %v986_v54 = vmax.f32 %v984_v30, %v985_v62  ;;  %v995_v33 = vmax.f32 %v993_v35, %v994_v3  ;;  %v846_v32 = vpop.permute.xlu0 %845  ;;  %v3013_v62 = vld [vmem:[%s3509_s28 + $0xd8] sm:$0xff] }
 0x419   : > { %5347 = vst [vmem:[#allocation116_spill] sm:$0xff] %v4165_v5  ;;  %5348 = vst [vmem:[#allocation117_spill] sm:$0xff] %v4168_v28  ;;  %v921_v43 = vadd.f32 %v920_v8, %v4165_v5  ;;  %v930_v0 = vadd.f32 %v929_v23, %v4168_v28  ;;  %v1002_v11 = vmax.f32 %v1001_v17, %v4165_v5  ;;  %v3014_v23 = vld [vmem:[%s3509_s28 + $0xe0] sm:$0xff] }
 0x41a   : > { %v1011_v10 = vmax.f32 %v1010_v21, %v4168_v28  ;;  %v4179_v46 = vmul.f32 %v3010_v36, %v838_v22  ;;  %v4182_v12 = vmul.f32 %v3011_v49, %v838_v22  ;;  %v906_v60 = vrot.slane %v905_v20, 2  ;;  %v3012_v21 = vld [vmem:[%s3509_s28 + $0xd0] sm:$0xff]  ;;  %v3015_v22 = vld [vmem:[%s3509_s28 + $0xe8] sm:$0xff] }
 0x41b   : > { %v922_v15 = vrot.slane %v921_v43, 4  ;;  %v931_v14 = vrot.slane %v930_v0, 4  ;;  %v1003_v7 = vrot.slane %v1002_v11, 4  ;;  %v915_v6 = vrot.slane %v914_v58, 2 }
 0x41c   : > { %5349 = vst [vmem:[#allocation118_spill] sm:$0xff] %v4179_v46  ;;  %5350 = vst [vmem:[#allocation119_spill] sm:$0xff] %v4182_v12  ;;  %v1012_v17 = vrot.slane %v1011_v10, 4  ;;  %v4185_v8 = vmul.f32 %v3012_v21, %v842_v59  ;;  %v4188_v35 = vmul.f32 %v3013_v62, %v842_v59  ;;  %v4191_v36 = vmul.f32 %v3014_v23, %v846_v32 }
 0x41d   : > { %v923_v3 = vadd.f32 %v922_v15, %v921_v43  ;;  %v932_v30 = vadd.f32 %v931_v14, %v930_v0  ;;  %v4194_v49 = vmul.f32 %v3015_v22, %v846_v32  ;;  %v1004_v15 = vmax.f32 %v1002_v11, %v1003_v7  ;;  %v850_v32 = vpop.permute.xlu1 %849 }
 0x41e   : > { %5351 = vst [vmem:[#allocation120_spill] sm:$0xff] %v4185_v8  ;;  %5352 = vst [vmem:[#allocation121_spill] sm:$0xff] %v4188_v35  ;;  %v937_v28 = vadd.f32 %v4185_v8, %v4179_v46  ;;  %v946_v5 = vadd.f32 %v4188_v35, %v4182_v12  ;;  %v1018_v21 = vmax.f32 %v4179_v46, %v4185_v8  ;;  %v987_v46 = vrot.slane %v986_v54, 2 }
 0x41f   : > { %5353 = vst [vmem:[#allocation122_spill] sm:$0xff] %v4191_v36  ;;  %5354 = vst [vmem:[#allocation123_spill] sm:$0xff] %v4194_v49  ;;  %v1027_v59 = vmax.f32 %v4182_v12, %v4188_v35  ;;  %v924_v0 = vrot.slane %v923_v3, 2  ;;  %v933_v43 = vrot.slane %v932_v30, 2  ;;  %v1013_v14 = vmax.f32 %v1011_v10, %v1012_v17  ;;  %v3017_v10 = vld [vmem:[%s3509_s28 + $0xf8] sm:$0xff]  ;;  %s3267_s28 = smov 122  }
 0x420   : > { %v938_v62 = vadd.f32 %v937_v28, %v4191_v36  ;;  %v947_v23 = vadd.f32 %v946_v5, %v4194_v49  ;;  %v1019_v22 = vmax.f32 %v1018_v21, %v4191_v36  ;;  %v907_v4 = vadd.f32 %v906_v60, %v905_v20 }
 0x421   : > { %v1028_v50 = vmax.f32 %v1027_v59, %v4194_v49  ;;  %v916_v8 = vadd.f32 %v915_v6, %v914_v58  ;;  %v996_v18 = vrot.slane %v995_v33, 2  ;;  %v4208_v35 = vmul.f32 0.03125, %v891_v13 }
 0x422   : > { %v4210_v12 = vmul.f32 0.03125, %v900_v19  ;;  %v4213_v11 = vmul.f32 %v3016_v2, %v850_v32  ;;  %v4216_v7 = vmul.f32 %v3017_v10, %v850_v32  ;;  %v925_v28 = vadd.f32 %v924_v0, %v923_v3 }
 0x423   : > { %v934_v5 = vadd.f32 %v933_v43, %v932_v30  ;;  %v1005_v17 = vrot.slane %v1004_v15, 2  ;;  %v1014_v21 = vrot.slane %v1013_v14, 2  ;;  %v908_v19 = vrot.slane %v907_v4, 1 }
 0x424   : > { %5355 = vst [vmem:[#allocation124_spill] sm:$0xff] %v4213_v11  ;;  %5356 = vst [vmem:[#allocation125_spill] sm:$0xff] %v4216_v7  ;;  %v939_v59 = vadd.f32 %v938_v62, %v4213_v11  ;;  %v948_v20 = vadd.f32 %v947_v23, %v4216_v7  ;;  %v1020_v58 = vmax.f32 %v1019_v22, %v4213_v11  ;;  %v917_v60 = vrot.slane %v916_v8, 1 }
 0x425   : > { %v1029_v13 = vmax.f32 %v1028_v50, %v4216_v7  ;;  %v988_v6 = vmax.f32 %v986_v54, %v987_v46  ;;  %v997_v2 = vmax.f32 %v995_v33, %v996_v18  ;;  %v926_v3 = vrot.slane %v925_v28, 1 }
 0x426   : > { %v940_v49 = vrot.slane %v939_v59, 4  ;;  %v949_v36 = vrot.slane %v948_v20, 4  ;;  %v1021_v32 = vrot.slane %v1020_v58, 4  ;;  %v935_v30 = vrot.slane %v934_v5, 1 }
 0x427   : > { %v1030_v10 = vrot.slane %v1029_v13, 4  ;;  %v1006_v0 = vmax.f32 %v1004_v15, %v1005_v17  ;;  %v1015_v43 = vmax.f32 %v1013_v14, %v1014_v21  ;;  %v909_v9 = vadd.f32 %v908_v19, %v907_v4 }
 0x428   : > { %v941_v41 = vadd.f32 %v940_v49, %v939_v59  ;;  %v950_v62 = vadd.f32 %v949_v36, %v948_v20  ;;  %v1022_v31 = vmax.f32 %v1020_v58, %v1021_v32  ;;  %v918_v22 = vadd.f32 %v917_v60, %v916_v8 }
 0x429   : > { %v1031_v23 = vmax.f32 %v1029_v13, %v1030_v10  ;;  %v989_v11 = vrot.slane %v988_v6, 1  ;;  %v998_v50 = vrot.slane %v997_v2, 1  ;;  %v927_v33 = vadd.f32 %v926_v3, %v925_v28 }
 0x42a   : > { %v942_v7 = vrot.slane %v941_v41, 2  ;;  %v951_v29 = vrot.slane %v950_v62, 2  ;;  %v1023_v54 = vrot.slane %v1022_v31, 2  ;;  %v936_v46 = vadd.f32 %v935_v30, %v934_v5 }
 0x42b   : > { %v1032_v18 = vrot.slane %v1031_v23, 2  ;;  %v1007_v26 = vrot.slane %v1006_v0, 1  ;;  %v1016_v39 = vrot.slane %v1015_v43, 1  ;;  %v958_v49 = vmul.f32 0.03125, %v909_v9 }
 0x42c   : > { %v943_v1 = vadd.f32 %v942_v7, %v941_v41  ;;  %v952_v56 = vadd.f32 %v951_v29, %v950_v62  ;;  %v1024_v15 = vmax.f32 %v1022_v31, %v1023_v54  ;;  %v959_v36 = vmul.f32 0.03125, %v918_v22 }
 0x42d   : > { %v1033_v14 = vmax.f32 %v1031_v23, %v1032_v18  ;;  %v990_v17 = vmax.f32 %v988_v6, %v989_v11  ;;  %v999_v21 = vmax.f32 %v997_v2, %v998_v50  ;;  %v960_v58 = vmul.f32 0.03125, %v927_v33 }
 0x42e   : > { %v944_v4 = vrot.slane %v943_v1, 1  ;;  %v953_v8 = vrot.slane %v952_v56, 1  ;;  %v1025_v59 = vrot.slane %v1024_v15, 1  ;;  %v961_v13 = vmul.f32 0.03125, %v936_v46 }
 0x42f   : > { %v1034_v20 = vrot.slane %v1033_v14, 1  ;;  %v1008_v19 = vmax.f32 %v1006_v0, %v1007_v26  ;;  %v1017_v60 = vmax.f32 %v1015_v43, %v1016_v39  ;;  %v1060_v29 = vsel %vm709_vm4, %v990_v17, %v4170_v53 }
 0x430   : > { %v945_v28 = vadd.f32 %v944_v4, %v943_v1  ;;  %v954_v5 = vadd.f32 %v953_v8, %v952_v56  ;;  %v1026_v32 = vmax.f32 %v1024_v15, %v1025_v59  ;;  %v1063_v31 = vsel %vm709_vm4, %v999_v21, %v4172_v37  ;;  %v5358_v59 = vld [vmem:[#allocation42_spill] sm:$0xff] }
 0x431   : > { %v1035_v10 = vmax.f32 %v1033_v14, %v1034_v20  ;;  %v1044_v41 = vsel %vm610_vm3, %v958_v49, %v4208_v35  ;;  %v1047_v9 = vsel %vm610_vm3, %v959_v36, %v4210_v12  ;;  %v1061_v1 = vsel %vm711_vm6, %v1008_v19, %v1060_v29  ;;  %v5360_v19 = vld [vmem:[#allocation57_spill] sm:$0xff] }
 0x432   : > { %v962_v11 = vmul.f32 0.03125, %v945_v28  ;;  %v963_v7 = vmul.f32 0.03125, %v954_v5  ;;  %v1045_v26 = vsel %vm612_vm5, %v960_v58, %v1044_v41  ;;  %v1048_v56 = vsel %vm612_vm5, %v961_v13, %v1047_v9  ;;  %v5359_v58 = vld [vmem:[#allocation43_spill] sm:$0xff]  ;;  %v5361_v5 = vld [vmem:[#allocation44_spill] sm:$0xff]  ;;  %v5362_v29 = vld [vmem:[#allocation45_spill] sm:$0xff] }
 0x433   : > { %v1064_v39 = vsel %vm711_vm6, %v1017_v60, %v1063_v31  ;;  %v1062_v6 = vsel %vm713_vm8, %v1026_v32, %v1061_v1  ;;  %v5363_v9 = vld [vmem:[#allocation59_spill] sm:$0xff]  ;;  %vm1981_vm3 = vcmask 662528   ;;  %vm2369_vm4 = vcmask 678912  }
 0x434   : > { %v1046_v53 = vsel %vm614_vm7, %v962_v11, %v1045_v26  ;;  %v1049_v37 = vsel %vm614_vm7, %v963_v7, %v1048_v56  ;;  %v1065_v35 = vsel %vm713_vm8, %v1035_v10, %v1064_v39  ;;  %v5364_v26 = vld [vmem:[#allocation46_spill] sm:$0xff]  ;;  %vm1247_vm5 = vcmask 629760  }
 0x435   : > { %v4239_v12 = vsel %vm716_vm9, %v1046_v53, %v1062_v6  ;;  %v4242_v2 = vsel %vm716_vm9, %v1049_v37, %v1065_v35  ;;  %v5365_v39 = vld [vmem:[#allocation50_spill] sm:$0xff]  ;;  %v5366_v6 = vld [vmem:[#allocation60_spill] sm:$0xff]  ;;  %vm1443_vm6 = vcmask 1039360   ;;  %vm1637_vm7 = vcmask 1031168  }
 0x436   : > { %5357 = vst [vmem:[#allocation126_spill] sm:$0xff] %v4242_v2  ;;  %v1089_v3 = vmul.f32 %v3725_v24, %v4239_v12  ;;  %v1090_v30 = vmul.f32 %v3725_v24, %v4242_v2  ;;  %v1114_v0 = vmul.f32 %v3753_v40, %v4239_v12  ;;  %v1115_v43 = vmul.f32 %v3753_v40, %v4242_v2 }
 0x437   : > { %v1139_v62 = vmul.f32 %v3741_v34, %v4239_v12  ;;  %v1140_v24 = vmul.f32 %v3741_v34, %v4242_v2  ;;  %v1164_v23 = vmul.f32 %v3750_v38, %v4242_v2  ;;  %v1163_v40 = vmul.f32 %v3750_v38, %v4239_v12 }
 0x438   : > { %1098 = vrot.lane.b32.xlu1 %v1090_v30, %s3219_s22  ;;  %1096 = vrot.lane.b32.xlu0 %v1089_v3, %s3219_s22  ;;  %v1189_v22 = vmul.f32 %v3758_v42, %v4242_v2  ;;  %v1188_v34 = vmul.f32 %v3758_v42, %v4239_v12  ;;  %v1214_v50 = vmul.f32 %v3766_v44, %v4242_v2  ;;  %v5367_v30 = vld [vmem:[#allocation52_spill] sm:$0xff]  ;;  %vm1804_vm8 = vcmask 1022976  }
 0x439   : > { %v1213_v38 = vmul.f32 %v3766_v44, %v4239_v12  ;;  %v1273_v54 = vmul.f32 %v3764_v47, %v4239_v12  ;;  %v1274_v42 = vmul.f32 %v3764_v47, %v4242_v2  ;;  %v1297_v18 = vmul.f32 %v3777_v55, %v4239_v12 }
 0x43a   : > { %v1298_v44 = vmul.f32 %v3777_v55, %v4242_v2  ;;  %v1321_v33 = vmul.f32 %v3781_v57, %v4239_v12  ;;  %v1322_v47 = vmul.f32 %v3781_v57, %v4242_v2  ;;  %v1345_v46 = vmul.f32 %v3785_v61, %v4242_v2 }
 0x43b   : > { %v1344_v55 = vmul.f32 %v3785_v61, %v4239_v12  ;;  %v1369_v15 = vmul.f32 %v3789_v63, %v4242_v2  ;;  %v1368_v57 = vmul.f32 %v3789_v63, %v4239_v12  ;;  %v1393_v14 = vmul.f32 %v3793_v48, %v4242_v2 }
 0x43c   : > { %1121 = vrot.lane.b32.xlu1 %v1114_v0, %s3222_s19  ;;  %1123 = vrot.lane.b32.xlu0 %v1115_v43, %s3222_s19  ;;  %v1392_v61 = vmul.f32 %v3793_v48, %v4239_v12  ;;  %v1468_v49 = vmul.f32 %v3815_v52, %v4242_v2  ;;  %v1467_v63 = vmul.f32 %v3815_v52, %v4239_v12  ;;  %vm1998_vm9 = vcmask 1014784  }
 0x43d   : > { %v1491_v36 = vmul.f32 %v3833_v25, %v4239_v12  ;;  %v1492_v48 = vmul.f32 %v3833_v25, %v4242_v2  ;;  %v1515_v17 = vmul.f32 %v3866_v16, %v4239_v12  ;;  %v1516_v52 = vmul.f32 %v3866_v16, %v4242_v2 }
 0x43e   : > { %v1539_v21 = vmul.f32 %v3871_v27, %v4242_v2  ;;  %v1538_v25 = vmul.f32 %v3871_v27, %v4239_v12  ;;  %v1563_v4 = vmul.f32 %v3883_v51, %v4242_v2  ;;  %v1562_v16 = vmul.f32 %v3883_v51, %v4239_v12 }
 0x43f   : > { %v1587_v8 = vmul.f32 %v3886_v45, %v4242_v2  ;;  %v1586_v27 = vmul.f32 %v3886_v45, %v4239_v12  ;;  %v1661_v20 = vmul.f32 %v5358_v59, %v4239_v12  ;;  %v1662_v51 = vmul.f32 %v5358_v59, %v4242_v2 }
 0x440   : > { %1146 = vrot.lane.b32.xlu1 %v1139_v62, %s3220_s12  ;;  %1148 = vrot.lane.b32.xlu0 %v1140_v24, %s3220_s12  ;;  %v1829_v13 = vmul.f32 %v5359_v58, %v4242_v2  ;;  %v1828_v45 = vmul.f32 %v5359_v58, %v4239_v12  ;;  %v1685_v60 = vmul.f32 %v5360_v19, %v4239_v12  ;;  %v5368_v62 = vld [vmem:[#allocation54_spill] sm:$0xff] }
 0x441   : > { %v1686_v28 = vmul.f32 %v5360_v19, %v4242_v2  ;;  %v1853_v32 = vmul.f32 %v5361_v5, %v4242_v2  ;;  %v1852_v10 = vmul.f32 %v5361_v5, %v4239_v12  ;;  %v2022_v31 = vmul.f32 %v5362_v29, %v4239_v12  ;;  %v5388_v19 = vld [vmem:[#allocation65_spill] sm:$0xff] }
 0x442   : > { %v2023_v41 = vmul.f32 %v5362_v29, %v4242_v2  ;;  %v1708_v11 = vmul.f32 %v5363_v9, %v4239_v12  ;;  %v1709_v7 = vmul.f32 %v5363_v9, %v4242_v2  ;;  %v1875_v56 = vmul.f32 %v5364_v26, %v4239_v12 }
 0x443   : > { %v1876_v1 = vmul.f32 %v5364_v26, %v4242_v2  ;;  %v2046_v53 = vmul.f32 %v5365_v39, %v4239_v12  ;;  %v2047_v37 = vmul.f32 %v5365_v39, %v4242_v2  ;;  %v2217_v35 = vmul.f32 %v5366_v6, %v4242_v2  ;;  %v5391_v26 = vld [vmem:[#allocation71_spill] sm:$0xff] }
 0x444   : > { %1171 = vrot.lane.b32.xlu1 %v1164_v23, %s3221_s14  ;;  %1169 = vrot.lane.b32.xlu0 %v1163_v40, %s3221_s14  ;;  %v2216_v3 = vmul.f32 %v5366_v6, %v4239_v12  ;;  %v1728_v0 = vmul.f32 %v5367_v30, %v4242_v2  ;;  %v1727_v43 = vmul.f32 %v5367_v30, %v4239_v12  ;;  %v5369_v40 = vld [vmem:[#allocation62_spill] sm:$0xff] }
 0x445   : > { %v1899_v24 = vmul.f32 %v5368_v62, %v4239_v12  ;;  %v1900_v23 = vmul.f32 %v5368_v62, %v4242_v2  ;;  %v1948_v5 = vmul.f32 %v5388_v19, %v4242_v2  ;;  %v2288_v39 = vmul.f32 %v5391_v26, %v4242_v2 }
 0x448   : > { %1196 = vrot.lane.b32.xlu1 %v1189_v22, %s3223_s11  ;;  %1194 = vrot.lane.b32.xlu0 %v1188_v34, %s3223_s11  ;;  %v2070_v22 = vmul.f32 %v5369_v40, %v4242_v2 }
 0x44c   : > { %1221 = vrot.lane.b32.xlu1 %v1214_v50, %s3224_s16  ;;  %1219 = vrot.lane.b32.xlu0 %v1213_v38, %s3224_s16  ;;  %v2069_v50 = vmul.f32 %v5369_v40, %v4239_v12 }
 0x450   : > { %1280 = vrot.lane.b32.xlu1 %v1273_v54, %s3219_s22  ;;  %1282 = vrot.lane.b32.xlu0 %v1274_v42, %s3219_s22  ;;  %v5372_v54 = vld [vmem:[#allocation56_spill] sm:$0xff] }
 0x451   : > { %v2241_v42 = vmul.f32 %v5372_v54, %v4242_v2 }
 0x454   : > { %1304 = vrot.lane.b32.xlu1 %v1297_v18, %s3222_s19  ;;  %1306 = vrot.lane.b32.xlu0 %v1298_v44, %s3222_s19  ;;  %v2240_v44 = vmul.f32 %v5372_v54, %v4239_v12 }
 0x458   : > { %1328 = vrot.lane.b32.xlu1 %v1321_v33, %s3220_s12  ;;  %1330 = vrot.lane.b32.xlu0 %v1322_v47, %s3220_s12  ;;  %v5375_v47 = vld [vmem:[#allocation58_spill] sm:$0xff] }
 0x45c   : > { %1352 = vrot.lane.b32.xlu1 %v1345_v46, %s3221_s14  ;;  %1350 = vrot.lane.b32.xlu0 %v1344_v55, %s3221_s14  ;;  %v1752_v46 = vmul.f32 %v5375_v47, %v4242_v2 }
 0x460   : > { %1376 = vrot.lane.b32.xlu1 %v1369_v15, %s3223_s11  ;;  %1374 = vrot.lane.b32.xlu0 %v1368_v57, %s3223_s11  ;;  %v1751_v15 = vmul.f32 %v5375_v47, %v4239_v12 }
 0x464   : > { %1400 = vrot.lane.b32.xlu1 %v1393_v14, %s3224_s16  ;;  %1398 = vrot.lane.b32.xlu0 %v1392_v61, %s3224_s16  ;;  %v5378_v14 = vld [vmem:[#allocation64_spill] sm:$0xff] }
 0x465   : > { %v1923_v61 = vmul.f32 %v5378_v14, %v4239_v12 }
 0x468   : > { %1476 = vrot.lane.b32.xlu1 %v1468_v49, %s3219_s22  ;;  %1474 = vrot.lane.b32.xlu0 %v1467_v63, %s3219_s22  ;;  %v1924_v63 = vmul.f32 %v5378_v14, %v4242_v2  ;;  %v5394_v14 = vld [vmem:[#allocation39_spill] sm:$0xff] }
 0x46c   : > { %1498 = vrot.lane.b32.xlu1 %v1491_v36, %s3222_s19  ;;  %1500 = vrot.lane.b32.xlu0 %v1492_v48, %s3222_s19  ;;  %v5381_v48 = vld [vmem:[#allocation61_spill] sm:$0xff] }
 0x470   : > { %1522 = vrot.lane.b32.xlu1 %v1515_v17, %s3220_s12  ;;  %1524 = vrot.lane.b32.xlu0 %v1516_v52, %s3220_s12  ;;  %v2094_v17 = vmul.f32 %v5381_v48, %v4242_v2 }
 0x474   : > { %1546 = vrot.lane.b32.xlu1 %v1539_v21, %s3221_s14  ;;  %1544 = vrot.lane.b32.xlu0 %v1538_v25, %s3221_s14  ;;  %v2093_v21 = vmul.f32 %v5381_v48, %v4239_v12 }
 0x478   : > { %1570 = vrot.lane.b32.xlu1 %v1563_v4, %s3223_s11  ;;  %1568 = vrot.lane.b32.xlu0 %v1562_v16, %s3223_s11  ;;  %v5384_v4 = vld [vmem:[#allocation63_spill] sm:$0xff] }
 0x479   : > { %v2263_v16 = vmul.f32 %v5384_v4, %v4239_v12 }
 0x47c   : > { %1594 = vrot.lane.b32.xlu1 %v1587_v8, %s3224_s16  ;;  %1592 = vrot.lane.b32.xlu0 %v1586_v27, %s3224_s16  ;;  %v2264_v27 = vmul.f32 %v5384_v4, %v4242_v2 }
 0x480   : > { %1668 = vrot.lane.b32.xlu1 %v1661_v20, %s3219_s22  ;;  %1670 = vrot.lane.b32.xlu0 %v1662_v51, %s3219_s22  ;;  %v5387_v20 = vld [vmem:[#allocation66_spill] sm:$0xff] }
 0x481   : > { %v1776_v51 = vmul.f32 %v5387_v20, %v4242_v2 }
 0x484   : > { %1837 = vrot.lane.b32.xlu1 %v1829_v13, %s3219_s22  ;;  %1835 = vrot.lane.b32.xlu0 %v1828_v45, %s3219_s22  ;;  %v1775_v13 = vmul.f32 %v5387_v20, %v4239_v12 }
 0x488   : > { %1692 = vrot.lane.b32.xlu1 %v1685_v60, %s3222_s19  ;;  %1694 = vrot.lane.b32.xlu0 %v1686_v28, %s3222_s19  ;;  %v1947_v60 = vmul.f32 %v5388_v19, %v4239_v12 }
 0x48c   : > { %1861 = vrot.lane.b32.xlu1 %v1853_v32, %s3222_s19  ;;  %1859 = vrot.lane.b32.xlu0 %v1852_v10, %s3222_s19  ;;  %v5389_v10 = vld [vmem:[#allocation67_spill] sm:$0xff] }
 0x48d   : > { %v2118_v29 = vmul.f32 %v5389_v10, %v4242_v2 }
 0x490   : > { %2029 = vrot.lane.b32.xlu1 %v2022_v31, %s3219_s22  ;;  %2031 = vrot.lane.b32.xlu0 %v2023_v41, %s3219_s22  ;;  %v2117_v41 = vmul.f32 %v5389_v10, %v4239_v12 }
 0x494   : > { %1712 = vrot.lane.b32.xlu1 %v1708_v11, %s3220_s12  ;;  %1714 = vrot.lane.b32.xlu0 %v1709_v7, %s3220_s12  ;;  %v5390_v11 = vld [vmem:[#allocation16_spill] sm:$0xff] }
 0x495   : > { %v1969_v7 = vsub.s32 4, %v5390_v11  ;;  %v2163_v48 = vsub.s32 5, %v5390_v11 }
 0x498   : > { %1881 = vrot.lane.b32.xlu1 %v1875_v56, %s3220_s12  ;;  %1883 = vrot.lane.b32.xlu0 %v1876_v1, %s3220_s12  ;;  %v2287_v56 = vmul.f32 %v5391_v26, %v4239_v12 }
 0x49c   : > { %2053 = vrot.lane.b32.xlu1 %v2046_v53, %s3222_s19  ;;  %2055 = vrot.lane.b32.xlu0 %v2047_v37, %s3222_s19  ;;  %v4522_v37 = vld [vmem:[%s5118_s7] sm:$0x7f] }
 0x49d   : > { %v1970_v6 = vrot.slane %v4522_v37, %v1969_v7 }
 0x4a0   : > { %2225 = vrot.lane.b32.xlu1 %v2217_v35, %s3219_s22  ;;  %2223 = vrot.lane.b32.xlu0 %v2216_v3, %s3219_s22  ;;  %v2289_v35 = vmul.f32 0.0, %v5391_v26  ;;  %s4991_s22 = scalar_lea.vmem [#allocation11], %s2749_s27  ;;  %s2769_s27 = sshll.u32 %s3342_s6, 12 }
 0x4a4   : > { %1735 = vrot.lane.b32.xlu1 %v1728_v0, %s3221_s14  ;;  %1733 = vrot.lane.b32.xlu0 %v1727_v43, %s3221_s14  ;;  %v4534_v0 = vld [vmem:[%s5118_s7 + $0x8] sm:$0x7f] }
 0x4a5   : > { %v1974_v43 = vrot.slane %v4534_v0, %v1969_v7 }
 0x4a8   : > { %1905 = vrot.lane.b32.xlu1 %v1899_v24, %s3221_s14  ;;  %1907 = vrot.lane.b32.xlu0 %v1900_v23, %s3221_s14  ;;  %v5392_v24 = vld [vmem:[#allocation68_spill] sm:$0xff] }
 0x4a9   : > { %v2141_v23 = vmul.f32 %v5392_v24, %v4239_v12  ;;  %v2143_v54 = vmul.f32 0.0, %v5392_v24 }
 0x4aa   : > { %v4420_v34 = vpop.permute.xlu1 %1098  ;;  %v4424_v38 = vpop.permute.xlu0 %1096 }
 0x4ab   : > { %5370 = vst [vmem:[#allocation42_spill] sm:$0xff] %v4420_v34  ;;  %5371 = vst [vmem:[#allocation43_spill] sm:$0xff] %v4424_v38  ;;  %v5415_v34 = vld [vmem:[#allocation83_spill] sm:$0xff] }
 0x4ac   : > { %2077 = vrot.lane.b32.xlu1 %v2070_v22, %s3220_s12  ;;  %2075 = vrot.lane.b32.xlu0 %v2069_v50, %s3220_s12  ;;  %v2142_v22 = vmul.f32 %v5392_v24, %v4242_v2 }
 0x4ae   : > { %v4430_v18 = vpop.permute.xlu1 %1121  ;;  %v4434_v33 = vpop.permute.xlu0 %1123 }
 0x4af   : > { %5373 = vst [vmem:[#allocation57_spill] sm:$0xff] %v4430_v18  ;;  %5374 = vst [vmem:[#allocation44_spill] sm:$0xff] %v4434_v33 }
 0x4b0   : > { %2249 = vrot.lane.b32.xlu1 %v2241_v42, %s3222_s19  ;;  %2247 = vrot.lane.b32.xlu0 %v2240_v44, %s3222_s19  ;;  %v5393_v42 = vld [vmem:[#allocation37_spill] sm:$0xff]  ;;  %s3261_s19 = smov 83  }
 0x4b1   : > { %v1457_v44 = vmul.f32 %v5393_v42, %v4239_v12 }
 0x4b2   : > { %v4440_v55 = vpop.permute.xlu1 %1146  ;;  %v4444_v57 = vpop.permute.xlu0 %1148 }
 0x4b3   : > { %5376 = vst [vmem:[#allocation45_spill] sm:$0xff] %v4440_v55  ;;  %5377 = vst [vmem:[#allocation59_spill] sm:$0xff] %v4444_v57 }
 0x4b4   : > { %1759 = vrot.lane.b32.xlu1 %v1752_v46, %s3223_s11  ;;  %1757 = vrot.lane.b32.xlu0 %v1751_v15, %s3223_s11  ;;  %v1458_v46 = vmul.f32 %v5393_v42, %v4242_v2 }
 0x4b6   : > { %v4450_v49 = vpop.permute.xlu1 %1171  ;;  %v4454_v36 = vpop.permute.xlu0 %1169 }
 0x4b7   : > { %5379 = vst [vmem:[#allocation46_spill] sm:$0xff] %v4450_v49  ;;  %5380 = vst [vmem:[#allocation50_spill] sm:$0xff] %v4454_v36  ;;  %v5414_v49 = vld [vmem:[#allocation77_spill] sm:$0xff] }
 0x4b8   : > { %1929 = vrot.lane.b32.xlu1 %v1923_v61, %s3223_s11  ;;  %1931 = vrot.lane.b32.xlu0 %v1924_v63, %s3223_s11 }
 0x4ba   : > { %v4460_v52 = vpop.permute.xlu1 %1196  ;;  %v4464_v25 = vpop.permute.xlu0 %1194 }
 0x4bb   : > { %5382 = vst [vmem:[#allocation60_spill] sm:$0xff] %v4460_v52  ;;  %5383 = vst [vmem:[#allocation52_spill] sm:$0xff] %v4464_v25  ;;  %v5412_v25 = vld [vmem:[#allocation74_spill] sm:$0xff] }
 0x4bc   : > { %2101 = vrot.lane.b32.xlu1 %v2094_v17, %s3221_s14  ;;  %2099 = vrot.lane.b32.xlu0 %v2093_v21, %s3221_s14  ;;  %v5395_v17 = vld [vmem:[#allocation69_spill] sm:$0xff]  ;;  %v5413_v52 = vld [vmem:[#allocation22_spill] sm:$0xff] }
 0x4bd   : > { %v2311_v21 = vmul.f32 %v5395_v17, %v4239_v12  ;;  %v2312_v20 = vmul.f32 %v5395_v17, %v4242_v2  ;;  %v2313_v7 = vmul.f32 0.0, %v5395_v17  ;;  %v2357_v17 = vsub.s32 6, %v5390_v11 }
 0x4be   : > { %v4470_v8 = vpop.permute.xlu1 %1221  ;;  %v4474_v59 = vpop.permute.xlu0 %1219  ;;  %v1264_v57 = vmul.f32 %v5413_v52, %v4242_v2 }
 0x4bf   : > { %5385 = vst [vmem:[#allocation54_spill] sm:$0xff] %v4470_v8  ;;  %5386 = vst [vmem:[#allocation62_spill] sm:$0xff] %v4474_v59 }
 0x4c0   : > { %2269 = vrot.lane.b32.xlu1 %v2263_v16, %s3220_s12  ;;  %2271 = vrot.lane.b32.xlu0 %v2264_v27, %s3220_s12  ;;  %s3259_s12 = smov 81   ;;  %v1456_v16 = vmul.f32 0.0, %v5393_v42  ;;  %v5398_v42 = vld [vmem:[#allocation73_spill] sm:$0xff] }
 0x4c2   : > { %v4480_v58 = vpop.permute.xlu1 %1280  ;;  %v4484_v45 = vpop.permute.xlu0 %1282 }
 0x4c4   : > { %1783 = vrot.lane.b32.xlu1 %v1776_v51, %s3224_s16  ;;  %1781 = vrot.lane.b32.xlu0 %v1775_v13, %s3224_s16  ;;  %v5396_v51 = vld [vmem:[#allocation40_spill] sm:$0xff] }
 0x4c6   : > { %v4490_v28 = vpop.permute.xlu1 %1304  ;;  %v4494_v32 = vpop.permute.xlu0 %1306 }
 0x4c8   : > { %1953 = vrot.lane.b32.xlu1 %v1947_v60, %s3224_s16  ;;  %1955 = vrot.lane.b32.xlu0 %v1948_v5, %s3224_s16 }
 0x4ca   : > { %v4500_v31 = vpop.permute.xlu1 %1328  ;;  %v4504_v9 = vpop.permute.xlu0 %1330 }
 0x4cc   : > { %2125 = vrot.lane.b32.xlu1 %v2118_v29, %s3223_s11  ;;  %2123 = vrot.lane.b32.xlu0 %v2117_v41, %s3223_s11  ;;  %v2164_v41 = vrot.slane %v4522_v37, %v2163_v48 }
 0x4ce   : > { %v4511_v1 = vpop.permute.xlu1 %1352  ;;  %v4515_v53 = vpop.permute.xlu0 %1350 }
 0x4d0   : > { %2293 = vrot.lane.b32.xlu1 %v2287_v56, %s3221_s14  ;;  %2295 = vrot.lane.b32.xlu0 %v2288_v39, %s3221_s14  ;;  %v5397_v39 = vld [vmem:[#allocation47_spill] sm:$0xff] }
 0x4d2   : > { %v4526_v3 = vpop.permute.xlu1 %1376  ;;  %v4528_v30 = vpop.permute.xlu0 %1374 }
 0x4d4   : > { %2297 = vrot.lane.b32.xlu1 %v2289_v35, %s3221_s14  ;;  %1977 = vrot.lane.b32.xlu0 %v1970_v6, %s3259_s12  ;;  %s3260_s14 = smov 82  }
 0x4d6   : > { %v4537_v62 = vpop.permute.xlu1 %1400  ;;  %v4541_v40 = vpop.permute.xlu0 %1398 }
 0x4d8   : > { %1979 = vrot.lane.b32.xlu1 %v1974_v43, %s3259_s12  ;;  %2147 = vrot.lane.b32.xlu0 %v2141_v23, %s3224_s16  ;;  %s2634_s12 = sshll.u32 %s4991_s22, 4  ;;  %s5055_s12 = int_to_ptr.vmem [resolvable:$true] %s2634_s12 }
 0x4da   : > { %v1477_v50 = vpop.permute.xlu1 %1476  ;;  %v1475_v47 = vpop.permute.xlu0 %1474 }
 0x4db   : > { %v1479_v15 = vsel %vm1100_vm11, %v1475_v47, %v1477_v50  ;;  %v1478_v61 = vsel %vm1100_vm11, %v5394_v14, %v1475_v47  ;;  %v1485_v4 = vadd.f32 %v1477_v50, %v1458_v46  ;;  %v5399_v47 = vld [vmem:[#allocation48_spill] sm:$0xff] }
 0x4dc   : > { %2149 = vrot.lane.b32.xlu1 %v2142_v22, %s3224_s16  ;;  %v1484_v63 = vadd.f32 %v1479_v15, %v1457_v44  ;;  %2151 = vrot.lane.b32.xlu0 %v2143_v54, %s3224_s16  ;;  %v1483_v60 = vadd.f32 %v1478_v61, %v1456_v16  ;;  %v2168_v22 = vrot.slane %v4534_v0, %v2163_v48  ;;  %v2337_v16 = vmul.f32 0.0, %v5398_v42 }
 0x4dd   : > { %v2335_v44 = vmul.f32 %v5398_v42, %v4239_v12 }
 0x4de   : > { %v1499_v27 = vpop.permute.xlu1 %1498  ;;  %v1501_v19 = vpop.permute.xlu0 %1500 }
 0x4df   : > { %v1502_v13 = vsel %vm1125_vm12, %v5396_v51, %v1499_v27  ;;  %v1503_v5 = vsel %vm1125_vm12, %v1499_v27, %v1501_v19  ;;  %v1509_v10 = vadd.f32 %v1501_v19, %v1485_v4  ;;  %v5400_v27 = vld [vmem:[#allocation49_spill] sm:$0xff] }
 0x4e0   : > { %2317 = vrot.lane.b32.xlu1 %v2311_v21, %s3223_s11  ;;  %v1508_v29 = vadd.f32 %v1503_v5, %v1484_v63  ;;  %2319 = vrot.lane.b32.xlu0 %v2312_v20, %s3223_s11  ;;  %v1507_v26 = vadd.f32 %v1502_v13, %v1483_v60  ;;  %v2336_v21 = vmul.f32 %v5398_v42, %v4242_v2 }
 0x4e1   : > { %v2358_v5 = vrot.slane %v4522_v37, %v2357_v17 }
 0x4e2   : > { %v1523_v56 = vpop.permute.xlu1 %1522  ;;  %v1525_v35 = vpop.permute.xlu0 %1524 }
 0x4e3   : > { %v1526_v6 = vsel %vm1150_vm13, %v5397_v39, %v1523_v56  ;;  %v1527_v24 = vsel %vm1150_vm13, %v1523_v56, %v1525_v35  ;;  %v1533_v23 = vadd.f32 %v1525_v35, %v1509_v10 }
 0x4e4   : > { %v1531_v43 = vadd.f32 %v1526_v6, %v1507_v26  ;;  %2321 = vrot.lane.b32.xlu1 %v2313_v7, %s3223_s11  ;;  %v1532_v50 = vadd.f32 %v1527_v24, %v1508_v29  ;;  %2171 = vrot.lane.b32.xlu0 %v2164_v41, %s3260_s14  ;;  %v2362_v29 = vrot.slane %v4534_v0, %v2357_v17  ;;  %v5401_v7 = vld [vmem:[#allocation51_spill] sm:$0xff]  ;;  %v5402_v0 = vld [vmem:[#allocation70_spill] sm:$0xff]  ;;  %s3262_s11 = smov 125  }
 0x4e6   : > { %v1547_v54 = vpop.permute.xlu1 %1546  ;;  %v1545_v15 = vpop.permute.xlu0 %1544 }
 0x4e7   : > { %v1551_v46 = vsel %vm1175_vm14, %v1547_v54, %v5399_v47  ;;  %v1550_v61 = vsel %vm1175_vm14, %v1545_v15, %v1547_v54  ;;  %v1555_v63 = vadd.f32 %v1545_v15, %v1531_v43  ;;  %v1818_v54 = vmul.f32 %v5402_v0, %v4239_v12 }
 0x4e8   : > { %v1557_v14 = vadd.f32 %v1551_v46, %v1533_v23  ;;  %2173 = vrot.lane.b32.xlu1 %v2168_v22, %s3260_s14  ;;  %v1556_v48 = vadd.f32 %v1550_v61, %v1532_v50  ;;  %2341 = vrot.lane.b32.xlu0 %v2335_v44, %s3224_s16  ;;  %v1819_v23 = vmul.f32 %v5402_v0, %v4242_v2 }
 0x4ea   : > { %v1571_v4 = vpop.permute.xlu1 %1570  ;;  %v1569_v51 = vpop.permute.xlu0 %1568 }
 0x4eb   : > { %v1575_v20 = vsel %vm1200_vm15, %v1571_v4, %v5400_v27  ;;  %v1574_v19 = vsel %vm1200_vm15, %v1569_v51, %v1571_v4  ;;  %v1579_v60 = vadd.f32 %v1569_v51, %v1555_v63  ;;  %v1817_v63 = vmul.f32 0.0, %v5402_v0 }
 0x4ec   : > { %v1581_v13 = vadd.f32 %v1575_v20, %v1557_v14  ;;  %2343 = vrot.lane.b32.xlu1 %v2336_v21, %s3224_s16  ;;  %v1580_v10 = vadd.f32 %v1574_v19, %v1556_v48  ;;  %2345 = vrot.lane.b32.xlu0 %v2337_v16, %s3224_s16  ;;  %v5403_v14 = vld [vmem:[#allocation76_spill] sm:$0xff]  ;;  %v5404_v16 = vld [vmem:[#allocation78_spill] sm:$0xff]  ;;  %s3263_s16 = smov 127  }
 0x4ee   : > { %v1595_v41 = vpop.permute.xlu1 %1594  ;;  %v1593_v56 = vpop.permute.xlu0 %1592 }
 0x4ef   : > { %v1599_v26 = vsel %vm726_vm10, %v1595_v41, %v5401_v7  ;;  %v1598_v6 = vsel %vm726_vm10, %v1593_v56, %v1595_v41  ;;  %v4596_v35 = vadd.f32 %v1593_v56, %v1579_v60  ;;  %v5405_v60 = vld [vmem:[#allocation72_spill] sm:$0xff] }
 0x4f0   : > { %v4593_v39 = vadd.f32 %v1599_v26, %v1581_v13  ;;  %2365 = vrot.lane.b32.xlu1 %v2358_v5, %s3261_s19  ;;  %v4598_v43 = vadd.f32 %v1598_v6, %v1580_v10  ;;  %2367 = vrot.lane.b32.xlu0 %v2362_v29, %s3261_s19  ;;  %v2013_v5 = vmul.f32 %v5405_v60, %v4242_v2  ;;  %s5053_s19 = scalar_lea.hbm %s5119_s8, %s2769_s27 }
 0x4f1   : > { %v2012_v10 = vmul.f32 %v5405_v60, %v4239_v12 }
 0x4f2   : > { %v4600_v37 = vpop.permute.xlu1 %1668  ;;  %v4602_v24 = vpop.permute.xlu0 %1670 }
 0x4f3   : > { %v1672_v36 = vsel %vm1100_vm11, %v5412_v25, %v4600_v37 }
 0x4f6   : > { %v1838_v22 = vpop.permute.xlu1 %1837  ;;  %v1836_v42 = vpop.permute.xlu0 %1835 }
 0x4f7   : > { %v1846_v50 = vadd.f32 %v1838_v22, %v1819_v23  ;;  %v1840_v44 = vsel %vm1100_vm11, %v1836_v42, %v1838_v22  ;;  %v1839_v61 = vsel %vm1100_vm11, %v5403_v14, %v1836_v42  ;;  %v5406_v23 = vld [vmem:[#allocation79_spill] sm:$0xff]  ;;  %v2011_v42 = vmul.f32 0.0, %v5405_v60 }
 0x4f8   : > { %v1845_v47 = vadd.f32 %v1840_v44, %v1818_v54  ;;  %v1844_v48 = vadd.f32 %v1839_v61, %v1817_v63  ;;  %v5407_v63 = vld [vmem:[#allocation81_spill] sm:$0xff] }
 0x4fa   : > { %v4609_v46 = vpop.permute.xlu1 %1692  ;;  %v4611_v15 = vpop.permute.xlu0 %1694 }
 0x4fb   : > { %v1696_v33 = vsel %vm1125_vm12, %v5414_v49, %v4609_v46 }
 0x4fe   : > { %v1862_v17 = vpop.permute.xlu1 %1861  ;;  %v1860_v4 = vpop.permute.xlu0 %1859 }
 0x4ff   : > { %v4616_v21 = vadd.f32 %v1862_v17, %v1846_v50  ;;  %v1863_v27 = vsel %vm1125_vm12, %v5404_v16, %v1860_v4  ;;  %v1864_v20 = vsel %vm1125_vm12, %v1860_v4, %v1862_v17 }
 0x500   : > { %v1868_v51 = vadd.f32 %v1863_v27, %v1844_v48  ;;  %v1869_v13 = vadd.f32 %v1864_v20, %v1845_v47 }
 0x502   : > { %v2030_v19 = vpop.permute.xlu1 %2029  ;;  %v2032_v29 = vpop.permute.xlu0 %2031 }
 0x503   : > { %v2034_v41 = vsel %vm1100_vm11, %v2030_v19, %v2032_v29  ;;  %v2040_v7 = vadd.f32 %v2032_v29, %v2013_v5  ;;  %v2033_v22 = vsel %vm1100_vm11, %v5406_v23, %v2030_v19 }
 0x504   : > { %v2039_v26 = vadd.f32 %v2034_v41, %v2012_v10  ;;  %v2038_v14 = vadd.f32 %v2033_v22, %v2011_v42 }
 0x506   : > { %v4626_v56 = vpop.permute.xlu1 %1712  ;;  %v1715_v6 = vpop.permute.xlu0 %1714 }
 0x50a   : > { %v1882_v0 = vpop.permute.xlu1 %1881  ;;  %v4632_v54 = vpop.permute.xlu0 %1883 }
 0x50b   : > { %v4630_v50 = vadd.f32 %v1882_v0, %v1868_v51  ;;  %v1887_v44 = vsel %vm1150_vm13, %v1882_v0, %v4632_v54  ;;  %v5408_v51 = vld [vmem:[#allocation75_spill] sm:$0xff] }
 0x50c   : > { %v1893_v47 = vadd.f32 %v1887_v44, %v1869_v13  ;;  %v2207_v19 = vmul.f32 %v5408_v51, %v4242_v2  ;;  %v2206_v13 = vmul.f32 %v5408_v51, %v4239_v12 }
 0x50e   : > { %v2054_v61 = vpop.permute.xlu1 %2053  ;;  %v2056_v48 = vpop.permute.xlu0 %2055 }
 0x50f   : > { %v2057_v17 = vsel %vm1125_vm12, %v5407_v63, %v2054_v61  ;;  %v2058_v16 = vsel %vm1125_vm12, %v2054_v61, %v2056_v48  ;;  %v4640_v27 = vadd.f32 %v2056_v48, %v2040_v7 }
 0x510   : > { %v2062_v4 = vadd.f32 %v2057_v17, %v2038_v14  ;;  %v4642_v20 = vadd.f32 %v2058_v16, %v2039_v26 }
 0x512   : > { %v2226_v60 = vpop.permute.xlu1 %2225  ;;  %v4650_v10 = vpop.permute.xlu0 %2223 }
 0x513   : > { %v4646_v5 = vadd.f32 %v2226_v60, %v2207_v19  ;;  %v2228_v29 = vsel %vm1100_vm11, %v4650_v10, %v2226_v60 }
 0x514   : > { %v2233_v41 = vadd.f32 %v2228_v29, %v2206_v13  ;;  %v5411_v29 = vld [vmem:[#allocation55_spill] sm:$0xff] }
 0x515   : > { %v1651_v11 = vmul.f32 %v5411_v29, %v4239_v12  ;;  %v1650_v18 = vmul.f32 0.0, %v5411_v29 }
 0x516   : > { %v1736_v0 = vpop.permute.xlu1 %1735  ;;  %v1734_v7 = vpop.permute.xlu0 %1733 }
 0x517   : > { %v1740_v25 = vsel %vm1175_vm14, %v1736_v0, %v5415_v34 }
 0x51a   : > { %v4654_v23 = vpop.permute.xlu1 %1905  ;;  %v4656_v26 = vpop.permute.xlu0 %1907 }
 0x51b   : > { %v1911_v22 = vsel %vm1175_vm14, %v4654_v23, %v4656_v26 }
 0x51c   : > { %v4661_v42 = vadd.f32 %v1911_v22, %v1893_v47  ;;  %v1673_v22 = vsel %vm1100_vm11, %v4600_v37, %v4602_v24  ;;  %v1677_v37 = vadd.f32 %v1672_v36, %v1650_v18 }
 0x51d   : > { %v1678_v8 = vadd.f32 %v1673_v22, %v1651_v11  ;;  %v1291_v11 = vadd.f32 %v4484_v45, %v1264_v57 }
 0x51e   : > { %v4663_v44 = vpop.permute.xlu1 %2077  ;;  %v4665_v14 = vpop.permute.xlu0 %2075 }
 0x51f   : > { %v4668_v61 = vadd.f32 %v4665_v14, %v2062_v4  ;;  %v1652_v4 = vmul.f32 %v5411_v29, %v4242_v2  ;;  %v1739_v2 = vsel %vm1175_vm14, %v1734_v7, %v1736_v0  ;;  %v1315_v49 = vadd.f32 %v4494_v32, %v1291_v11 }
 0x521   : > { %5409 = vst [vmem:[#allocation56_spill] sm:$0xff] %v4668_v61  ;;  %v1679_v59 = vadd.f32 %v4602_v24, %v1652_v4  ;;  %v1716_v4 = vsel %vm1150_vm13, %v4626_v56, %v1715_v6  ;;  %v1339_v36 = vadd.f32 %v4504_v9, %v1315_v49 }
 0x522   : > { %v4670_v63 = vpop.permute.xlu1 %2249  ;;  %v4672_v17 = vpop.permute.xlu0 %2247 }
 0x523   : > { %v2252_v48 = vsel %vm1125_vm12, %v4672_v17, %v4670_v63  ;;  %v1703_v24 = vadd.f32 %v4611_v15, %v1679_v59 }
 0x524   : > { %v4677_v16 = vadd.f32 %v2252_v48, %v2233_v41  ;;  %v1697_v41 = vsel %vm1125_vm12, %v4609_v46, %v4611_v15  ;;  %v5416_v15 = vld [vmem:[#allocation87_spill] sm:$0xff] }
 0x525   : > { %v1702_v38 = vadd.f32 %v1697_v41, %v1678_v8  ;;  %v1722_v22 = vadd.f32 %v1715_v6, %v1703_v24  ;;  %v1701_v8 = vadd.f32 %v1696_v33, %v1677_v37  ;;  %v5417_v41 = vld [vmem:[#allocation34_spill] sm:$0xff]  ;;  %v5418_v24 = vld [vmem:[#allocation35_spill] sm:$0xff] }
 0x526   : > { %5410 = vst [vmem:[#allocation58_spill] sm:$0xff] %v4677_v16  ;;  %v1760_v19 = vpop.permute.xlu1 %1759  ;;  %v1758_v47 = vpop.permute.xlu0 %1757  ;;  %v1357_v18 = vsel %vm1175_vm14, %v4511_v1, %v5417_v41  ;;  %v5419_v33 = vld [vmem:[#allocation91_spill] sm:$0xff] }
 0x527   : > { %v1721_v59 = vadd.f32 %v1716_v4, %v1702_v38  ;;  %v1764_v16 = vsel %vm1200_vm15, %v1760_v19, %v5416_v15  ;;  %v1746_v46 = vadd.f32 %v1740_v25, %v1722_v22  ;;  %v1763_v34 = vsel %vm1200_vm15, %v1758_v47, %v1760_v19 }
 0x528   : > { %v1720_v38 = vadd.f32 %v4626_v56, %v1701_v8  ;;  %v1381_v4 = vsel %vm1200_vm15, %v4526_v3, %v5418_v24  ;;  %v1363_v37 = vadd.f32 %v1357_v18, %v1339_v36  ;;  %v1263_v36 = vmul.f32 %v5413_v52, %v4239_v12  ;;  %v5422_v24 = vld [vmem:[#allocation80_spill] sm:$0xff] }
 0x529   : > { %v1745_v57 = vadd.f32 %v1739_v2, %v1721_v59  ;;  %v1770_v6 = vadd.f32 %v1764_v16, %v1746_v46  ;;  %v5420_v59 = vld [vmem:[#allocation36_spill] sm:$0xff] }
 0x52a   : > { %v4679_v60 = vpop.permute.xlu1 %1929  ;;  %v4681_v13 = vpop.permute.xlu0 %1931  ;;  %v1744_v22 = vadd.f32 %v1734_v7, %v1720_v38  ;;  %v1405_v56 = vsel %vm726_vm10, %v4537_v62, %v5420_v59  ;;  %v1387_v49 = vadd.f32 %v1381_v4, %v1363_v37  ;;  %v1285_v7 = vsel %vm1100_vm11, %v4480_v58, %v4484_v45 }
 0x52b   : > { %v1769_v11 = vadd.f32 %v1763_v34, %v1745_v57  ;;  %v1309_v38 = vsel %vm1125_vm12, %v4490_v28, %v4494_v32  ;;  %v1888_v4 = vsel %vm1150_vm13, %v4632_v54, %v5422_v24  ;;  %v1333_v45 = vsel %vm1150_vm13, %v4500_v31, %v4504_v9  ;;  %v5424_v9 = vld [vmem:[#allocation53_spill] sm:$0xff] }
 0x52c   : > { %v1768_v8 = vadd.f32 %v1758_v47, %v1744_v22  ;;  %v1411_v41 = vadd.f32 %v1405_v56, %v1387_v49  ;;  %v1894_v37 = vadd.f32 %v1888_v4, %v4616_v21  ;;  %v1356_v54 = vsel %vm1175_vm14, %v4515_v53, %v4511_v1  ;;  %v5426_v21 = vld [vmem:[#allocation92_spill] sm:$0xff] }
 0x52e   : > { %v4694_v48 = vpop.permute.xlu1 %2101  ;;  %v4699_v55 = vpop.permute.xlu0 %2099 }
 0x532   : > { %v4714_v29 = vpop.permute.xlu1 %2269  ;;  %v4718_v61 = vpop.permute.xlu0 %2271 }
 0x536   : > { %v1784_v0 = vpop.permute.xlu1 %1783  ;;  %v1782_v19 = vpop.permute.xlu0 %1781 }
 0x537   : > { %v1788_v25 = vsel %vm726_vm10, %v1784_v0, %v5419_v33  ;;  %v1787_v2 = vsel %vm726_vm10, %v1782_v19, %v1784_v0  ;;  %v1792_v18 = vadd.f32 %v1782_v19, %v1768_v8  ;;  %v5423_v33 = vld [vmem:[#allocation84_spill] sm:$0xff] }
 0x538   : > { %v1794_v15 = vadd.f32 %v1788_v25, %v1770_v6  ;;  %v1793_v16 = vadd.f32 %v1787_v2, %v1769_v11  ;;  %v5421_v6 = vld [vmem:[#allocation23_spill] sm:$0xff]  ;;  %v1290_v11 = vadd.f32 %v1285_v7, %v1263_v36  ;;  %v1912_v25 = vsel %vm1175_vm14, %v4656_v26, %v5423_v33  ;;  %v5425_v2 = vld [vmem:[#allocation88_spill] sm:$0xff] }
 0x539   : > { %v1433_v0 = vmul.f32 %v5421_v6, %v1411_v41  ;;  %v1936_v26 = vsel %vm1200_vm15, %v4681_v13, %v5425_v2  ;;  %v1918_v56 = vadd.f32 %v1912_v25, %v1894_v37  ;;  %v5428_v33 = vld [vmem:[#allocation32_spill] sm:$0xff] }
 0x53a   : > { %v4736_v46 = vpop.permute.xlu1 %1953  ;;  %1802 = vrot.lane.b32.xlu1 %v1794_v15, %s3262_s11  ;;  %1800 = vrot.lane.b32.xlu0 %v1793_v16, %s3262_s11  ;;  %v4738_v34 = vpop.permute.xlu0 %1955  ;;  %v1314_v32 = vadd.f32 %v1309_v38, %v1290_v11  ;;  %v1627_v15 = vmul.f32 %v5424_v9, %v4593_v39  ;;  %v1380_v16 = vsel %vm1200_vm15, %v4528_v30, %v4526_v3  ;;  %v5427_v38 = vld [vmem:[#allocation30_spill] sm:$0xff]  ;;  %v5429_v25 = vld [vmem:[#allocation24_spill] sm:$0xff] }
 0x53b   : > { %v1960_v49 = vsel %vm726_vm10, %v4738_v34, %v5426_v21  ;;  %v1942_v39 = vadd.f32 %v1936_v26, %v1918_v56  ;;  %v1916_v56 = vadd.f32 %v4654_v23, %v4630_v50 }
 0x53c   : > { %v1338_v59 = vadd.f32 %v1333_v45, %v1314_v32  ;;  %v1262_v45 = vmul.f32 0.0, %v5413_v52  ;;  %v1427_v32 = vsel %vm1426_vm0, %v5429_v25, %v5421_v6  ;;  %v2081_v6 = vsel %vm1150_vm13, %v4665_v14, %v4663_v44 }
 0x53d   : > { %v1966_v36 = vadd.f32 %v1960_v49, %v1942_v39  ;;  %v5433_v49 = vld [vmem:[#allocation89_spill] sm:$0xff]  ;;  %v1940_v23 = vadd.f32 %v4679_v60, %v1916_v56 }
 0x53e   : > { %v4743_v57 = vpop.permute.xlu1 %2125  ;;  %1798 = vrot.lane.b32.xlu1 %v1792_v18, %s3262_s11  ;;  %v4747_v47 = vpop.permute.xlu0 %2123  ;;  %v1362_v1 = vadd.f32 %v1356_v54, %v1338_v59  ;;  %v1404_v18 = vsel %vm726_vm10, %v4541_v40, %v4537_v62  ;;  %v1308_v62 = vsel %vm1125_vm12, %v5428_v33, %v4490_v28  ;;  %v5431_v59 = vld [vmem:[#allocation85_spill] sm:$0xff]  ;;  %s2620_s11 = scalar_lea.sflag [#allocation5], %s3503_s23 }
 0x53f   : > { %v2082_v28 = vsel %vm1150_vm13, %v4663_v44, %v5431_v59  ;;  %v2105_v44 = vsel %vm1175_vm14, %v4699_v55, %v4694_v48 }
 0x540   : > { %v1386_v7 = vadd.f32 %v1380_v16, %v1362_v1  ;;  %v5432_v16 = vld [vmem:[#allocation41_spill] sm:$0xff]  ;;  %v2106_v1 = vsel %vm1175_vm14, %v4694_v48, %v5433_v49  ;;  %v2088_v50 = vadd.f32 %v2082_v28, %v4640_v27  ;;  %v2205_v27 = vmul.f32 0.0, %v5408_v51 }
 0x541   : > { %v1621_v21 = vsel %vm1620_vm1, %v5432_v16, %v5424_v9  ;;  %v5434_v9 = vld [vmem:[#allocation82_spill] sm:$0xff]  ;;  %v2129_v48 = vsel %vm1200_vm15, %v4747_v47, %v4743_v57 }
 0x542   : > { %v4762_v19 = vpop.permute.xlu1 %2293  ;;  %1441 = vrot.lane.b32.xlu1 %v1433_v0, %s3263_s16  ;;  %v4766_v22 = vpop.permute.xlu0 %2295  ;;  %v1284_v0 = vsel %vm1100_vm11, %v5427_v38, %v4480_v58  ;;  %v1410_v24 = vadd.f32 %v1404_v18, %v1386_v7  ;;  %v5430_v58 = vld [vmem:[#allocation33_spill] sm:$0xff]  ;;  %v1626_v18 = vmul.f32 %v1621_v21, %v4598_v43  ;;  %v2227_v7 = vsel %vm1100_vm11, %v5434_v9, %v4650_v10  ;;  %v5436_v10 = vld [vmem:[#allocation86_spill] sm:$0xff] }
 0x543   : > { %v1289_v37 = vadd.f32 %v1284_v0, %v1262_v45  ;;  %v5435_v38 = vld [vmem:[#allocation93_spill] sm:$0xff]  ;;  %v2112_v0 = vadd.f32 %v2106_v1, %v2088_v50  ;;  %v2232_v51 = vadd.f32 %v2227_v7, %v2205_v27  ;;  %v1625_v27 = vmul.f32 %v5432_v16, %v4596_v35 }
 0x544   : > { %v1432_v2 = vmul.f32 %v1427_v32, %v1410_v24  ;;  %v2130_v43 = vsel %vm1200_vm15, %v4743_v57, %v5435_v38  ;;  %v1964_v24 = vadd.f32 %v4736_v46, %v1940_v23  ;;  %v2299_v35 = vsel %vm1175_vm14, %v4762_v19, %v4766_v22 }
 0x545   : > { %v1313_v52 = vadd.f32 %v1308_v62, %v1289_v37  ;;  %v2136_v32 = vadd.f32 %v2130_v43, %v2112_v0  ;;  %v1959_v43 = vsel %vm726_vm10, %v4736_v46, %v4738_v34 }
 0x546   : > { %v4782_v8 = vpop.permute.xlu1 %2297  ;;  %1635 = vrot.lane.b32.xlu1 %v1627_v15, %s3264_s15  ;;  %v4785_v41 = vpop.permute.xlu0 %1977  ;;  %v1332_v15 = vsel %vm1150_vm13, %v5430_v58, %v4500_v31 }
 0x547   : > { %v1337_v31 = vadd.f32 %v1332_v15, %v1313_v52  ;;  %v1986_v37 = vmul.f32 %v4785_v41, %v1964_v24  ;;  %v2300_v49 = vsel %vm1175_vm14, %v4766_v22, %v4782_v8  ;;  %v1935_v8 = vsel %vm1200_vm15, %v4679_v60, %v4681_v13 }
 0x548   : > { %v1941_v0 = vadd.f32 %v1935_v8, %v4661_v42  ;;  %v2275_v60 = vsel %vm1150_vm13, %v4714_v29, %v4718_v61  ;;  %v5439_v42 = vld [vmem:[#allocation58_spill] sm:$0xff]  ;;  %v5453_v8 = vld [vmem:[#allocation45_spill] sm:$0xff] }
 0x549   : > { %v2281_v34 = vadd.f32 %v2275_v60, %v5439_v42 }
 0x54a   : > { %v4790_v3 = vpop.permute.xlu1 %1979  ;;  %v4796_v11 = vpop.permute.xlu0 %2147  ;;  %v1965_v46 = vadd.f32 %v1959_v43, %v1941_v0  ;;  %v5456_v0 = vld [vmem:[#allocation54_spill] sm:$0xff] }
 0x54b   : > { %v1988_v4 = vmul.f32 %v4790_v3, %v1966_v36  ;;  %v2087_v36 = vadd.f32 %v2081_v6, %v4642_v20  ;;  %v2251_v20 = vsel %vm1125_vm12, %v5436_v10, %v4672_v17  ;;  %v1982_v13 = vsel %vm1981_vm3, %v4785_v41, %v4790_v3  ;;  %v5438_v10 = vld [vmem:[#allocation56_spill] sm:$0xff] }
 0x54d   : > { %1996 = vrot.lane.b32.xlu0 %v1988_v4, %s3265_s18  ;;  %v1361_v4 = vadd.f32 %v4515_v53, %v1337_v31  ;;  %v2111_v45 = vadd.f32 %v2105_v44, %v2087_v36  ;;  %v2256_v53 = vadd.f32 %v2251_v20, %v2232_v51  ;;  %v2110_v20 = vadd.f32 %v4699_v55, %v5438_v10  ;;  %v5457_v10 = vld [vmem:[#allocation50_spill] sm:$0xff] }
 0x54e   : > { %v2150_v54 = vpop.permute.xlu1 %2149  ;;  %v2152_v26 = vpop.permute.xlu0 %2151  ;;  %v2305_v55 = vadd.f32 %v2299_v35, %v2281_v34  ;;  %v5458_v34 = vld [vmem:[#allocation52_spill] sm:$0xff] }
 0x54f   : > { %v2154_v33 = vsel %vm726_vm10, %v2150_v54, %v2152_v26  ;;  %v2153_v58 = vsel %vm726_vm10, %v4796_v11, %v2150_v54  ;;  %v1385_v15 = vadd.f32 %v4528_v30, %v1361_v4  ;;  %v5437_v26 = vld [vmem:[#allocation90_spill] sm:$0xff]  ;;  %v2258_v54 = vadd.f32 %v4670_v63, %v4646_v5 }
 0x550   : > { %v2160_v52 = vadd.f32 %v2154_v33, %v2136_v32  ;;  %v2276_v59 = vsel %vm1150_vm13, %v4718_v61, %v5437_v26  ;;  %v2280_v6 = vadd.f32 %v4714_v29, %v2256_v53  ;;  %v2134_v61 = vadd.f32 %v4747_v47, %v2110_v20  ;;  %v5444_v53 = vld [vmem:[#allocation26_spill] sm:$0xff] }
 0x551   : > { %1439 = vrot.lane.b32.xlu0 %v1432_v2, %s3263_s16  ;;  %v2135_v2 = vadd.f32 %v2129_v48, %v2111_v45  ;;  %v1409_v17 = vadd.f32 %v4541_v40, %v1385_v15  ;;  %v2282_v40 = vadd.f32 %v2276_v59, %v2258_v54  ;;  %v1987_v29 = vmul.f32 %v1982_v13, %v1965_v46  ;;  %v5442_v15 = vld [vmem:[#allocation42_spill] sm:$0xff] }
 0x552   : > { %v4822_v39 = vpop.permute.xlu1 %2317  ;;  %v4830_v14 = vpop.permute.xlu0 %2319  ;;  %v2158_v3 = vadd.f32 %v4796_v11, %v2134_v61  ;;  %v5441_v11 = vld [vmem:[#allocation19_spill] sm:$0xff] }
 0x553   : > { %v2159_v28 = vadd.f32 %v2153_v58, %v2135_v2  ;;  %v1431_v63 = vmul.f32 %v5429_v25, %v1409_v17  ;;  %v2306_v23 = vadd.f32 %v2300_v49, %v2282_v40  ;;  %v2323_v41 = vsel %vm1200_vm15, %v4822_v39, %v4830_v14  ;;  %v5445_v17 = vld [vmem:[#allocation44_spill] sm:$0xff] }
 0x554   : > { %v1078_v59 = vmul.f32 0.0, %v5441_v11 }
 0x555   : > { %1633 = vrot.lane.b32.xlu0 %v1626_v18, %s3264_s15  ;;  %v2304_v18 = vadd.f32 %v4762_v19, %v2280_v6  ;;  %v2329_v19 = vadd.f32 %v2323_v41, %v2305_v55  ;;  %v5459_v55 = vld [vmem:[#allocation62_spill] sm:$0xff] }
 0x556   : > { %v2322_v62 = vpop.permute.xlu1 %2321  ;;  %v2172_v57 = vpop.permute.xlu0 %2171 }
 0x557   : > { %v2324_v50 = vsel %vm1200_vm15, %v4830_v14, %v2322_v62  ;;  %v2328_v44 = vadd.f32 %v4822_v39, %v2304_v18  ;;  %v2180_v22 = vmul.f32 %v2172_v57, %v2158_v3  ;;  %v5440_v14 = vld [vmem:[#allocation126_spill] sm:$0xff]  ;;  %v1079_v18 = vmul.f32 %v5441_v11, %v4239_v12 }
 0x558   : > { %v2330_v36 = vadd.f32 %v2324_v50, %v2306_v23  ;;  %v1080_v32 = vmul.f32 %v5441_v11, %v5440_v14  ;;  %v1225_v3 = vsel %vm726_vm10, %v5459_v55, %v5456_v0 }
 0x559   : > { %1992 = vrot.lane.b32.xlu0 %v1986_v37, %s3265_s18 }
 0x55a   : > { %v2174_v56 = vpop.permute.xlu1 %2173  ;;  %v2342_v31 = vpop.permute.xlu0 %2341  ;;  %v1108_v2 = vadd.f32 %v5442_v15, %v1080_v32 }
 0x55b   : > { %v2176_v30 = vsel %vm2175_vm2, %v2172_v57, %v2174_v56  ;;  %v2182_v21 = vmul.f32 %v2174_v56, %v2160_v52  ;;  %v2352_v38 = vadd.f32 %v2342_v31, %v2328_v44  ;;  %v5443_v57 = vld [vmem:[#allocation43_spill] sm:$0xff]  ;;  %v5447_v56 = vld [vmem:[#allocation46_spill] sm:$0xff] }
 0x55c   : > { %v2181_v1 = vmul.f32 %v2176_v30, %v2159_v28  ;;  %v1101_v52 = vsel %vm1100_vm11, %v5444_v53, %v5443_v57  ;;  %v1133_v26 = vadd.f32 %v5445_v17, %v1108_v2  ;;  %v5446_v28 = vld [vmem:[#allocation27_spill] sm:$0xff]  ;;  %v1102_v30 = vsel %vm1100_vm11, %v5443_v57, %v5442_v15  ;;  %v5461_v57 = vld [vmem:[#allocation21_spill] sm:$0xff] }
 0x55d   : > { %2190 = vrot.lane.b32.xlu1 %v2182_v21, %s3266_s24  ;;  %v1177_v54 = vsel %vm1175_vm14, %v5447_v56, %v5446_v28  ;;  %v5448_v21 = vld [vmem:[#allocation57_spill] sm:$0xff]  ;;  %v1106_v50 = vadd.f32 %v1101_v52, %v1078_v59  ;;  %v1107_v43 = vadd.f32 %v1102_v30, %v1079_v18  ;;  %v1176_v20 = vsel %vm1175_vm14, %v5457_v10, %v5447_v56 }
 0x55e   : > { %v2344_v5 = vpop.permute.xlu1 %2343  ;;  %2188 = vrot.lane.b32.xlu0 %v2181_v1, %s3266_s24  ;;  %v2346_v9 = vpop.permute.xlu0 %2345  ;;  %v5450_v1 = vld [vmem:[#allocation59_spill] sm:$0xff]  ;;  %vm2386_vm11 = vcmask 998400  }
 0x55f   : > { %v2348_v7 = vsel %vm726_vm10, %v2344_v5, %v2346_v9  ;;  %v2347_v45 = vsel %vm726_vm10, %v2342_v31, %v2344_v5  ;;  %v5449_v31 = vld [vmem:[#allocation28_spill] sm:$0xff]  ;;  %v1158_v40 = vadd.f32 %v5450_v1, %v1133_v26  ;;  %v5451_v5 = vld [vmem:[#allocation29_spill] sm:$0xff]  ;;  %v1127_v9 = vsel %vm1125_vm12, %v5448_v21, %v5445_v17 }
 0x560   : > { %v2354_v24 = vadd.f32 %v2348_v7, %v2330_v36  ;;  %v2353_v62 = vadd.f32 %v2347_v45, %v2329_v19  ;;  %v1126_v49 = vsel %vm1125_vm12, %v5449_v31, %v5448_v21  ;;  %v5454_v7 = vld [vmem:[#allocation25_spill] sm:$0xff]  ;;  %v1132_v13 = vadd.f32 %v1127_v9, %v1107_v43  ;;  %v5460_v45 = vld [vmem:[#allocation20_spill] sm:$0xff] }
 0x561   : > { %1437 = vrot.lane.b32.xlu1 %v1431_v63, %s3263_s16  ;;  %v5452_v63 = vld [vmem:[#allocation60_spill] sm:$0xff]  ;;  %v1151_v36 = vsel %vm1150_vm13, %v5454_v7, %v5453_v8  ;;  %v1248_v53 = vsel %vm1247_vm5, %v5461_v57, %v5460_v45  ;;  %vm2538_vm12 = vcmask 416768   ;;  %s3119_s16 = scalar_lea.vmem %s5055_s12, 4096 }
 0x562   : > { %v2366_v25 = vpop.permute.xlu1 %2365  ;;  %v2368_v4 = vpop.permute.xlu0 %2367  ;;  %v1202_v23 = vsel %vm1200_vm15, %v5452_v63, %v5451_v5  ;;  %v1201_v61 = vsel %vm1200_vm15, %v5458_v34, %v5452_v63  ;;  %p3120_p3 = scmp.ne.s32.totalorder %s5055_s12, %s3119_s16 }
 0x563   : > { %v2374_v48 = vmul.f32 %v2366_v25, %v2352_v38  ;;  %v2376_v16 = vmul.f32 %v2368_v4, %v2354_v24  ;;  %v2370_v33 = vsel %vm2369_vm4, %v2366_v25, %v2368_v4  ;;  %v1183_v38 = vadd.f32 %v1177_v54, %v1158_v40 }
 0x564   : > { %v2375_v47 = vmul.f32 %v2370_v33, %v2353_v62  ;;  %v1131_v25 = vadd.f32 %v1126_v49, %v1106_v50  ;;  %p3121_p5 = pnand %p3120_p3, %p3455_p7 }
 0x565   : > { %1631 = vrot.lane.b32.xlu1 %v1625_v27, %s3264_s15  ;;  %2380 = vrot.lane.b32.xlu0 %v2374_v48, %s3267_s28  ;;  %v5455_v27 = vld [vmem:[#allocation31_spill] sm:$0xff]  ;;  %v1152_v48 = vsel %vm1150_vm13, %v5453_v8, %v5450_v1  ;;  %v1208_v60 = vadd.f32 %v1202_v23, %v1183_v38  ;;  %s3270_s15 = smov [#allocation11]  }
 0x566   : > { %v1226_v12 = vsel %vm726_vm10, %v5456_v0, %v5455_v27  ;;  %v1156_v4 = vadd.f32 %v1151_v36, %v1131_v25  ;;  %v1157_v35 = vadd.f32 %v1152_v48, %v1132_v13  ;;  %vm2192_vm10 = vcmask 1006592   ;;  %p3122_p10 = pneg %p3121_p5 }
 0x567   : > { %v1232_v46 = vadd.f32 %v1226_v12, %v1208_v60  ;;  %v2408_v25 = vstv %s2407_s26 }
 0x569   : > { %1994 = vrot.lane.b32.xlu1 %v1987_v29, %s3265_s18  ;;  %2384 = vrot.lane.b32.xlu0 %v2376_v16, %s3267_s28  ;;  %v1181_v29 = vadd.f32 %v5457_v10, %v1156_v4  ;;  %v1182_v16 = vadd.f32 %v1176_v20, %v1157_v35  ;;  %v1254_v19 = vmul.f32 %v5460_v45, %v1232_v46  ;;  %s3123_s18 = sshll.u32 %s3270_s15, 4  ;;  %s3124_s18 = int_to_ptr.vmem [resolvable:$false] %s3123_s18 }
 0x56a   : > { %p3126_p12 = scmp.lt.s32.totalorder %s5055_s12, %s3124_s18 }
 0x56b   : > { %v1207_v33 = vadd.f32 %v1201_v61, %v1182_v16 }
 0x56d   : > { %2186 = vrot.lane.b32.xlu1 %v2180_v22, %s3266_s24  ;;  %v1206_v22 = vadd.f32 %v5458_v34, %v1181_v29  ;;  %v1231_v11 = vadd.f32 %v1225_v3, %v1207_v33  ;;  %s3125_s24 = scalar_lea.vmem %s3124_s18, 8192 }
 0x56e   : > { %p3127_p1 = scmp.lt.s32.totalorder %s3125_s24, %s3119_s16 }
 0x56f   : > { %v1230_v14 = vadd.f32 %v5459_v55, %v1206_v22  ;;  %v1253_v26 = vmul.f32 %v1248_v53, %v1231_v11 }
 0x570   : > { %p3128_p4 = por %p3127_p1, %p3126_p12 }
 0x571   : > { %2382 = vrot.lane.b32.xlu1 %v2375_v47, %s3267_s28  ;;  %v1252_v59 = vmul.f32 %v5461_v57, %v1230_v14 }
 0x572   : > { %p3129_p13 = pnand %p3128_p4, %p3122_p10 }
 0x5ac   : > { %v4903_v51 = vpop.permute.xlu1 %1802  ;;  %v4905_v39 = vpop.permute.xlu0 %1800 }
 0x5ad   : > { %v1806_v63 = vsel %vm1804_vm8, %v4905_v39, %v4903_v51 }
 0x5b0   : > { %v4909_v37 = vpop.permute.xlu1 %1798 }
 0x5b1   : > { %v1805_v23 = vsel %vm1804_vm8, %v4909_v37, %v4905_v39 }
 0x5b4   : > { %v1442_v44 = vpop.permute.xlu1 %1441 }
 0x5b5   : > { %v1451_v47 = vadd.f32 %v1442_v44, %v1254_v19 }
 0x5b8   : > { %v1636_v42 = vpop.permute.xlu1 %1635 }
 0x5b9   : > { %v1645_v32 = vadd.f32 %v1636_v42, %v1451_v47 }
 0x5bb   : > { %v1812_v28 = vadd.f32 %v4903_v51, %v1645_v32 }
 0x5bf   : > { %v4911_v58 = vpop.permute.xlu0 %1996 }
 0x5c0   : > { %v2006_v49 = vadd.f32 %v4911_v58, %v1812_v28 }
 0x5c3   : > { %v1440_v6 = vpop.permute.xlu0 %1439 }
 0x5c4   : > { %v1445_v52 = vsel %vm1443_vm6, %v1440_v6, %v1442_v44 }
 0x5c5   : > { %v1450_v54 = vadd.f32 %v1445_v52, %v1253_v26 }
 0x5c7   : > { %v1634_v24 = vpop.permute.xlu0 %1633 }
 0x5c8   : > { %v1639_v56 = vsel %vm1637_vm7, %v1634_v24, %v1636_v42 }
 0x5c9   : > { %v1644_v40 = vadd.f32 %v1639_v56, %v1450_v54  ;;  %v5463_v56 = vld [vmem:[#allocation18_spill] sm:$0xff] }
 0x5cb   : > { %v1993_v41 = vpop.permute.xlu0 %1992  ;;  %v1811_v7 = vadd.f32 %v1806_v63, %v1644_v40 }
 0x5cf   : > { %v2191_v62 = vpop.permute.xlu1 %2190 }
 0x5d0   : > { %v2189_v15 = vpop.permute.xlu0 %2188 }
 0x5d1   : > { %v2194_v48 = vsel %vm2192_vm10, %v2189_v15, %v2191_v62 }
 0x5d3   : > { %v1438_v2 = vpop.permute.xlu1 %1437 }
 0x5d4   : > { %v1444_v17 = vsel %vm1443_vm6, %v1438_v2, %v1440_v6  ;;  %v2200_v6 = vadd.f32 %v2191_v62, %v2006_v49  ;;  %v3268_v62 = vmov 1966171168  }
 0x5d5   : > { %v1449_v30 = vadd.f32 %v1444_v17, %v1252_v59  ;;  %v2435_v47 = vunpack.c.l.s4 %v3268_v62  ;;  %v5477_v62 = vld [vmem:[#allocation103_spill] sm:$0xff] }
 0x5d7   : > { %v1632_v21 = vpop.permute.xlu1 %1631  ;;  %v2381_v31 = vpop.permute.xlu0 %2380  ;;  %v2436_v14 = vunpack.c.0.s8 %v2435_v47 }
 0x5d8   : > { %v1638_v1 = vsel %vm1637_vm7, %v1632_v21, %v1634_v24 }
 0x5d9   : > { %v1643_v18 = vadd.f32 %v1638_v1, %v1449_v30  ;;  %v5464_v30 = vld [vmem:[#allocation17_spill] sm:$0xff]  ;;  %v5465_v1 = vld [vmem:[#allocation38_spill] sm:$0xff] }
 0x5db   : > { %v1995_v50 = vpop.permute.xlu1 %1994  ;;  %v2385_v5 = vpop.permute.xlu0 %2384  ;;  %v1810_v8 = vadd.f32 %v1805_v23, %v1643_v18 }
 0x5dc   : > { %v2000_v44 = vsel %vm1998_vm9, %v1995_v50, %v4911_v58  ;;  %v2394_v9 = vadd.f32 %v2385_v5, %v2200_v6  ;;  %v1999_v36 = vsel %vm1998_vm9, %v1993_v41, %v1995_v50 }
 0x5dd   : > { %v2005_v43 = vadd.f32 %v2000_v44, %v1811_v7  ;;  %v2004_v24 = vadd.f32 %v1999_v36, %v1810_v8 }
 0x5de   : > { %v2400_v38 = vrot.slane %v2394_v9, 4 }
 0x5df   : > { %v2187_v27 = vpop.permute.xlu1 %2186  ;;  %v2199_v39 = vadd.f32 %v2194_v48, %v2005_v43 }
 0x5e0   : > { %v2406_v0 = vadd.f32 %v2400_v38, %v2394_v9  ;;  %v2193_v12 = vsel %vm2192_vm10, %v2187_v27, %v2189_v15  ;;  %v5462_v15 = vld [vmem:[#allocation16_spill] sm:$0xff] }
 0x5e1   : > { %v2198_v60 = vadd.f32 %v2193_v12, %v2004_v24  ;;  %v2439_v2 = vsub.s32 %v2436_v14, %v5462_v15  ;;  %v5468_v24 = vld [vmem:[#allocation98_spill] sm:$0xff] }
 0x5e2   : > { %v2411_v51 = vadd.f32 %v2408_v25, %v2406_v0  ;;  %v5467_v0 = vld [vmem:[#allocation94_spill] sm:$0xff] }
 0x5e3   : > { %v2383_v13 = vpop.permute.xlu1 %2382  ;;  %v5478_v14 = vld [vmem:[#allocation106_spill] sm:$0xff] }
 0x5e4   : > { %v2387_v37 = vsel %vm2386_vm11, %v2381_v31, %v2383_v13  ;;  %v2388_v58 = vsel %vm2386_vm11, %v2383_v13, %v2385_v5  ;;  %v2759_v20 = vmul.f32 -1.442695, %v2411_v51  ;;  %v5469_v51 = vld [vmem:[#allocation100_spill] sm:$0xff] }
 0x5e5   : > { %v2392_v4 = vadd.f32 %v2387_v37, %v2198_v60  ;;  %v2393_v10 = vadd.f32 %v2388_v58, %v2199_v39  ;;  %v5470_v58 = vld [vmem:[#allocation97_spill] sm:$0xff] }
 0x5e6   : > { %2974 = vpow2.f32 %v2759_v20 }
 0x5e7   : > { %v2398_v46 = vrot.slane %v2392_v4, 4  ;;  %v2399_v35 = vrot.slane %v2393_v10, 4 }
 0x5e9   : > { %v2404_v42 = vadd.f32 %v2398_v46, %v2392_v4  ;;  %v2405_v34 = vadd.f32 %v2399_v35, %v2393_v10  ;;  %v5471_v10 = vld [vmem:[#allocation95_spill] sm:$0xff] }
 0x5ea   : > { %v5472_v46 = vld [vmem:[#allocation99_spill] sm:$0xff] }
 0x5eb   : > { %v2409_v61 = vadd.f32 %v2408_v25, %v2404_v42  ;;  %v2410_v29 = vadd.f32 %v2408_v25, %v2405_v34  ;;  %v5466_v25 = vld [vmem:[#allocation96_spill] sm:$0xff]  ;;  %v5473_v42 = vld [vmem:[#allocation101_spill] sm:$0xff] }
 0x5ed   : > { %v2757_v16 = vmul.f32 -1.442695, %v2409_v61  ;;  %v2758_v41 = vmul.f32 -1.442695, %v2410_v29 }
 0x5ef   : > { %2976 = vpow2.f32 %v2757_v16 }
 0x5f0   : > { %2978 = vpow2.f32 %v2758_v41  ;;  %v2975_v55 = vpop.eup %2974 }
 0x5f1   : > { %v2423_v3 = vadd.f32 1.0, %v2975_v55  ;;  %v5474_v55 = vld [vmem:[#allocation104_spill] sm:$0xff] }
 0x5f3   : > { %2980 = vrcp.f32 %v2423_v3 }
 0x5f9   : > { %v2977_v45 = vpop.eup %2976 }
 0x5fa   : > { %v2979_v19 = vpop.eup %2978  ;;  %v2421_v22 = vadd.f32 1.0, %v2977_v45  ;;  %v5475_v45 = vld [vmem:[#allocation105_spill] sm:$0xff] }
 0x5fb   : > { %v2422_v33 = vadd.f32 1.0, %v2979_v19 }
 0x5fc   : > { %2982 = vrcp.f32 %v2421_v22  ;;  %v5476_v22 = vld [vmem:[#allocation102_spill] sm:$0xff] }
 0x5fd   : > { %2984 = vrcp.f32 %v2422_v33  ;;  %v2981_v11 = vpop.eup %2980 }
 0x5fe   : > { %v2447_v17 = vrot.slane %v2981_v11, %v2439_v2 }
 0x606   : > { %v2983_v32 = vpop.eup %2982 }
 0x607   : > { %v2985_v57 = vpop.eup %2984 }
 0x608   : > { %v2433_v53 = vcombine.low %v2983_v32, %v2985_v57  ;;  %v5479_v32 = vld [vmem:[#allocation107_spill] sm:$0xff] }
 0x60a   : > { %v2440_v52 = vrot.slane %v2433_v53, %v2439_v2  ;;  %v5481_v53 = vld [vmem:[#allocation109_spill] sm:$0xff] }
 0x60c   : > { %v2448_v26 = vcombine.low %v2440_v52, %v2447_v17  ;;  %v2449_v59 = vcombine.high %v2440_v52, %v2447_v17 }
 0x60e   : > { %v2456_v28 = vrot.slane %v2448_v26, %v2439_v2  ;;  %v2463_v31 = vrot.slane %v2449_v59, %v2439_v2  ;;  %v5480_v2 = vld [vmem:[#allocation108_spill] sm:$0xff] }
 0x610   : > { %v2473_v54 = vrot.slane %v2456_v28, %v5463_v56  ;;  %v2469_v21 = vrot.slane %v2456_v28, %v5464_v30  ;;  %v2481_v49 = vrot.slane %v2463_v31, %v5464_v30  ;;  %v2477_v40 = vrot.slane %v2456_v28, %v5465_v1 }
 0x611   : > { %v2489_v18 = vrot.slane %v2463_v31, %v5465_v1  ;;  %v2485_v6 = vrot.slane %v2463_v31, %v5463_v56  ;;  %v2464_v50 = vcombine.high %v2456_v28, %v2456_v28  ;;  %v2465_v23 = vcombine.high %v2463_v31, %v2463_v31  ;;  %v5482_v28 = vld [vmem:[#allocation110_spill] sm:$0xff] }
 0x612   : > { %2516 = vrot.lane.b32.xlu0 %v2473_v54, %s3269_s25  ;;  %2514 = vrot.lane.b32.xlu1 %v2469_v21, %s3269_s25  ;;  %v5483_v54 = vld [vmem:[#allocation112_spill] sm:$0xff]  ;;  %v5484_v21 = vld [vmem:[#allocation114_spill] sm:$0xff] }
 0x613   : > { %v2497_v5 = vrot.slane %v2464_v50, %v5463_v56  ;;  %v2493_v63 = vrot.slane %v2464_v50, %v5464_v30  ;;  %v2505_v44 = vrot.slane %v2465_v23, %v5464_v30  ;;  %v2501_v9 = vrot.slane %v2464_v50, %v5465_v1  ;;  %v5486_v50 = vld [vmem:[#allocation111_spill] sm:$0xff] }
 0x614   : > { %v2513_v8 = vrot.slane %v2465_v23, %v5465_v1  ;;  %v2509_v7 = vrot.slane %v2465_v23, %v5463_v56 }
 0x616   : > { %2520 = vrot.lane.b32.xlu0 %v2481_v49, %s3269_s25  ;;  %2518 = vrot.lane.b32.xlu1 %v2477_v40, %s3269_s25  ;;  %v5485_v49 = vld [vmem:[#allocation116_spill] sm:$0xff] }
 0x61a   : > { %2524 = vrot.lane.b32.xlu0 %v2489_v18, %s3269_s25  ;;  %2522 = vrot.lane.b32.xlu1 %v2485_v6, %s3269_s25 }
 0x61e   : > { %2528 = vrot.lane.b32.xlu0 %v2497_v5, %s3269_s25  ;;  %2526 = vrot.lane.b32.xlu1 %v2493_v63, %s3269_s25  ;;  %v5487_v63 = vld [vmem:[#allocation113_spill] sm:$0xff] }
 0x622   : > { %2532 = vrot.lane.b32.xlu0 %v2505_v44, %s3269_s25  ;;  %2530 = vrot.lane.b32.xlu1 %v2501_v9, %s3269_s25  ;;  %v5488_v44 = vld [vmem:[#allocation115_spill] sm:$0xff] }
 0x626   : > { %2536 = vrot.lane.b32.xlu0 %v2513_v8, %s3269_s25  ;;  %2534 = vrot.lane.b32.xlu1 %v2509_v7, %s3269_s25  ;;  %v5489_v8 = vld [vmem:[#allocation117_spill] sm:$0xff] }
 0x684   : > { %v2517_v36 = vpop.permute.xlu0 %2516  ;;  %v2515_v38 = vpop.permute.xlu1 %2514 }
 0x685   : > { %v2539_v43 = vsel %vm2538_vm12, %v2515_v38, %v2517_v36 }
 0x686   : > { %v2555_v27 = vmul.f32 %v2539_v43, %v5466_v25  ;;  %v2557_v12 = vmul.f32 %v2539_v43, %v5467_v0  ;;  %v2559_v48 = vmul.f32 %v2539_v43, %v5468_v24  ;;  %v2561_v60 = vmul.f32 %v2539_v43, %v5469_v51 }
 0x688   : > { %2587 = vst [vmem:[%s4991_s22] sm:$0xff] %v2555_v27  ;;  %2589 = vst [vmem:[%s4991_s22 + $0x10] sm:$0xff] %v2557_v12  ;;  %v2521_v13 = vpop.permute.xlu0 %2520  ;;  %v2519_v39 = vpop.permute.xlu1 %2518  ;;  %v5490_v27 = vld [vmem:[#allocation118_spill] sm:$0xff]  ;;  %v5491_v12 = vld [vmem:[#allocation119_spill] sm:$0xff] }
 0x689   : > { %2591 = vst [vmem:[%s4991_s22 + $0x20] sm:$0xff] %v2559_v48  ;;  %2593 = vst [vmem:[%s4991_s22 + $0x30] sm:$0xff] %v2561_v60  ;;  %v2540_v37 = vsel %vm2538_vm12, %v2517_v36, %v2519_v39  ;;  %v5492_v48 = vld [vmem:[#allocation120_spill] sm:$0xff]  ;;  %v5493_v60 = vld [vmem:[#allocation121_spill] sm:$0xff] }
 0x68a   : > { %v2556_v4 = vmul.f32 %v2540_v37, %v5470_v58  ;;  %v2558_v20 = vmul.f32 %v2540_v37, %v5471_v10  ;;  %v2560_v35 = vmul.f32 %v2540_v37, %v5472_v46  ;;  %v2562_v34 = vmul.f32 %v2540_v37, %v5473_v42  ;;  %v5494_v39 = vld [vmem:[#allocation122_spill] sm:$0xff]  ;;  %v5495_v58 = vld [vmem:[#allocation123_spill] sm:$0xff]  ;;  %v5496_v10 = vld [vmem:[#allocation124_spill] sm:$0xff] }
 0x68b   : > { %v5497_v46 = vld [vmem:[#allocation125_spill] sm:$0xff] }
 0x68c   : > { %2588 = vst [vmem:[%s4991_s22 + $0x8] sm:$0xff] %v2556_v4  ;;  %2590 = vst [vmem:[%s4991_s22 + $0x18] sm:$0xff] %v2558_v20  ;;  %v2525_v61 = vpop.permute.xlu0 %2524  ;;  %v2523_v29 = vpop.permute.xlu1 %2522 }
 0x68d   : > { %2592 = vst [vmem:[%s4991_s22 + $0x28] sm:$0xff] %v2560_v35  ;;  %2594 = vst [vmem:[%s4991_s22 + $0x38] sm:$0xff] %v2562_v34  ;;  %v2541_v16 = vsel %vm2538_vm12, %v2521_v13, %v2523_v29  ;;  %v2542_v41 = vsel %vm2538_vm12, %v2523_v29, %v2525_v61 }
 0x68e   : > { %v2563_v3 = vmul.f32 %v2541_v16, %v5474_v55  ;;  %v2564_v19 = vmul.f32 %v2542_v41, %v5475_v45  ;;  %v2565_v33 = vmul.f32 %v2541_v16, %v5476_v22  ;;  %v2566_v47 = vmul.f32 %v2542_v41, %v5477_v62 }
 0x68f   : > { %v2567_v11 = vmul.f32 %v2541_v16, %v5478_v14  ;;  %v2568_v15 = vmul.f32 %v2542_v41, %v5479_v32  ;;  %v2569_v57 = vmul.f32 %v2541_v16, %v5480_v2  ;;  %v2570_v52 = vmul.f32 %v2542_v41, %v5481_v53 }
 0x690   : > { %2595 = vst [vmem:[%s4991_s22 + $0x40] sm:$0xff] %v2563_v3  ;;  %2596 = vst [vmem:[%s4991_s22 + $0x48] sm:$0xff] %v2564_v19  ;;  %v2529_v17 = vpop.permute.xlu0 %2528  ;;  %v2527_v26 = vpop.permute.xlu1 %2526 }
 0x691   : > { %2597 = vst [vmem:[%s4991_s22 + $0x50] sm:$0xff] %v2565_v33  ;;  %2598 = vst [vmem:[%s4991_s22 + $0x58] sm:$0xff] %v2566_v47  ;;  %v2543_v59 = vsel %vm2538_vm12, %v2527_v26, %v2529_v17 }
 0x692   : > { %2599 = vst [vmem:[%s4991_s22 + $0x60] sm:$0xff] %v2567_v11  ;;  %2600 = vst [vmem:[%s4991_s22 + $0x68] sm:$0xff] %v2568_v15  ;;  %v2571_v56 = vmul.f32 %v2543_v59, %v5482_v28  ;;  %v2573_v30 = vmul.f32 %v2543_v59, %v5483_v54  ;;  %v2575_v31 = vmul.f32 %v2543_v59, %v5484_v21 }
 0x693   : > { %2601 = vst [vmem:[%s4991_s22 + $0x70] sm:$0xff] %v2569_v57  ;;  %2602 = vst [vmem:[%s4991_s22 + $0x78] sm:$0xff] %v2570_v52  ;;  %v2577_v1 = vmul.f32 %v2543_v59, %v5485_v49 }
 0x694   : > { %2603 = vst [vmem:[%s4991_s22 + $0x80] sm:$0xff] %v2571_v56  ;;  %2605 = vst [vmem:[%s4991_s22 + $0x90] sm:$0xff] %v2573_v30  ;;  %v2533_v40 = vpop.permute.xlu0 %2532  ;;  %v2531_v18 = vpop.permute.xlu1 %2530 }
 0x695   : > { %2607 = vst [vmem:[%s4991_s22 + $0xa0] sm:$0xff] %v2575_v31  ;;  %2609 = vst [vmem:[%s4991_s22 + $0xb0] sm:$0xff] %v2577_v1  ;;  %v2544_v6 = vsel %vm2538_vm12, %v2529_v17, %v2531_v18 }
 0x696   : > { %v2572_v5 = vmul.f32 %v2544_v6, %v5486_v50  ;;  %v2574_v23 = vmul.f32 %v2544_v6, %v5487_v63  ;;  %v2576_v9 = vmul.f32 %v2544_v6, %v5488_v44  ;;  %v2578_v7 = vmul.f32 %v2544_v6, %v5489_v8 }
 0x698   : > { %2604 = vst [vmem:[%s4991_s22 + $0x88] sm:$0xff] %v2572_v5  ;;  %2606 = vst [vmem:[%s4991_s22 + $0x98] sm:$0xff] %v2574_v23  ;;  %v2537_v36 = vpop.permute.xlu0 %2536  ;;  %v2535_v38 = vpop.permute.xlu1 %2534 }
 0x699   : > { %2608 = vst [vmem:[%s4991_s22 + $0xa8] sm:$0xff] %v2576_v9  ;;  %2610 = vst [vmem:[%s4991_s22 + $0xb8] sm:$0xff] %v2578_v7  ;;  %v2545_v43 = vsel %vm2538_vm12, %v2533_v40, %v2535_v38  ;;  %v2546_v25 = vsel %vm2538_vm12, %v2535_v38, %v2537_v36 }
 0x69a   : > { %v2579_v0 = vmul.f32 %v2545_v43, %v5490_v27  ;;  %v2580_v24 = vmul.f32 %v2546_v25, %v5491_v12  ;;  %v2581_v51 = vmul.f32 %v2545_v43, %v5492_v48  ;;  %v2582_v13 = vmul.f32 %v2546_v25, %v5493_v60 }
 0x69b   : > { %v2583_v37 = vmul.f32 %v2545_v43, %v5494_v39  ;;  %v2584_v4 = vmul.f32 %v2546_v25, %v5495_v58  ;;  %v2585_v20 = vmul.f32 %v2545_v43, %v5496_v10  ;;  %v2586_v35 = vmul.f32 %v2546_v25, %v5497_v46 }
 0x69c   : > { %2611 = vst [vmem:[%s4991_s22 + $0xc0] sm:$0xff] %v2579_v0  ;;  %2612 = vst [vmem:[%s4991_s22 + $0xc8] sm:$0xff] %v2580_v24 }
 0x69d   : > { %2613 = vst [vmem:[%s4991_s22 + $0xd0] sm:$0xff] %v2581_v51  ;;  %2614 = vst [vmem:[%s4991_s22 + $0xd8] sm:$0xff] %v2582_v13 }
 0x69e   : > { %2615 = vst [vmem:[%s4991_s22 + $0xe0] sm:$0xff] %v2583_v37  ;;  %2616 = vst [vmem:[%s4991_s22 + $0xe8] sm:$0xff] %v2584_v4 }
 0x69f   : > { %2617 = vst [vmem:[%s4991_s22 + $0xf0] sm:$0xff] %v2585_v20  ;;  %2618 = vst [vmem:[%s4991_s22 + $0xf8] sm:$0xff] %v2586_v35 }
 0x6a0   : > { %3132 = shalt.err (!%p3129_p13)
}
 0x6a1   : > { %s3133_s28 = scalar_lea.hbm %s5053_s19, 4096  ;;  %s3137_s22 = scalar_lea.hbm %s5119_s8, 8192 }
 0x6a2   : > { %p3134_p9 = scmp.ne.s32.totalorder %s5053_s19, %s3133_s28  ;;  %p3138_p6 = scmp.lt.u32.totalorder %s5053_s19, %s5119_s8 }
 0x6a3   : > { %p3139_p8 = scmp.lt.u32.totalorder %s3137_s22, %s3133_s28  ;;  %p3141_p3 = scmp.lt.u32.totalorder %s3133_s28, %s5053_s19 }
 0x6a4   : > { %p3135_p2 = pnand %p3134_p9, %p3455_p7 }
 0x6a5   : > { %p3140_p0 = por %p3139_p8, %p3138_p6 }
 0x6a6   : > { %p3136_p11 = pneg %p3135_p2 }
 0x6a7   : > { %p3142_p5 = por %p3141_p3, %p3140_p0 }
 0x6a9   : > { %p3143_p10 = pnand %p3142_p5, %p3136_p11 }
 0x6ab   : > { %3146 = shalt.err (!%p3143_p10)
}
 0x6ac   : > { %s3271_s14 = smov 256   ;;  %s3272_s16 = smov 16  }
 0x6ad   : > { %2784 = dma.vmem_to_hbm [thread:$0]  (%p3455_p7), %s5055_s12, 4096, %s5053_s19, %s2620_s11, %s3271_s14, %s3271_s14, %s3272_s16  }
 0x6ae PF: > { %s2649_s15 = sand.u32 1, %s3181_s29   ;;  %p5498_p12 = scmp.ne.s32.totalorder %s5234_s13, 0 }
 0x6af   : > { %p5499_p1 = scmp.ge.s32.totalorder %s3193_s10, 2  ;;  %s2650_s18 = scalar_lea.sflag [#allocation5], %s2649_s15 }
 0x6b1   : > { %p2801_p4 = pnand %p5499_p1, %p5498_p12 }
 0x6b3   : > { %3176 = dma.done.wait (!%p2801_p4), %s2650_s18, 4096  }
 0x6b4   : > { %3178 = vsyncadd (!%p2801_p4), %s2650_s18, 4294963200  ;;  %p24_p13 = scmp.ge.s32.totalorder %s3377_s20, 4   ;;  %s5500_s29 = smov %s3185_s30 }
 0x6b5   : > { %s5501_s30 = smov %s3189_s9  ;;  %s5502_s9 = smov %s3451_s17 }
 0x6b6   : > { %s5503_s10 = smov %s3377_s20  ;;  %26 = sbr.rel (!%p24_p13) target bundleno = 9 (0x9), region = 110 }
 0x6bd   :  { %2655 = vsyncpa [#allocation4], 1 }
 0x6be   :  { %2657 = vsyncpa [#allocation4 + $0x1], 1 }
 0x6bf   :  { %2658 = vsyncpa [#allocation9], 1 }
 0x6c0   :  { %2659 = vsyncpa [#allocation5], 1 }
 0x6c1   :  { %2661 = vsyncpa [#allocation5 + $0x1], 1 }
 0x6c2   :  { %2662 = vsyncpa [#allocation6], 1 }
 0x6c3   :  { %2664 = vsyncpa [#allocation6 + $0x1], 1 }

</bundles_post_ra>
